<compile_context>
chip_gen: v7x
topology: tpu7x:2x2x1
jax: 0.10.0
libtpu: 0.0.40
codegen_flags: <defaults>
</compile_context>

<pallas_src>
import functools

import jax
import jax.numpy as jnp
from jax.experimental import pallas as pl
from jax.experimental.pallas import tpu as pltpu

EPS = 1e-5     # BatchNorm2d default eps
LANE = 128     # TPU lane width; channel dims padded to multiples of this


# --------------------------------------------------------------------------- #
# Kernels
# --------------------------------------------------------------------------- #
def _conv1x1_stats_kernel(x_ref, w_ref, y_ref, stats_ref):
    """1x1 conv as a pixels-x-channels matmul, plus per-block partial BN stats
    (sum, sum_sq) of the f32 conv output.  Output stored as bf16."""
    nb, hh, ww, cin = x_ref.shape
    cout = w_ref.shape[1]
    m = nb * hh * ww

    x = x_ref[...].reshape(m, cin).astype(jnp.bfloat16)
    y = jnp.dot(x, w_ref[...], preferred_element_type=jnp.float32)

    y_ref[...] = y.reshape(nb, hh, ww, cout).astype(y_ref.dtype)
    s = jnp.sum(y, axis=0, keepdims=True)
    ss = jnp.sum(y * y, axis=0, keepdims=True)
    stats_ref[...] = jnp.concatenate([s, ss], axis=0)[None]          # (1, 2, cout)


def _bn_relu_conv1x1_stats_kernel(y_in_ref, sc_ref, sh_ref, w_ref, y_ref,
                                  stats_ref):
    """BN (per-channel affine) + ReLU of the bf16 input, then 1x1 conv,
    plus per-block partial BN stats of the f32 conv output."""
    nb, hh, ww, cin = y_in_ref.shape
    cout = w_ref.shape[1]
    m = nb * hh * ww

    a = jnp.maximum(
        y_in_ref[...].reshape(m, cin).astype(jnp.float32) * sc_ref[...]
        + sh_ref[...], 0.0)
    y = jnp.dot(a.astype(jnp.bfloat16), w_ref[...],
                preferred_element_type=jnp.float32)

    y_ref[...] = y.reshape(nb, hh, ww, cout).astype(y_ref.dtype)
    s = jnp.sum(y, axis=0, keepdims=True)
    ss = jnp.sum(y * y, axis=0, keepdims=True)
    stats_ref[...] = jnp.concatenate([s, ss], axis=0)[None]


def _bn_relu_convkxk_stats_kernel(k, y1_ref, sc_ref, sh_ref, w_ref,
                                  y2_ref, stats_ref, pad_ref):
    """BN+ReLU of y1, then kxk stride-1 'same' conv.

    The activated input is written once into a width-padded bf16 scratch
    (padded width a multiple of 8).  Per dx we accumulate k K=cin matmuls over
    the contiguous full-width row slab (row slices are outer-dim slices, so no
    relayout), then add one dx-shifted f32 slice of the wide result.  Also emits
    per-block partial BN stats of the f32 conv output."""
    nb, hh, ww, cin = y1_ref.shape
    cout = w_ref.shape[3]
    p = (k - 1) // 2
    wbuf = pad_ref.shape[2]
    m = nb * hh * ww
    mw = nb * hh * wbuf

    a1 = jnp.maximum(
        y1_ref[...].astype(jnp.float32) * sc_ref[...] + sh_ref[...], 0.0)

    # Zero ONLY the halo rows/columns (cheap, idempotent -> safe under "parallel"
    # megacore partitioning where scratch is per-core); the interior is fully
    # overwritten every grid step.
    if p > 0:
        pad_ref[:, :p, :, :] = jnp.zeros((nb, p, wbuf, cin), pad_ref.dtype)
        pad_ref[:, p + hh:, :, :] = jnp.zeros((nb, p, wbuf, cin), pad_ref.dtype)
        pad_ref[:, :, :p, :] = jnp.zeros((nb, hh + 2 * p, p, cin), pad_ref.dtype)
    if wbuf > p + ww:
        pad_ref[:, :, p + ww:, :] = jnp.zeros(
            (nb, hh + 2 * p, wbuf - p - ww, cin), pad_ref.dtype)
    pad_ref[:, p:p + hh, p:p + ww, :] = a1.astype(pad_ref.dtype)

    y2 = None
    for dx in range(k):
        acc = None
        for dy in range(k):
            # Outer-dim row slice -> contiguous; K = cin (MXU-native on v5e).
            slab = pad_ref[:, dy:dy + hh, :, :].reshape(mw, cin)
            c = jnp.dot(slab, w_ref[dy, dx], preferred_element_type=jnp.float32)
            acc = c if acc is None else acc + c
        acc4 = acc.reshape(nb, hh, wbuf, cout)
        contrib = acc4[:, :, dx:dx + ww, :]          # one shifted f32 slice per dx
        y2 = contrib if y2 is None else y2 + contrib

    y2_ref[...] = y2.astype(y2_ref.dtype)
    y2f = y2.reshape(m, cout)
    s = jnp.sum(y2f, axis=0, keepdims=True)
    ss = jnp.sum(y2f * y2f, axis=0, keepdims=True)
    stats_ref[...] = jnp.concatenate([s, ss], axis=0)[None]


def _bn_residual_relu_kernel(y_ref, sc_ref, sh_ref, x_ref, o_ref):
    """Final BN (per-channel affine) of bf16 y3 + residual add (f32 x) + ReLU."""
    nb, hh, ww, c = y_ref.shape
    m = nb * hh * ww
    y = y_ref[...].reshape(m, c).astype(jnp.float32) * sc_ref[...] + sh_ref[...]
    out = jnp.maximum(y + x_ref[...].reshape(m, c), 0.0)
    o_ref[...] = out.reshape(nb, hh, ww, c).astype(o_ref.dtype)


# --------------------------------------------------------------------------- #
# VMEM sizing helpers
# --------------------------------------------------------------------------- #
def _round_up(x, mult):
    return (x + mult - 1) // mult * mult


@functools.lru_cache(maxsize=1)
def _vmem_capacity_bytes():
    try:
        cap = int(pltpu.get_tpu_info().vmem_capacity_bytes)
        if cap <= 0:
            raise ValueError("bad vmem capacity")
        return cap
    except Exception:
        return 128 * 1024 * 1024


def _vmem_limit_bytes():
    # ~75% of physical per-core VMEM: ~48 MiB on v7x, ~96 MiB on v5e/v6e,
    # leaving headroom for Mosaic internal scratch.
    return max(32 * 1024 * 1024, (_vmem_capacity_bytes() * 3) // 4)


def _compiler_params():
    return pltpu.CompilerParams(dimension_semantics=("parallel",),
                                vmem_limit_bytes=_vmem_limit_bytes())


def _stage_footprint_bytes(n, H, W, Cp, F1p, F2p, k):
    """Rough max-over-stages VMEM footprint for a block of n images:
    double-buffered in/out blocks + scratch + the main in-kernel temporaries."""
    p = (k - 1) // 2
    wbuf = _round_up(W + 2 * p, 8)
    m = n * H * W
    mw = n * H * wbuf
    w_bytes = 2 * (Cp * F1p + k * k * F1p * F2p + F2p * Cp)   # bf16 weights
    # stage 1: x f32 in (2x), y1 bf16 out (2x), bf16 cast of x, f32 accumulator
    s1 = 2 * m * Cp * 4 + 2 * m * F1p * 2 + m * Cp * 2 + m * F1p * 4
    # stage 2: y1 bf16 in (2x), y2 bf16 out (2x), pad scratch, f32 act,
    #          wide f32 accumulator, f32 output accumulator
    s2 = (2 * m * F1p * 2 + 2 * m * F2p * 2
          + n * (H + 2 * p) * wbuf * F1p * 2
          + m * F1p * 4 + mw * F2p * 4 + m * F2p * 4)
    # stage 3: y2 bf16 in (2x), y3 bf16 out (2x), f32 act, bf16 act, f32 acc
    s3 = 2 * m * F2p * 2 + 2 * m * Cp * 2 + m * F2p * 4 + m * F2p * 2 + m * Cp * 4
    # stage 4: y3 bf16 (2x) + x f32 (2x) in, out f32 (2x), f32 temp
    s4 = 2 * m * Cp * 2 + 2 * m * Cp * 4 + 2 * m * Cp * 4 + m * Cp * 4
    return max(s1, s2, s3, s4) + w_bytes


def _pick_n_blk(N, H, W, Cp, F1p, F2p, k):
    """Largest divisor of N whose estimated per-stage footprint fits the budget."""
    budget = int(_vmem_limit_bytes() * 0.8)
    best = 1
    for d in range(1, N + 1):
        if N % d == 0 and _stage_footprint_bytes(d, H, W, Cp, F1p, F2p, k) <= budget:
            best = d
    return best


# --------------------------------------------------------------------------- #
# pallas_call wrappers
# --------------------------------------------------------------------------- #
def _blk4(n_blk, hh, ww, c):
    return pl.BlockSpec((n_blk, hh, ww, c), lambda i: (i, 0, 0, 0))


def _full_spec(shape):
    ndim = len(shape)
    return pl.BlockSpec(shape, lambda *_: (0,) * ndim)


def _conv1x1_call(x, w, *, n_blk):
    N, hh, ww, cin = x.shape
    cout = w.shape[1]
    g = N // n_blk
    return pl.pallas_call(
        _conv1x1_stats_kernel,
        grid=(g,),
        in_specs=[_blk4(n_blk, hh, ww, cin), _full_spec((cin, cout))],
        out_specs=[_blk4(n_blk, hh, ww, cout),
                   pl.BlockSpec((1, 2, cout), lambda i: (i, 0, 0))],
        out_shape=(jax.ShapeDtypeStruct((N, hh, ww, cout), jnp.bfloat16),
                   jax.ShapeDtypeStruct((g, 2, cout), jnp.float32)),
        compiler_params=_compiler_params(),
    )(x, w)


def _bn_relu_conv1x1_call(y_in, sc, sh, w, *, n_blk):
    N, hh, ww, cin = y_in.shape
    cout = w.shape[1]
    g = N // n_blk
    return pl.pallas_call(
        _bn_relu_conv1x1_stats_kernel,
        grid=(g,),
        in_specs=[_blk4(n_blk, hh, ww, cin),
                  _full_spec((1, cin)), _full_spec((1, cin)),
                  _full_spec((cin, cout))],
        out_specs=[_blk4(n_blk, hh, ww, cout),
                   pl.BlockSpec((1, 2, cout), lambda i: (i, 0, 0))],
        out_shape=(jax.ShapeDtypeStruct((N, hh, ww, cout), jnp.bfloat16),
                   jax.ShapeDtypeStruct((g, 2, cout), jnp.float32)),
        compiler_params=_compiler_params(),
    )(y_in, sc, sh, w)


def _convkxk_call(y1, sc, sh, w, *, k, n_blk):
    N, hh, ww, cin = y1.shape
    cout = w.shape[3]
    p = (k - 1) // 2
    wbuf = _round_up(ww + 2 * p, 8)
    g = N // n_blk
    kern = functools.partial(_bn_relu_convkxk_stats_kernel, k)
    return pl.pallas_call(
        kern,
        grid=(g,),
        in_specs=[_blk4(n_blk, hh, ww, cin),
                  _full_spec((1, cin)), _full_spec((1, cin)),
                  _full_spec((k, k, cin, cout))],
        out_specs=[_blk4(n_blk, hh, ww, cout),
                   pl.BlockSpec((1, 2, cout), lambda i: (i, 0, 0))],
        out_shape=(jax.ShapeDtypeStruct((N, hh, ww, cout), jnp.bfloat16),
                   jax.ShapeDtypeStruct((g, 2, cout), jnp.float32)),
        scratch_shapes=[pltpu.VMEM((n_blk, hh + 2 * p, wbuf, cin), jnp.bfloat16)],
        compiler_params=_compiler_params(),
    )(y1, sc, sh, w)


def _residual_call(y3, sc, sh, x, *, n_blk, out_dtype):
    N, hh, ww, c = y3.shape
    g = N // n_blk
    return pl.pallas_call(
        _bn_residual_relu_kernel,
        grid=(g,),
        in_specs=[_blk4(n_blk, hh, ww, c),
                  _full_spec((1, c)), _full_spec((1, c)),
                  _blk4(n_blk, hh, ww, c)],
        out_specs=_blk4(n_blk, hh, ww, c),
        out_shape=jax.ShapeDtypeStruct((N, hh, ww, c), out_dtype),
        compiler_params=_compiler_params(),
    )(y3, sc, sh, x)


# --------------------------------------------------------------------------- #
# Host-side glue
# --------------------------------------------------------------------------- #
def _pad_to(a, shape):
    pads = [(0, t - s) for s, t in zip(a.shape, shape)]
    return jnp.pad(a, pads)


def _affine_from_stats(partial_stats, gamma, beta, n_pix):
    """Reduce per-block (sum, sum_sq) partials into a BN per-channel affine."""
    # TODO(synk): switch to a Welford-style merge if cancellation in
    # E[y^2]-E[y]^2 ever becomes a problem at large DC offsets.
    s = jnp.sum(partial_stats, axis=0)                  # (2, C)
    mean = s[0] / n_pix
    var = jnp.maximum(s[1] / n_pix - mean * mean, 0.0)  # biased (training) var
    scale = gamma.reshape(-1) * jax.lax.rsqrt(var + EPS)
    shift = beta.reshape(-1) - mean * scale
    return scale.reshape(1, -1), shift.reshape(1, -1)


def _xavier_uniform(key, shape, fan_in, fan_out):
    a = (6.0 / (fan_in + fan_out)) ** 0.5
    return jax.random.uniform(key, shape, jnp.float32, -a, a)


def init_identity_block_params(key, in_channels, filters, kernel_size):
    """Deterministic synthetic params, matching the PyTorch module's init:
    xavier-uniform conv weights, zero conv biases, BN gamma=1 / beta=0."""
    F1, F2, F3 = filters
    k = kernel_size
    k1, k2, k3 = jax.random.split(key, 3)
    return {
        # 1x1 convs stored as (C_in, C_out); kxk conv as (k, k, C_in, C_out)
        "w1": _xavier_uniform(k1, (in_channels, F1), in_channels, F1),
        "b1": jnp.zeros((F1,), jnp.float32),
        "g1": jnp.ones((F1,), jnp.float32),
        "be1": jnp.zeros((F1,), jnp.float32),
        "w2": _xavier_uniform(k2, (k, k, F1, F2), F1 * k * k, F2 * k * k),
        "b2": jnp.zeros((F2,), jnp.float32),
        "g2": jnp.ones((F2,), jnp.float32),
        "be2": jnp.zeros((F2,), jnp.float32),
        "w3": _xavier_uniform(k3, (F2, F3), F2, F3),
        "b3": jnp.zeros((F3,), jnp.float32),
        "g3": jnp.ones((F3,), jnp.float32),
        "be3": jnp.zeros((F3,), jnp.float32),
    }


@functools.partial(jax.jit, static_argnames=("kernel_size", "n_blk"))
def identity_block(x_nchw, params, kernel_size=3, n_blk=None):
    N, C, H, W = x_nchw.shape
    k = kernel_size
    assert k % 2 == 1, "'same' conv implemented for odd kernel_size"
    F1 = params["w1"].shape[1]
    F2 = params["w2"].shape[3]
    F3 = params["w3"].shape[1]
    assert F3 == C, "IdentityBlock requires F3 == in_channels for the residual"

    # Lane-dense channel padding (multiples of 128).
    Cp, F1p, F2p = _round_up(C, LANE), _round_up(F1, LANE), _round_up(F2, LANE)

    if n_blk is None:
        n_blk = _pick_n_blk(N, H, W, Cp, F1p, F2p, k)
    assert N % n_blk == 0
    n_pix = N * H * W

    # NCHW -> NHWC, pad channels with zeros (padded channels stay exactly zero
    # through every stage and are sliced off at the end).
    x_nhwc = _pad_to(jnp.transpose(x_nchw, (0, 2, 3, 1)).astype(jnp.float32),
                     (N, H, W, Cp))

    # Weights in bf16 (MXU operands); BN params in f32.  Conv biases are NOT
    # passed to the kernels: each conv is immediately followed by BatchNorm,
    # whose mean subtraction cancels a per-channel bias exactly (and the module
    # zero-initializes conv biases anyway).
    w1 = _pad_to(params["w1"], (Cp, F1p)).astype(jnp.bfloat16)
    w2 = _pad_to(params["w2"], (k, k, F1p, F2p)).astype(jnp.bfloat16)
    w3 = _pad_to(params["w3"], (F2p, Cp)).astype(jnp.bfloat16)
    g1 = _pad_to(params["g1"].reshape(1, -1), (1, F1p)).astype(jnp.float32)
    g2 = _pad_to(params["g2"].reshape(1, -1), (1, F2p)).astype(jnp.float32)
    g3 = _pad_to(params["g3"].reshape(1, -1), (1, Cp)).astype(jnp.float32)
    be1 = _pad_to(params["be1"].reshape(1, -1), (1, F1p)).astype(jnp.float32)
    be2 = _pad_to(params["be2"].reshape(1, -1), (1, F2p)).astype(jnp.float32)
    be3 = _pad_to(params["be3"].reshape(1, -1), (1, Cp)).astype(jnp.float32)

    # ---- stage 1: conv1 (1x1) + partial BN1 stats --------------------------
    y1, ps1 = _conv1x1_call(x_nhwc, w1, n_blk=n_blk)
    sc1, sh1 = _affine_from_stats(ps1, g1, be1, n_pix)

    # ---- stage 2: BN1+ReLU -> conv2 (kxk 'same') + partial BN2 stats -------
    y2, ps2 = _convkxk_call(y1, sc1, sh1, w2, k=k, n_blk=n_blk)
    sc2, sh2 = _affine_from_stats(ps2, g2, be2, n_pix)

    # ---- stage 3: BN2+ReLU -> conv3 (1x1) + partial BN3 stats --------------
    y3, ps3 = _bn_relu_conv1x1_call(y2, sc2, sh2, w3, n_blk=n_blk)
    sc3, sh3 = _affine_from_stats(ps3, g3, be3, n_pix)

    # ---- stage 4: BN3 + residual add + ReLU --------------------------------
    out = _residual_call(y3, sc3, sh3, x_nhwc, n_blk=n_blk,
                         out_dtype=x_nchw.dtype)

    return jnp.transpose(out[..., :C], (0, 3, 1, 2))


# --------------------------------------------------------------------------- #
# Pure-JAX reference (mirrors the kernel's bf16 operands / bf16 intermediates)
# --------------------------------------------------------------------------- #
def identity_block_reference(x_nchw, params, kernel_size=3):
    N, C, H, W = x_nchw.shape
    k = kernel_size
    p = (k - 1) // 2
    x = jnp.transpose(x_nchw, (0, 2, 3, 1)).astype(jnp.float32)

    def mm(a2d, w):
        return jnp.dot(a2d.astype(jnp.bfloat16), w.astype(jnp.bfloat16),
                       preferred_element_type=jnp.float32)

    def bn_affine(y_f32, g, b):
        mean = jnp.mean(y_f32, axis=(0, 1, 2))
        var = jnp.maximum(jnp.mean(y_f32 * y_f32, axis=(0, 1, 2)) - mean * mean,
                          0.0)
        scale = g * jax.lax.rsqrt(var + EPS)
        shift = b - mean * scale
        return scale, shift

    def q(y):  # mirror bf16 storage of intermediates
        return y.astype(jnp.bfloat16).astype(jnp.float32)

    F1 = params["w1"].shape[1]
    F2 = params["w2"].shape[3]

    y1 = mm(x.reshape(-1, C), params["w1"]).reshape(N, H, W, F1) + params["b1"]
    sc1, sh1 = bn_affine(y1, params["g1"], params["be1"])
    a1 = jax.nn.relu(q(y1) * sc1 + sh1)

    ap = jnp.pad(a1.astype(jnp.bfloat16), ((0, 0), (p, p), (p, p), (0, 0)))
    y2 = jnp.zeros((N, H, W, F2), jnp.float32)
    for dy in range(k):
        for dx in range(k):
            win = ap[:, dy:dy + H, dx:dx + W, :]
            y2 = y2 + mm(win.reshape(-1, F1),
                         params["w2"][dy, dx]).reshape(N, H, W, F2)
    y2 = y2 + params["b2"]
    sc2, sh2 = bn_affine(y2, params["g2"], params["be2"])
    a2 = jax.nn.relu(q(y2) * sc2 + sh2)

    y3 = mm(a2.reshape(-1, F2), params["w3"]).reshape(N, H, W, C) + params["b3"]
    sc3, sh3 = bn_affine(y3, params["g3"], params["be3"])
    out = jax.nn.relu(q(y3) * sc3 + sh3 + x)
    return jnp.transpose(out, (0, 3, 1, 2))


if __name__ == "__main__":
    key = jax.random.PRNGKey(0)
    kx, kp = jax.random.split(key)

    # Small shapes consistent with the module:
    # IdentityBlock(in_channels=8, filters=(4, 4, 8), kernel_size=3), NCHW input.
    N, C, H, W = 2, 8, 8, 8
    filters = (4, 4, 8)
    kernel_size = 3

    x = jax.random.normal(kx, (N, C, H, W), jnp.float32)
    params = init_identity_block_params(kp, C, filters, kernel_size)

    # n_blk=1 -> grid of 2 blocks per stage, exercising the tiled / partial-stats
    # path even at this tiny shape.
    y = identity_block(x, params, kernel_size=kernel_size, n_blk=1)
    jax.block_until_ready(y)
    assert y.shape == (N, C, H, W) and y.dtype == jnp.float32

    y_ref = identity_block_reference(x, params, kernel_size)
    err = float(jnp.max(jnp.abs(y - y_ref)))
    assert err < 2e-2, f"max abs error vs reference: {err}"

    print("KERNEL_OK")
</pallas_src>

<mosaic_0001>
module attributes {stable_mosaic.version = 11 : i64} {
  func.func @_conv1x1_stats_kernel(%arg0: i32, %arg1: memref<1x8x8x128xf32, #tpu.memory_space<vmem>>, %arg2: memref<128x128xbf16, #tpu.memory_space<vmem>>, %arg3: memref<1x8x8x128xbf16, #tpu.memory_space<vmem>>, %arg4: memref<1x2x128xf32, #tpu.memory_space<vmem>>) attributes {dimension_semantics = [#tpu.dimension_semantics<parallel>], iteration_bounds = array<i64: 2>, scalar_prefetch = 0 : i64, scratch_operands = 0 : i64, tpu.core_type = #tpu.core_type<tc>, window_params = [{transform_indices = @transform_0, window_bounds = array<i64: 1, 8, 8, 128>}, {pipeline_mode = #tpu.pipeline_mode<synchronous>, transform_indices = @transform_1, window_bounds = array<i64: 128, 128>}, {transform_indices = @transform_2, window_bounds = array<i64: 1, 8, 8, 128>}, {transform_indices = @transform_3, window_bounds = array<i64: 1, 2, 128>}]} {
    %c0 = arith.constant 0 : index
    %c0_0 = arith.constant 0 : index
    %c0_1 = arith.constant 0 : index
    %c0_2 = arith.constant 0 : index
    %0 = vector.load %arg1[%c0, %c0_0, %c0_1, %c0_2] : memref<1x8x8x128xf32, #tpu.memory_space<vmem>>, vector<1x8x8x128xf32>
    %1 = vector.shape_cast %0 : vector<1x8x8x128xf32> to vector<64x128xf32>
    %2 = arith.truncf %1 : vector<64x128xf32> to vector<64x128xbf16>
    %c0_3 = arith.constant 0 : index
    %c0_4 = arith.constant 0 : index
    %3 = vector.load %arg2[%c0_3, %c0_4] : memref<128x128xbf16, #tpu.memory_space<vmem>>, vector<128x128xbf16>
    %cst = arith.constant dense<0.000000e+00> : vector<64x128xf32>
    %4 = tpu.matmul %2, %3, %cst {dimension_numbers = #tpu.dot_dimension_numbers<[1], [0], [0], [1], [0, 0, 1, 1], [], []>} : vector<64x128xbf16>, vector<128x128xbf16>, vector<64x128xf32> -> vector<64x128xf32>
    %5 = vector.shape_cast %4 : vector<64x128xf32> to vector<1x8x8x128xf32>
    %6 = arith.truncf %5 : vector<1x8x8x128xf32> to vector<1x8x8x128xbf16>
    %c0_5 = arith.constant 0 : index
    %c0_6 = arith.constant 0 : index
    %c0_7 = arith.constant 0 : index
    %c0_8 = arith.constant 0 : index
    %7 = vector.load %arg3[%c0_5, %c0_6, %c0_7, %c0_8] : memref<1x8x8x128xbf16, #tpu.memory_space<vmem>>, vector<1x8x8x128xbf16>
    tpu.vector_store %arg3[%c0_5, %c0_6, %c0_7, %c0_8], %6 {strides = array<i32>} : memref<1x8x8x128xbf16, #tpu.memory_space<vmem>>, vector<1x8x8x128xbf16>,
    %cst_9 = arith.constant dense<0.000000e+00> : vector<128xf32>
    %8 = vector.multi_reduction <add>, %4, %cst_9 [0] : vector<64x128xf32> to vector<128xf32>
    %9 = vector.shape_cast %8 : vector<128xf32> to vector<1x128xf32>
    %10 = arith.mulf %4, %4 : vector<64x128xf32>
    %cst_10 = arith.constant dense<0.000000e+00> : vector<128xf32>
    %11 = vector.multi_reduction <add>, %10, %cst_10 [0] : vector<64x128xf32> to vector<128xf32>
    %12 = vector.shape_cast %11 : vector<128xf32> to vector<1x128xf32>
    %13 = tpu.concatenate %9, %12 in 0 : vector<1x128xf32>, vector<1x128xf32> -> vector<2x128xf32>
    %14 = vector.shape_cast %13 : vector<2x128xf32> to vector<1x2x128xf32>
    %c0_11 = arith.constant 0 : index
    %c0_12 = arith.constant 0 : index
    %c0_13 = arith.constant 0 : index
    %15 = vector.load %arg4[%c0_11, %c0_12, %c0_13] : memref<1x2x128xf32, #tpu.memory_space<vmem>>, vector<1x2x128xf32>
    tpu.vector_store %arg4[%c0_11, %c0_12, %c0_13], %14 {strides = array<i32>} : memref<1x2x128xf32, #tpu.memory_space<vmem>>, vector<1x2x128xf32>,
    return
  }
  func.func @transform_0(%arg0: i32) -> (i32, i32, i32, i32) {
    %c0_i32 = arith.constant 0 : i32
    %c0_i32_0 = arith.constant 0 : i32
    %c0_i32_1 = arith.constant 0 : i32
    %c0_i32_2 = arith.constant 0 : i32
    return %arg0, %c0_i32, %c0_i32_0, %c0_i32_1 : i32, i32, i32, i32
  }
  func.func @transform_1(%arg0: i32) -> (i32, i32) {
    %c0_i32 = arith.constant 0 : i32
    %c0_i32_0 = arith.constant 0 : i32
    %c0_i32_1 = arith.constant 0 : i32
    return %c0_i32, %c0_i32_0 : i32, i32
  }
  func.func @transform_2(%arg0: i32) -> (i32, i32, i32, i32) {
    %c0_i32 = arith.constant 0 : i32
    %c0_i32_0 = arith.constant 0 : i32
    %c0_i32_1 = arith.constant 0 : i32
    %c0_i32_2 = arith.constant 0 : i32
    return %arg0, %c0_i32, %c0_i32_0, %c0_i32_1 : i32, i32, i32, i32
  }
  func.func @transform_3(%arg0: i32) -> (i32, i32, i32) {
    %c0_i32 = arith.constant 0 : i32
    %c0_i32_0 = arith.constant 0 : i32
    %c0_i32_1 = arith.constant 0 : i32
    return %arg0, %c0_i32, %c0_i32_0 : i32, i32, i32
  }
}

module attributes {stable_mosaic.version = 11 : i64} {
  func.func @_bn_relu_convkxk_stats_kernel(%arg0: i32, %arg1: memref<1x8x8x128xbf16, #tpu.memory_space<vmem>>, %arg2: memref<1x128xf32, #tpu.memory_space<vmem>>, %arg3: memref<1x128xf32, #tpu.memory_space<vmem>>, %arg4: memref<3x3x128x128xbf16, #tpu.memory_space<vmem>>, %arg5: memref<1x8x8x128xbf16, #tpu.memory_space<vmem>>, %arg6: memref<1x2x128xf32, #tpu.memory_space<vmem>>, %arg7: memref<1x10x16x128xbf16, #tpu.memory_space<vmem>>) attributes {dimension_semantics = [#tpu.dimension_semantics<parallel>], iteration_bounds = array<i64: 2>, scalar_prefetch = 0 : i64, scratch_operands = 1 : i64, tpu.core_type = #tpu.core_type<tc>, window_params = [{transform_indices = @transform_0, window_bounds = array<i64: 1, 8, 8, 128>}, {pipeline_mode = #tpu.pipeline_mode<synchronous>, transform_indices = @transform_1, window_bounds = array<i64: 1, 128>}, {pipeline_mode = #tpu.pipeline_mode<synchronous>, transform_indices = @transform_2, window_bounds = array<i64: 1, 128>}, {pipeline_mode = #tpu.pipeline_mode<synchronous>, transform_indices = @transform_3, window_bounds = array<i64: 3, 3, 128, 128>}, {transform_indices = @transform_4, window_bounds = array<i64: 1, 8, 8, 128>}, {transform_indices = @transform_5, window_bounds = array<i64: 1, 2, 128>}]} {
    %c0 = arith.constant 0 : index
    %c0_0 = arith.constant 0 : index
    %c0_1 = arith.constant 0 : index
    %c0_2 = arith.constant 0 : index
    %0 = vector.load %arg1[%c0, %c0_0, %c0_1, %c0_2] : memref<1x8x8x128xbf16, #tpu.memory_space<vmem>>, vector<1x8x8x128xbf16>
    %1 = arith.extf %0 : vector<1x8x8x128xbf16> to vector<1x8x8x128xf32>
    %c0_3 = arith.constant 0 : index
    %c0_4 = arith.constant 0 : index
    %2 = vector.load %arg2[%c0_3, %c0_4] : memref<1x128xf32, #tpu.memory_space<vmem>>, vector<1x128xf32>
    %3 = vector.shape_cast %2 : vector<1x128xf32> to vector<1x1x1x128xf32>
    %4 = vector.broadcast %3 : vector<1x1x1x128xf32> to vector<1x8x8x128xf32>
    %5 = arith.mulf %1, %4 : vector<1x8x8x128xf32>
    %c0_5 = arith.constant 0 : index
    %c0_6 = arith.constant 0 : index
    %6 = vector.load %arg3[%c0_5, %c0_6] : memref<1x128xf32, #tpu.memory_space<vmem>>, vector<1x128xf32>
    %7 = vector.shape_cast %6 : vector<1x128xf32> to vector<1x1x1x128xf32>
    %8 = vector.broadcast %7 : vector<1x1x1x128xf32> to vector<1x8x8x128xf32>
    %9 = arith.addf %5, %8 : vector<1x8x8x128xf32>
    %cst = arith.constant 0.000000e+00 : f32
    %10 = vector.broadcast %cst : f32 to vector<1x8x8x128xf32>
    %11 = arith.maximumf %9, %10 : vector<1x8x8x128xf32>
    %cst_7 = arith.constant 0.000000e+00 : bf16
    %12 = vector.broadcast %cst_7 : bf16 to vector<1x1x16x128xbf16>
    %c0_8 = arith.constant 0 : index
    %c0_9 = arith.constant 0 : index
    %c0_10 = arith.constant 0 : index
    %c0_11 = arith.constant 0 : index
    %13 = vector.load %arg7[%c0_8, %c0_9, %c0_10, %c0_11] : memref<1x10x16x128xbf16, #tpu.memory_space<vmem>>, vector<1x1x16x128xbf16>
    tpu.vector_store %arg7[%c0_8, %c0_9, %c0_10, %c0_11], %12 {strides = array<i32>} : memref<1x10x16x128xbf16, #tpu.memory_space<vmem>>, vector<1x1x16x128xbf16>,
    %cst_12 = arith.constant 0.000000e+00 : bf16
    %14 = vector.broadcast %cst_12 : bf16 to vector<1x1x16x128xbf16>
    %c0_13 = arith.constant 0 : index
    %c9 = arith.constant 9 : index
    %c0_14 = arith.constant 0 : index
    %c0_15 = arith.constant 0 : index
    %15 = vector.load %arg7[%c0_13, %c9, %c0_14, %c0_15] : memref<1x10x16x128xbf16, #tpu.memory_space<vmem>>, vector<1x1x16x128xbf16>
    tpu.vector_store %arg7[%c0_13, %c9, %c0_14, %c0_15], %14 {strides = array<i32>} : memref<1x10x16x128xbf16, #tpu.memory_space<vmem>>, vector<1x1x16x128xbf16>,
    %cst_16 = arith.constant 0.000000e+00 : bf16
    %16 = vector.broadcast %cst_16 : bf16 to vector<1x10x1x128xbf16>
    %c0_17 = arith.constant 0 : index
    %c0_18 = arith.constant 0 : index
    %c0_19 = arith.constant 0 : index
    %c0_20 = arith.constant 0 : index
    %17 = vector.load %arg7[%c0_17, %c0_18, %c0_19, %c0_20] : memref<1x10x16x128xbf16, #tpu.memory_space<vmem>>, vector<1x10x1x128xbf16>
    tpu.vector_store %arg7[%c0_17, %c0_18, %c0_19, %c0_20], %16 {strides = array<i32>} : memref<1x10x16x128xbf16, #tpu.memory_space<vmem>>, vector<1x10x1x128xbf16>,
    %cst_21 = arith.constant 0.000000e+00 : bf16
    %18 = vector.broadcast %cst_21 : bf16 to vector<1x10x7x128xbf16>
    %c0_22 = arith.constant 0 : index
    %c0_23 = arith.constant 0 : index
    %c9_24 = arith.constant 9 : index
    %c0_25 = arith.constant 0 : index
    %19 = vector.load %arg7[%c0_22, %c0_23, %c9_24, %c0_25] : memref<1x10x16x128xbf16, #tpu.memory_space<vmem>>, vector<1x10x7x128xbf16>
    tpu.vector_store %arg7[%c0_22, %c0_23, %c9_24, %c0_25], %18 {strides = array<i32>} : memref<1x10x16x128xbf16, #tpu.memory_space<vmem>>, vector<1x10x7x128xbf16>,
    %20 = arith.truncf %11 : vector<1x8x8x128xf32> to vector<1x8x8x128xbf16>
    %c0_26 = arith.constant 0 : index
    %c1 = arith.constant 1 : index
    %c1_27 = arith.constant 1 : index
    %c0_28 = arith.constant 0 : index
    %21 = vector.load %arg7[%c0_26, %c1, %c1_27, %c0_28] : memref<1x10x16x128xbf16, #tpu.memory_space<vmem>>, vector<1x8x8x128xbf16>
    tpu.vector_store %arg7[%c0_26, %c1, %c1_27, %c0_28], %20 {strides = array<i32>} : memref<1x10x16x128xbf16, #tpu.memory_space<vmem>>, vector<1x8x8x128xbf16>,
    %c0_29 = arith.constant 0 : index
    %c0_30 = arith.constant 0 : index
    %c0_31 = arith.constant 0 : index
    %c0_32 = arith.constant 0 : index
    %22 = vector.load %arg7[%c0_29, %c0_30, %c0_31, %c0_32] : memref<1x10x16x128xbf16, #tpu.memory_space<vmem>>, vector<1x8x16x128xbf16>
    %23 = vector.shape_cast %22 : vector<1x8x16x128xbf16> to vector<128x128xbf16>
    %c0_33 = arith.constant 0 : index
    %c0_34 = arith.constant 0 : index
    %c0_35 = arith.constant 0 : index
    %c0_36 = arith.constant 0 : index
    %24 = vector.load %arg4[%c0_33, %c0_34, %c0_35, %c0_36] : memref<3x3x128x128xbf16, #tpu.memory_space<vmem>>, vector<1x1x128x128xbf16>
    %25 = vector.shape_cast %24 : vector<1x1x128x128xbf16> to vector<128x128xbf16>
    %cst_37 = arith.constant dense<0.000000e+00> : vector<128x128xf32>
    %26 = tpu.matmul %23, %25, %cst_37 {dimension_numbers = #tpu.dot_dimension_numbers<[1], [0], [0], [1], [0, 0, 1, 1], [], []>} : vector<128x128xbf16>, vector<128x128xbf16>, vector<128x128xf32> -> vector<128x128xf32>
    %c0_38 = arith.constant 0 : index
    %c1_39 = arith.constant 1 : index
    %c0_40 = arith.constant 0 : index
    %c0_41 = arith.constant 0 : index
    %27 = vector.load %arg7[%c0_38, %c1_39, %c0_40, %c0_41] : memref<1x10x16x128xbf16, #tpu.memory_space<vmem>>, vector<1x8x16x128xbf16>
    %28 = vector.shape_cast %27 : vector<1x8x16x128xbf16> to vector<128x128xbf16>
    %c1_42 = arith.constant 1 : index
    %c0_43 = arith.constant 0 : index
    %c0_44 = arith.constant 0 : index
    %c0_45 = arith.constant 0 : index
    %29 = vector.load %arg4[%c1_42, %c0_43, %c0_44, %c0_45] : memref<3x3x128x128xbf16, #tpu.memory_space<vmem>>, vector<1x1x128x128xbf16>
    %30 = vector.shape_cast %29 : vector<1x1x128x128xbf16> to vector<128x128xbf16>
    %cst_46 = arith.constant dense<0.000000e+00> : vector<128x128xf32>
    %31 = tpu.matmul %28, %30, %cst_46 {dimension_numbers = #tpu.dot_dimension_numbers<[1], [0], [0], [1], [0, 0, 1, 1], [], []>} : vector<128x128xbf16>, vector<128x128xbf16>, vector<128x128xf32> -> vector<128x128xf32>
    %32 = arith.addf %26, %31 : vector<128x128xf32>
    %c0_47 = arith.constant 0 : index
    %c2 = arith.constant 2 : index
    %c0_48 = arith.constant 0 : index
    %c0_49 = arith.constant 0 : index
    %33 = vector.load %arg7[%c0_47, %c2, %c0_48, %c0_49] : memref<1x10x16x128xbf16, #tpu.memory_space<vmem>>, vector<1x8x16x128xbf16>
    %34 = vector.shape_cast %33 : vector<1x8x16x128xbf16> to vector<128x128xbf16>
    %c2_50 = arith.constant 2 : index
    %c0_51 = arith.constant 0 : index
    %c0_52 = arith.constant 0 : index
    %c0_53 = arith.constant 0 : index
    %35 = vector.load %arg4[%c2_50, %c0_51, %c0_52, %c0_53] : memref<3x3x128x128xbf16, #tpu.memory_space<vmem>>, vector<1x1x128x128xbf16>
    %36 = vector.shape_cast %35 : vector<1x1x128x128xbf16> to vector<128x128xbf16>
    %cst_54 = arith.constant dense<0.000000e+00> : vector<128x128xf32>
    %37 = tpu.matmul %34, %36, %cst_54 {dimension_numbers = #tpu.dot_dimension_numbers<[1], [0], [0], [1], [0, 0, 1, 1], [], []>} : vector<128x128xbf16>, vector<128x128xbf16>, vector<128x128xf32> -> vector<128x128xf32>
    %38 = arith.addf %32, %37 : vector<128x128xf32>
    %39 = vector.shape_cast %38 : vector<128x128xf32> to vector<1x8x16x128xf32>
    %40 = vector.extract_strided_slice %39 {offsets = [0, 0, 0, 0], sizes = [1, 8, 8, 128], strides = [1, 1, 1, 1]} : vector<1x8x16x128xf32> to vector<1x8x8x128xf32>
    %c0_55 = arith.constant 0 : index
    %c0_56 = arith.constant 0 : index
    %c0_57 = arith.constant 0 : index
    %c0_58 = arith.constant 0 : index
    %41 = vector.load %arg7[%c0_55, %c0_56, %c0_57, %c0_58] : memref<1x10x16x128xbf16, #tpu.memory_space<vmem>>, vector<1x8x16x128xbf16>
    %42 = vector.shape_cast %41 : vector<1x8x16x128xbf16> to vector<128x128xbf16>
    %c0_59 = arith.constant 0 : index
    %c1_60 = arith.constant 1 : index
    %c0_61 = arith.constant 0 : index
    %c0_62 = arith.constant 0 : index
    %43 = vector.load %arg4[%c0_59, %c1_60, %c0_61, %c0_62] : memref<3x3x128x128xbf16, #tpu.memory_space<vmem>>, vector<1x1x128x128xbf16>
    %44 = vector.shape_cast %43 : vector<1x1x128x128xbf16> to vector<128x128xbf16>
    %cst_63 = arith.constant dense<0.000000e+00> : vector<128x128xf32>
    %45 = tpu.matmul %42, %44, %cst_63 {dimension_numbers = #tpu.dot_dimension_numbers<[1], [0], [0], [1], [0, 0, 1, 1], [], []>} : vector<128x128xbf16>, vector<128x128xbf16>, vector<128x128xf32> -> vector<128x128xf32>
    %c0_64 = arith.constant 0 : index
    %c1_65 = arith.constant 1 : index
    %c0_66 = arith.constant 0 : index
    %c0_67 = arith.constant 0 : index
    %46 = vector.load %arg7[%c0_64, %c1_65, %c0_66, %c0_67] : memref<1x10x16x128xbf16, #tpu.memory_space<vmem>>, vector<1x8x16x128xbf16>
    %47 = vector.shape_cast %46 : vector<1x8x16x128xbf16> to vector<128x128xbf16>
    %c1_68 = arith.constant 1 : index
    %c1_69 = arith.constant 1 : index
    %c0_70 = arith.constant 0 : index
    %c0_71 = arith.constant 0 : index
    %48 = vector.load %arg4[%c1_68, %c1_69, %c0_70, %c0_71] : memref<3x3x128x128xbf16, #tpu.memory_space<vmem>>, vector<1x1x128x128xbf16>
    %49 = vector.shape_cast %48 : vector<1x1x128x128xbf16> to vector<128x128xbf16>
    %cst_72 = arith.constant dense<0.000000e+00> : vector<128x128xf32>
    %50 = tpu.matmul %47, %49, %cst_72 {dimension_numbers = #tpu.dot_dimension_numbers<[1], [0], [0], [1], [0, 0, 1, 1], [], []>} : vector<128x128xbf16>, vector<128x128xbf16>, vector<128x128xf32> -> vector<128x128xf32>
    %51 = arith.addf %45, %50 : vector<128x128xf32>
    %c0_73 = arith.constant 0 : index
    %c2_74 = arith.constant 2 : index
    %c0_75 = arith.constant 0 : index
    %c0_76 = arith.constant 0 : index
    %52 = vector.load %arg7[%c0_73, %c2_74, %c0_75, %c0_76] : memref<1x10x16x128xbf16, #tpu.memory_space<vmem>>, vector<1x8x16x128xbf16>
    %53 = vector.shape_cast %52 : vector<1x8x16x128xbf16> to vector<128x128xbf16>
    %c2_77 = arith.constant 2 : index
    %c1_78 = arith.constant 1 : index
    %c0_79 = arith.constant 0 : index
    %c0_80 = arith.constant 0 : index
    %54 = vector.load %arg4[%c2_77, %c1_78, %c0_79, %c0_80] : memref<3x3x128x128xbf16, #tpu.memory_space<vmem>>, vector<1x1x128x128xbf16>
    %55 = vector.shape_cast %54 : vector<1x1x128x128xbf16> to vector<128x128xbf16>
    %cst_81 = arith.constant dense<0.000000e+00> : vector<128x128xf32>
    %56 = tpu.matmul %53, %55, %cst_81 {dimension_numbers = #tpu.dot_dimension_numbers<[1], [0], [0], [1], [0, 0, 1, 1], [], []>} : vector<128x128xbf16>, vector<128x128xbf16>, vector<128x128xf32> -> vector<128x128xf32>
    %57 = arith.addf %51, %56 : vector<128x128xf32>
    %58 = vector.shape_cast %57 : vector<128x128xf32> to vector<1x8x16x128xf32>
    %59 = vector.extract_strided_slice %58 {offsets = [0, 0, 1, 0], sizes = [1, 8, 8, 128], strides = [1, 1, 1, 1]} : vector<1x8x16x128xf32> to vector<1x8x8x128xf32>
    %60 = arith.addf %40, %59 : vector<1x8x8x128xf32>
    %c0_82 = arith.constant 0 : index
    %c0_83 = arith.constant 0 : index
    %c0_84 = arith.constant 0 : index
    %c0_85 = arith.constant 0 : index
    %61 = vector.load %arg7[%c0_82, %c0_83, %c0_84, %c0_85] : memref<1x10x16x128xbf16, #tpu.memory_space<vmem>>, vector<1x8x16x128xbf16>
    %62 = vector.shape_cast %61 : vector<1x8x16x128xbf16> to vector<128x128xbf16>
    %c0_86 = arith.constant 0 : index
    %c2_87 = arith.constant 2 : index
    %c0_88 = arith.constant 0 : index
    %c0_89 = arith.constant 0 : index
    %63 = vector.load %arg4[%c0_86, %c2_87, %c0_88, %c0_89] : memref<3x3x128x128xbf16, #tpu.memory_space<vmem>>, vector<1x1x128x128xbf16>
    %64 = vector.shape_cast %63 : vector<1x1x128x128xbf16> to vector<128x128xbf16>
    %cst_90 = arith.constant dense<0.000000e+00> : vector<128x128xf32>
    %65 = tpu.matmul %62, %64, %cst_90 {dimension_numbers = #tpu.dot_dimension_numbers<[1], [0], [0], [1], [0, 0, 1, 1], [], []>} : vector<128x128xbf16>, vector<128x128xbf16>, vector<128x128xf32> -> vector<128x128xf32>
    %c0_91 = arith.constant 0 : index
    %c1_92 = arith.constant 1 : index
    %c0_93 = arith.constant 0 : index
    %c0_94 = arith.constant 0 : index
    %66 = vector.load %arg7[%c0_91, %c1_92, %c0_93, %c0_94] : memref<1x10x16x128xbf16, #tpu.memory_space<vmem>>, vector<1x8x16x128xbf16>
    %67 = vector.shape_cast %66 : vector<1x8x16x128xbf16> to vector<128x128xbf16>
    %c1_95 = arith.constant 1 : index
    %c2_96 = arith.constant 2 : index
    %c0_97 = arith.constant 0 : index
    %c0_98 = arith.constant 0 : index
    %68 = vector.load %arg4[%c1_95, %c2_96, %c0_97, %c0_98] : memref<3x3x128x128xbf16, #tpu.memory_space<vmem>>, vector<1x1x128x128xbf16>
    %69 = vector.shape_cast %68 : vector<1x1x128x128xbf16> to vector<128x128xbf16>
    %cst_99 = arith.constant dense<0.000000e+00> : vector<128x128xf32>
    %70 = tpu.matmul %67, %69, %cst_99 {dimension_numbers = #tpu.dot_dimension_numbers<[1], [0], [0], [1], [0, 0, 1, 1], [], []>} : vector<128x128xbf16>, vector<128x128xbf16>, vector<128x128xf32> -> vector<128x128xf32>
    %71 = arith.addf %65, %70 : vector<128x128xf32>
    %c0_100 = arith.constant 0 : index
    %c2_101 = arith.constant 2 : index
    %c0_102 = arith.constant 0 : index
    %c0_103 = arith.constant 0 : index
    %72 = vector.load %arg7[%c0_100, %c2_101, %c0_102, %c0_103] : memref<1x10x16x128xbf16, #tpu.memory_space<vmem>>, vector<1x8x16x128xbf16>
    %73 = vector.shape_cast %72 : vector<1x8x16x128xbf16> to vector<128x128xbf16>
    %c2_104 = arith.constant 2 : index
    %c2_105 = arith.constant 2 : index
    %c0_106 = arith.constant 0 : index
    %c0_107 = arith.constant 0 : index
    %74 = vector.load %arg4[%c2_104, %c2_105, %c0_106, %c0_107] : memref<3x3x128x128xbf16, #tpu.memory_space<vmem>>, vector<1x1x128x128xbf16>
    %75 = vector.shape_cast %74 : vector<1x1x128x128xbf16> to vector<128x128xbf16>
    %cst_108 = arith.constant dense<0.000000e+00> : vector<128x128xf32>
    %76 = tpu.matmul %73, %75, %cst_108 {dimension_numbers = #tpu.dot_dimension_numbers<[1], [0], [0], [1], [0, 0, 1, 1], [], []>} : vector<128x128xbf16>, vector<128x128xbf16>, vector<128x128xf32> -> vector<128x128xf32>
    %77 = arith.addf %71, %76 : vector<128x128xf32>
    %78 = vector.shape_cast %77 : vector<128x128xf32> to vector<1x8x16x128xf32>
    %79 = vector.extract_strided_slice %78 {offsets = [0, 0, 2, 0], sizes = [1, 8, 8, 128], strides = [1, 1, 1, 1]} : vector<1x8x16x128xf32> to vector<1x8x8x128xf32>
    %80 = arith.addf %60, %79 : vector<1x8x8x128xf32>
    %81 = arith.truncf %80 : vector<1x8x8x128xf32> to vector<1x8x8x128xbf16>
    %c0_109 = arith.constant 0 : index
    %c0_110 = arith.constant 0 : index
    %c0_111 = arith.constant 0 : index
    %c0_112 = arith.constant 0 : index
    %82 = vector.load %arg5[%c0_109, %c0_110, %c0_111, %c0_112] : memref<1x8x8x128xbf16, #tpu.memory_space<vmem>>, vector<1x8x8x128xbf16>
    tpu.vector_store %arg5[%c0_109, %c0_110, %c0_111, %c0_112], %81 {strides = array<i32>} : memref<1x8x8x128xbf16, #tpu.memory_space<vmem>>, vector<1x8x8x128xbf16>,
    %83 = vector.shape_cast %80 : vector<1x8x8x128xf32> to vector<64x128xf32>
    %cst_113 = arith.constant dense<0.000000e+00> : vector<128xf32>
    %84 = vector.multi_reduction <add>, %83, %cst_113 [0] : vector<64x128xf32> to vector<128xf32>
    %85 = vector.shape_cast %84 : vector<128xf32> to vector<1x128xf32>
    %86 = arith.mulf %83, %83 : vector<64x128xf32>
    %cst_114 = arith.constant dense<0.000000e+00> : vector<128xf32>
    %87 = vector.multi_reduction <add>, %86, %cst_114 [0] : vector<64x128xf32> to vector<128xf32>
    %88 = vector.shape_cast %87 : vector<128xf32> to vector<1x128xf32>
    %89 = tpu.concatenate %85, %88 in 0 : vector<1x128xf32>, vector<1x128xf32> -> vector<2x128xf32>
    %90 = vector.shape_cast %89 : vector<2x128xf32> to vector<1x2x128xf32>
    %c0_115 = arith.constant 0 : index
    %c0_116 = arith.constant 0 : index
    %c0_117 = arith.constant 0 : index
    %91 = vector.load %arg6[%c0_115, %c0_116, %c0_117] : memref<1x2x128xf32, #tpu.memory_space<vmem>>, vector<1x2x128xf32>
    tpu.vector_store %arg6[%c0_115, %c0_116, %c0_117], %90 {strides = array<i32>} : memref<1x2x128xf32, #tpu.memory_space<vmem>>, vector<1x2x128xf32>,
    return
  }
  func.func @transform_0(%arg0: i32) -> (i32, i32, i32, i32) {
    %c0_i32 = arith.constant 0 : i32
    %c0_i32_0 = arith.constant 0 : i32
    %c0_i32_1 = arith.constant 0 : i32
    %c0_i32_2 = arith.constant 0 : i32
    return %arg0, %c0_i32, %c0_i32_0, %c0_i32_1 : i32, i32, i32, i32
  }
  func.func @transform_1(%arg0: i32) -> (i32, i32) {
    %c0_i32 = arith.constant 0 : i32
    %c0_i32_0 = arith.constant 0 : i32
    %c0_i32_1 = arith.constant 0 : i32
    return %c0_i32, %c0_i32_0 : i32, i32
  }
  func.func @transform_2(%arg0: i32) -> (i32, i32) {
    %c0_i32 = arith.constant 0 : i32
    %c0_i32_0 = arith.constant 0 : i32
    %c0_i32_1 = arith.constant 0 : i32
    return %c0_i32, %c0_i32_0 : i32, i32
  }
  func.func @transform_3(%arg0: i32) -> (i32, i32, i32, i32) {
    %c0_i32 = arith.constant 0 : i32
    %c0_i32_0 = arith.constant 0 : i32
    %c0_i32_1 = arith.constant 0 : i32
    %c0_i32_2 = arith.constant 0 : i32
    %c0_i32_3 = arith.constant 0 : i32
    return %c0_i32, %c0_i32_0, %c0_i32_1, %c0_i32_2 : i32, i32, i32, i32
  }
  func.func @transform_4(%arg0: i32) -> (i32, i32, i32, i32) {
    %c0_i32 = arith.constant 0 : i32
    %c0_i32_0 = arith.constant 0 : i32
    %c0_i32_1 = arith.constant 0 : i32
    %c0_i32_2 = arith.constant 0 : i32
    return %arg0, %c0_i32, %c0_i32_0, %c0_i32_1 : i32, i32, i32, i32
  }
  func.func @transform_5(%arg0: i32) -> (i32, i32, i32) {
    %c0_i32 = arith.constant 0 : i32
    %c0_i32_0 = arith.constant 0 : i32
    %c0_i32_1 = arith.constant 0 : i32
    return %arg0, %c0_i32, %c0_i32_0 : i32, i32, i32
  }
}

module attributes {stable_mosaic.version = 11 : i64} {
  func.func @_bn_relu_conv1x1_stats_kernel(%arg0: i32, %arg1: memref<1x8x8x128xbf16, #tpu.memory_space<vmem>>, %arg2: memref<1x128xf32, #tpu.memory_space<vmem>>, %arg3: memref<1x128xf32, #tpu.memory_space<vmem>>, %arg4: memref<128x128xbf16, #tpu.memory_space<vmem>>, %arg5: memref<1x8x8x128xbf16, #tpu.memory_space<vmem>>, %arg6: memref<1x2x128xf32, #tpu.memory_space<vmem>>) attributes {dimension_semantics = [#tpu.dimension_semantics<parallel>], iteration_bounds = array<i64: 2>, scalar_prefetch = 0 : i64, scratch_operands = 0 : i64, tpu.core_type = #tpu.core_type<tc>, window_params = [{transform_indices = @transform_0, window_bounds = array<i64: 1, 8, 8, 128>}, {pipeline_mode = #tpu.pipeline_mode<synchronous>, transform_indices = @transform_1, window_bounds = array<i64: 1, 128>}, {pipeline_mode = #tpu.pipeline_mode<synchronous>, transform_indices = @transform_2, window_bounds = array<i64: 1, 128>}, {pipeline_mode = #tpu.pipeline_mode<synchronous>, transform_indices = @transform_3, window_bounds = array<i64: 128, 128>}, {transform_indices = @transform_4, window_bounds = array<i64: 1, 8, 8, 128>}, {transform_indices = @transform_5, window_bounds = array<i64: 1, 2, 128>}]} {
    %c0 = arith.constant 0 : index
    %c0_0 = arith.constant 0 : index
    %c0_1 = arith.constant 0 : index
    %c0_2 = arith.constant 0 : index
    %0 = vector.load %arg1[%c0, %c0_0, %c0_1, %c0_2] : memref<1x8x8x128xbf16, #tpu.memory_space<vmem>>, vector<1x8x8x128xbf16>
    %1 = vector.shape_cast %0 : vector<1x8x8x128xbf16> to vector<64x128xbf16>
    %2 = arith.extf %1 : vector<64x128xbf16> to vector<64x128xf32>
    %c0_3 = arith.constant 0 : index
    %c0_4 = arith.constant 0 : index
    %3 = vector.load %arg2[%c0_3, %c0_4] : memref<1x128xf32, #tpu.memory_space<vmem>>, vector<1x128xf32>
    %4 = vector.broadcast %3 : vector<1x128xf32> to vector<64x128xf32>
    %5 = arith.mulf %2, %4 : vector<64x128xf32>
    %c0_5 = arith.constant 0 : index
    %c0_6 = arith.constant 0 : index
    %6 = vector.load %arg3[%c0_5, %c0_6] : memref<1x128xf32, #tpu.memory_space<vmem>>, vector<1x128xf32>
    %7 = vector.broadcast %6 : vector<1x128xf32> to vector<64x128xf32>
    %8 = arith.addf %5, %7 : vector<64x128xf32>
    %cst = arith.constant 0.000000e+00 : f32
    %9 = vector.broadcast %cst : f32 to vector<64x128xf32>
    %10 = arith.maximumf %8, %9 : vector<64x128xf32>
    %11 = arith.truncf %10 : vector<64x128xf32> to vector<64x128xbf16>
    %c0_7 = arith.constant 0 : index
    %c0_8 = arith.constant 0 : index
    %12 = vector.load %arg4[%c0_7, %c0_8] : memref<128x128xbf16, #tpu.memory_space<vmem>>, vector<128x128xbf16>
    %cst_9 = arith.constant dense<0.000000e+00> : vector<64x128xf32>
    %13 = tpu.matmul %11, %12, %cst_9 {dimension_numbers = #tpu.dot_dimension_numbers<[1], [0], [0], [1], [0, 0, 1, 1], [], []>} : vector<64x128xbf16>, vector<128x128xbf16>, vector<64x128xf32> -> vector<64x128xf32>
    %14 = vector.shape_cast %13 : vector<64x128xf32> to vector<1x8x8x128xf32>
    %15 = arith.truncf %14 : vector<1x8x8x128xf32> to vector<1x8x8x128xbf16>
    %c0_10 = arith.constant 0 : index
    %c0_11 = arith.constant 0 : index
    %c0_12 = arith.constant 0 : index
    %c0_13 = arith.constant 0 : index
    %16 = vector.load %arg5[%c0_10, %c0_11, %c0_12, %c0_13] : memref<1x8x8x128xbf16, #tpu.memory_space<vmem>>, vector<1x8x8x128xbf16>
    tpu.vector_store %arg5[%c0_10, %c0_11, %c0_12, %c0_13], %15 {strides = array<i32>} : memref<1x8x8x128xbf16, #tpu.memory_space<vmem>>, vector<1x8x8x128xbf16>,
    %cst_14 = arith.constant dense<0.000000e+00> : vector<128xf32>
    %17 = vector.multi_reduction <add>, %13, %cst_14 [0] : vector<64x128xf32> to vector<128xf32>
    %18 = vector.shape_cast %17 : vector<128xf32> to vector<1x128xf32>
    %19 = arith.mulf %13, %13 : vector<64x128xf32>
    %cst_15 = arith.constant dense<0.000000e+00> : vector<128xf32>
    %20 = vector.multi_reduction <add>, %19, %cst_15 [0] : vector<64x128xf32> to vector<128xf32>
    %21 = vector.shape_cast %20 : vector<128xf32> to vector<1x128xf32>
    %22 = tpu.concatenate %18, %21 in 0 : vector<1x128xf32>, vector<1x128xf32> -> vector<2x128xf32>
    %23 = vector.shape_cast %22 : vector<2x128xf32> to vector<1x2x128xf32>
    %c0_16 = arith.constant 0 : index
    %c0_17 = arith.constant 0 : index
    %c0_18 = arith.constant 0 : index
    %24 = vector.load %arg6[%c0_16, %c0_17, %c0_18] : memref<1x2x128xf32, #tpu.memory_space<vmem>>, vector<1x2x128xf32>
    tpu.vector_store %arg6[%c0_16, %c0_17, %c0_18], %23 {strides = array<i32>} : memref<1x2x128xf32, #tpu.memory_space<vmem>>, vector<1x2x128xf32>,
    return
  }
  func.func @transform_0(%arg0: i32) -> (i32, i32, i32, i32) {
    %c0_i32 = arith.constant 0 : i32
    %c0_i32_0 = arith.constant 0 : i32
    %c0_i32_1 = arith.constant 0 : i32
    %c0_i32_2 = arith.constant 0 : i32
    return %arg0, %c0_i32, %c0_i32_0, %c0_i32_1 : i32, i32, i32, i32
  }
  func.func @transform_1(%arg0: i32) -> (i32, i32) {
    %c0_i32 = arith.constant 0 : i32
    %c0_i32_0 = arith.constant 0 : i32
    %c0_i32_1 = arith.constant 0 : i32
    return %c0_i32, %c0_i32_0 : i32, i32
  }
  func.func @transform_2(%arg0: i32) -> (i32, i32) {
    %c0_i32 = arith.constant 0 : i32
    %c0_i32_0 = arith.constant 0 : i32
    %c0_i32_1 = arith.constant 0 : i32
    return %c0_i32, %c0_i32_0 : i32, i32
  }
  func.func @transform_3(%arg0: i32) -> (i32, i32) {
    %c0_i32 = arith.constant 0 : i32
    %c0_i32_0 = arith.constant 0 : i32
    %c0_i32_1 = arith.constant 0 : i32
    return %c0_i32, %c0_i32_0 : i32, i32
  }
  func.func @transform_4(%arg0: i32) -> (i32, i32, i32, i32) {
    %c0_i32 = arith.constant 0 : i32
    %c0_i32_0 = arith.constant 0 : i32
    %c0_i32_1 = arith.constant 0 : i32
    %c0_i32_2 = arith.constant 0 : i32
    return %arg0, %c0_i32, %c0_i32_0, %c0_i32_1 : i32, i32, i32, i32
  }
  func.func @transform_5(%arg0: i32) -> (i32, i32, i32) {
    %c0_i32 = arith.constant 0 : i32
    %c0_i32_0 = arith.constant 0 : i32
    %c0_i32_1 = arith.constant 0 : i32
    return %arg0, %c0_i32, %c0_i32_0 : i32, i32, i32
  }
}

module attributes {stable_mosaic.version = 11 : i64} {
  func.func @_bn_residual_relu_kernel(%arg0: i32, %arg1: memref<1x8x8x128xbf16, #tpu.memory_space<vmem>>, %arg2: memref<1x128xf32, #tpu.memory_space<vmem>>, %arg3: memref<1x128xf32, #tpu.memory_space<vmem>>, %arg4: memref<1x8x8x128xf32, #tpu.memory_space<vmem>>, %arg5: memref<1x8x8x128xf32, #tpu.memory_space<vmem>>) attributes {dimension_semantics = [#tpu.dimension_semantics<parallel>], iteration_bounds = array<i64: 2>, scalar_prefetch = 0 : i64, scratch_operands = 0 : i64, tpu.core_type = #tpu.core_type<tc>, window_params = [{transform_indices = @transform_0, window_bounds = array<i64: 1, 8, 8, 128>}, {pipeline_mode = #tpu.pipeline_mode<synchronous>, transform_indices = @transform_1, window_bounds = array<i64: 1, 128>}, {pipeline_mode = #tpu.pipeline_mode<synchronous>, transform_indices = @transform_2, window_bounds = array<i64: 1, 128>}, {transform_indices = @transform_3, window_bounds = array<i64: 1, 8, 8, 128>}, {transform_indices = @transform_4, window_bounds = array<i64: 1, 8, 8, 128>}]} {
    %c0 = arith.constant 0 : index
    %c0_0 = arith.constant 0 : index
    %c0_1 = arith.constant 0 : index
    %c0_2 = arith.constant 0 : index
    %0 = vector.load %arg1[%c0, %c0_0, %c0_1, %c0_2] : memref<1x8x8x128xbf16, #tpu.memory_space<vmem>>, vector<1x8x8x128xbf16>
    %1 = vector.shape_cast %0 : vector<1x8x8x128xbf16> to vector<64x128xbf16>
    %2 = arith.extf %1 : vector<64x128xbf16> to vector<64x128xf32>
    %c0_3 = arith.constant 0 : index
    %c0_4 = arith.constant 0 : index
    %3 = vector.load %arg2[%c0_3, %c0_4] : memref<1x128xf32, #tpu.memory_space<vmem>>, vector<1x128xf32>
    %4 = vector.broadcast %3 : vector<1x128xf32> to vector<64x128xf32>
    %5 = arith.mulf %2, %4 : vector<64x128xf32>
    %c0_5 = arith.constant 0 : index
    %c0_6 = arith.constant 0 : index
    %6 = vector.load %arg3[%c0_5, %c0_6] : memref<1x128xf32, #tpu.memory_space<vmem>>, vector<1x128xf32>
    %7 = vector.broadcast %6 : vector<1x128xf32> to vector<64x128xf32>
    %8 = arith.addf %5, %7 : vector<64x128xf32>
    %c0_7 = arith.constant 0 : index
    %c0_8 = arith.constant 0 : index
    %c0_9 = arith.constant 0 : index
    %c0_10 = arith.constant 0 : index
    %9 = vector.load %arg4[%c0_7, %c0_8, %c0_9, %c0_10] : memref<1x8x8x128xf32, #tpu.memory_space<vmem>>, vector<1x8x8x128xf32>
    %10 = vector.shape_cast %9 : vector<1x8x8x128xf32> to vector<64x128xf32>
    %11 = arith.addf %8, %10 : vector<64x128xf32>
    %cst = arith.constant 0.000000e+00 : f32
    %12 = vector.broadcast %cst : f32 to vector<64x128xf32>
    %13 = arith.maximumf %11, %12 : vector<64x128xf32>
    %14 = vector.shape_cast %13 : vector<64x128xf32> to vector<1x8x8x128xf32>
    %c0_11 = arith.constant 0 : index
    %c0_12 = arith.constant 0 : index
    %c0_13 = arith.constant 0 : index
    %c0_14 = arith.constant 0 : index
    %15 = vector.load %arg5[%c0_11, %c0_12, %c0_13, %c0_14] : memref<1x8x8x128xf32, #tpu.memory_space<vmem>>, vector<1x8x8x128xf32>
    tpu.vector_store %arg5[%c0_11, %c0_12, %c0_13, %c0_14], %14 {strides = array<i32>} : memref<1x8x8x128xf32, #tpu.memory_space<vmem>>, vector<1x8x8x128xf32>,
    return
  }
  func.func @transform_0(%arg0: i32) -> (i32, i32, i32, i32) {
    %c0_i32 = arith.constant 0 : i32
    %c0_i32_0 = arith.constant 0 : i32
    %c0_i32_1 = arith.constant 0 : i32
    %c0_i32_2 = arith.constant 0 : i32
    return %arg0, %c0_i32, %c0_i32_0, %c0_i32_1 : i32, i32, i32, i32
  }
  func.func @transform_1(%arg0: i32) -> (i32, i32) {
    %c0_i32 = arith.constant 0 : i32
    %c0_i32_0 = arith.constant 0 : i32
    %c0_i32_1 = arith.constant 0 : i32
    return %c0_i32, %c0_i32_0 : i32, i32
  }
  func.func @transform_2(%arg0: i32) -> (i32, i32) {
    %c0_i32 = arith.constant 0 : i32
    %c0_i32_0 = arith.constant 0 : i32
    %c0_i32_1 = arith.constant 0 : i32
    return %c0_i32, %c0_i32_0 : i32, i32
  }
  func.func @transform_3(%arg0: i32) -> (i32, i32, i32, i32) {
    %c0_i32 = arith.constant 0 : i32
    %c0_i32_0 = arith.constant 0 : i32
    %c0_i32_1 = arith.constant 0 : i32
    %c0_i32_2 = arith.constant 0 : i32
    return %arg0, %c0_i32, %c0_i32_0, %c0_i32_1 : i32, i32, i32, i32
  }
  func.func @transform_4(%arg0: i32) -> (i32, i32, i32, i32) {
    %c0_i32 = arith.constant 0 : i32
    %c0_i32_0 = arith.constant 0 : i32
    %c0_i32_1 = arith.constant 0 : i32
    %c0_i32_2 = arith.constant 0 : i32
    return %arg0, %c0_i32, %c0_i32_0, %c0_i32_1 : i32, i32, i32, i32
  }
}

</mosaic_0001>

<bundles_post_ra>
// kernel: identity_block.4
= control target key start
LH: loop header
LB: loop body
LE: loop exit
PB: predicated region body
PF: predicated region fallthrough
CT: control target
= control target key end

     0   :  { %9 = vsyncpa [#allocation3], 0  ;;  %s1178_s0 = inlined_call_operand.hbm [shape: f32[2,8,8,128], index: 0, kind: input, shape index: {}]   ;;  %s1179_s1 = inlined_call_operand.hbm [shape: bf16[128,128], index: 1, kind: input, shape index: {}]   ;;  %s1180_s2 = inlined_call_operand.hbm [shape: bf16[2,8,8,128], index: 2, kind: output, shape index: {0}]   ;;  %s1181_s3 = inlined_call_operand.hbm [shape: f32[2,2,128], index: 3, kind: output, shape index: {1}]  }
   0x1   :  { %11 = vsyncpa [#allocation3 + $0x1], 0 }
   0x2   :  { %12 = vsyncpa [#allocation6], 0 }
   0x3   :  { %13 = vsyncpa [#allocation4], 0 }
   0x4   :  { %15 = vsyncpa [#allocation4 + $0x1], 0 }
   0x5   :  { %16 = vsyncpa [#allocation9], 0 }
   0x6   :  { %18 = vsyncpa [#allocation9 + $0x1], 0  ;;  %s929_s12 = smov 0   ;;  %s931_s13 = smov 0  }
   0x7   :  { %s933_s14 = smov 0   ;;  %s935_s15 = smov 0  }
   0x8 LB: > { %s950_s16 = sadd.s32 4294967295, %s897_s15   ;;  %s557_s17 = sadd.s32 4294967294, %s897_s15   ;;  %s897_s15 = sphi %s935_s15, %s1201_s15   ;;  %s893_s14 = sphi %s933_s14, %s1200_s14   ;;  %s889_s13 = sphi %s931_s13, %s1199_s13   ;;  %s885_s12 = sphi %s929_s12, %s1198_s12  }
   0x9   : > { %p44_p0 = scmp.ne.s32.totalorder %s889_s13, %s885_s12  ;;  %p1182_p1 = scmp.eq.s32.totalorder %s950_s16, 0 }
   0xa   : > { %p95_p3 = scmp.eq.s32.totalorder %s557_s17, 1  ;;  %p558_p5 = scmp.ge.s32.totalorder %s897_s15, 1 }
   0xb   : > { %p959_p4 = por %p1182_p1, %p44_p0  ;;  %p128_p7 = scmp.lt.s32.totalorder %s897_s15, 3 }
   0xc   : > { %p964_p6 = por %p95_p3, %p44_p0  ;;  %s899_s21 = smov [#allocation5]  }
   0xd   : > { %s1185_s18 = scalar_select %p959_p4, 1, 0 }
   0xe   : > { %s1186_s19 = scalar_select %p964_p6, 1, 0 }
   0xf   : > { %p969_p8 = pnand %p558_p5, %p128_p7  ;;  %s140_s22 = sshll.u32 %s899_s21, 4  ;;  %s973_s22 = int_to_ptr.vmem [resolvable:$true] %s140_s22 }
  0x10   : > { %s985_s24 = sadd.s32 1, %s897_s15   ;;  %s31_s25 = sadd.s32 1, %s893_s14 }
  0x11   : > { %s1187_s20 = scalar_select %p969_p8, 1, 0 }
  0x12   : > { %p671_p9 = pneg %p969_p8  ;;  %s28_s26 = ssub.s32 %s897_s15, %s985_s24 }
  0x13   : > { %s737_s29 = scalar_lea.hbm %s1179_s1, 1024 }
  0x14   : > { %p980_p11 = pnand %p671_p9, %p1182_p1  ;;  %p738_p12 = scmp.ne.s32.totalorder %s1179_s1, %s737_s29 }
  0x15   : > { %p744_p5 = scmp.lt.u32.totalorder %s737_s29, %s1179_s1 }
  0x16   : > { %p739_p13 = pneg %p980_p11 }
  0x18   : > { %p740_p0 = pnand %p739_p13, %p738_p12 }
  0x1a   : > { %p741_p3 = pneg %p740_p0 }
  0x1c   : > { %p746_p7 = pnand %p744_p5, %p741_p3 }
  0x1e   : > { %749 = shalt.err (!%p746_p7)
}
  0x1f   : > { %s750_s7 = scalar_lea.vmem %s973_s22, 1024  ;;  %p758_p2 = scmp.lt.s32.totalorder %s973_s22, %s973_s22 }
  0x20   : > { %p751_p9 = scmp.ne.s32.totalorder %s973_s22, %s750_s7  ;;  %p759_p6 = scmp.lt.s32.totalorder %s750_s7, %s750_s7 }
  0x22   : > { %p753_p10 = pnand %p751_p9, %p739_p13  ;;  %p760_p4 = por %p759_p6, %p758_p2 }
  0x24   : > { %p754_p1 = pneg %p753_p10 }
  0x26   : > { %p761_p8 = pnand %p760_p4, %p754_p1 }
  0x28   : > { %764 = shalt.err (!%p761_p8)
}
  0x29   : > { %s900_s8 = smov 64   ;;  %s901_s9 = smov 4  }
  0x2a   : > { %674 = dma.hbm_to_vmem [thread:$0]  (!%p980_p11), %s1179_s1, 1024, %s973_s22, [#allocation6], %s900_s8, %s900_s8, %s901_s9  }
  0x2b   : > { %p29_p2 = scmp.eq.s32.totalorder %s28_s26, 0  ;;  %p38_p1 = scmp.ne.s32.totalorder %s893_s14, %s889_s13 }
  0x2c   : > { %p39_p4 = scmp.eq.s32.totalorder %s897_s15, 0  ;;  %p687_p6 = scmp.lt.s32.totalorder %s897_s15, 2 }
  0x2d   : > { %s1016_s17 = scalar_select %p29_p2, %s893_s14, %s31_s25  }
  0x2e   : > { %p40_p8 = por %p39_p4, %p38_p1  ;;  %p1189_p10 = scmp.eq.s32.totalorder %s950_s16, 1 }
  0x2f   : > { %s154_s27 = sand.u32 1, %s893_s14   ;;  %s584_s28 = sshll.u32 %s897_s15, 10 }
  0x30   : > { %p1020_p12 = por %p1189_p10, %p38_p1  ;;  %s561_s29 = sshll.u32 %s154_s27, 6 }
  0x31   : > { %s1029_s4 = scalar_lea.hbm %s1178_s0, %s584_s28  ;;  %s158_s22 = scalar_lea.vmem [#allocation2], %s561_s29 }
  0x32   : > { %s165_s25 = sshll.u32 %s158_s22, 4  ;;  %p1031_p11 = pnand %p687_p6, %p40_p8  ;;  %s1035_s25 = int_to_ptr.vmem [resolvable:$true] %s165_s25 }
  0x33   : > { %s1037_s5 = scalar_lea.sflag [#allocation3], %s154_s27  ;;  %s765_s6 = scalar_lea.hbm %s1029_s4, 1024 }
  0x34   : > { %p766_p13 = scmp.ne.s32.totalorder %s1029_s4, %s765_s6  ;;  %p767_p0 = pneg %p1031_p11 }
  0x35   : > { %s770_s9 = scalar_lea.hbm %s1178_s0, 2048  ;;  %p771_p7 = scmp.lt.u32.totalorder %s1029_s4, %s1178_s0 }
  0x36   : > { %p768_p3 = pnand %p767_p0, %p766_p13  ;;  %p772_p9 = scmp.lt.u32.totalorder %s770_s9, %s765_s6 }
  0x37   : > { %p774_p1 = scmp.lt.u32.totalorder %s765_s6, %s1029_s4 }
  0x38   : > { %p769_p5 = pneg %p768_p3  ;;  %p773_p2 = por %p772_p9, %p771_p7 }
  0x3a   : > { %p775_p4 = por %p774_p1, %p773_p2 }
  0x3c   : > { %p776_p6 = pnand %p775_p4, %p769_p5 }
  0x3e   : > { %779 = shalt.err (!%p776_p6)
}
  0x3f   : > { %s780_s27 = scalar_lea.vmem %s1035_s25, 1024  ;;  %s902_s28 = smov [#allocation2]  }
  0x40   : > { %p781_p8 = scmp.ne.s32.totalorder %s1035_s25, %s780_s27  ;;  %s785_s29 = sshll.u32 %s902_s28, 4  ;;  %s786_s29 = int_to_ptr.vmem [resolvable:$false] %s785_s29 }
  0x41   : > { %s787_s23 = scalar_lea.vmem %s786_s29, 2048  ;;  %p788_p3 = scmp.lt.s32.totalorder %s1035_s25, %s786_s29 }
  0x42   : > { %p783_p10 = pnand %p781_p8, %p767_p0  ;;  %p789_p7 = scmp.lt.s32.totalorder %s787_s23, %s780_s27 }
  0x44   : > { %p784_p13 = pneg %p783_p10  ;;  %p790_p9 = por %p789_p7, %p788_p3 }
  0x46   : > { %p791_p2 = pnand %p790_p9, %p784_p13 }
  0x48   : > { %794 = shalt.err (!%p791_p2)
}
  0x49   : > { %s903_s30 = smov 128   ;;  %s904_s22 = smov 8  }
  0x4a   : > { %678 = dma.hbm_to_vmem [thread:$0]  (!%p1031_p11), %s1029_s4, 1024, %s1035_s25, %s1037_s5, %s903_s30, %s903_s30, %s904_s22  }
  0x4b   : > { %p1192_p0 = scmp.ne.s32.totalorder %s1187_s20, 0 }
  0x4c   : > { %s1068_s6 = sand.u32 (!%p1192_p0), 1, %s889_s13   ;;  %p1193_p5 = scmp.ne.s32.totalorder (!%p1192_p0), %s1185_s18, 0 }
  0x4d   : > { %177 = sbr.rel (%p1192_p0) target bundleno = 390 (0x186), region = 28  ;;  %s565_s7 = sshll.u32 (!%p1192_p0), %s1068_s6, 6 }
  0x4e   : > { %s180_s8 = scalar_lea.sflag (!%p1192_p0), [#allocation3], %s1068_s6  ;;  %s1072_s9 = scalar_lea.vmem (!%p1192_p0), [#allocation2], %s565_s7 }
  0x54   : > { %868 = dma.done.wait (%p1193_p5), %s180_s8, 1024  }
  0x55   : > { %870 = vsyncadd (%p1193_p5), %s180_s8, 4294966272  ;;  %p1194_p11 = scmp.eq.s32.totalorder %s950_s16, 0 }
  0x57   : > { %872 = dma.done.wait (%p1194_p11), [#allocation6], 1024   ;;  %p1195_p1 = pmov %p1194_p11 }
  0x58   : > { %v729_v0 = vld [vmem:[#allocation5] sm:$0xff]   ;;  %v730_v1 = vld [vmem:[#allocation5 + $0x8] sm:$0xff]   ;;  %v731_v2 = vld [vmem:[#allocation5 + $0x10] sm:$0xff]   ;;  %s567_s18 = sshll.u32 %s1068_s6, 5  ;;  %s585_s25 = sshll.u32 %s950_s16, 9 }
  0x59   : > { %874 = vsyncadd (%p1195_p1), [#allocation6], 4294966272  ;;  %621 = vmatprep.subr.bf16.mxu0 %v729_v0  ;;  %645 = vmatprep.subr.bf16.mxu1 %v729_v0  ;;  %v732_v3 = vld [vmem:[#allocation5 + $0x18] sm:$0xff]   ;;  %v216_v4 = vld [vmem:[%s1072_s9] sm:$0xff]  ;;  %s207_s20 = scalar_lea.vmem [#allocation7], %s567_s18  ;;  %s1100_s10 = scalar_lea.hbm %s1180_s2, %s585_s25 }
  0x5a   : > { %622 = vmatpush3.bf16.msra.mxu0 %v729_v0  ;;  %653 = vmatpush3.bf16.msra.mxu1 %v729_v0  ;;  %v217_v5 = vld [vmem:[%s1072_s9 + $0x8] sm:$0xff]  ;;  %v220_v7 = vld [vmem:[%s1072_s9 + $0x20] sm:$0xff]  ;;  %v735_v12 = vld [vmem:[#allocation5 + $0x30] sm:$0xff]   ;;  %s429_s4 = sshll.u32 %s207_s20, 4  ;;  %s411_s11 = scalar_lea.sflag [#allocation4], %s1068_s6  ;;  %s1094_s4 = int_to_ptr.vmem [resolvable:$true] %s429_s4 }
  0x5b   : > { %623 = vmatprep.subr.bf16.mxu0 %v730_v1  ;;  %646 = vmatprep.subr.bf16.mxu1 %v730_v1  ;;  %v224_v6 = vpack.c.bf16 %v217_v5, %v216_v4  ;;  %v221_v8 = vld [vmem:[%s1072_s9 + $0x28] sm:$0xff]  ;;  %v733_v10 = vld [vmem:[#allocation5 + $0x20] sm:$0xff]   ;;  %v736_v13 = vld [vmem:[#allocation5 + $0x38] sm:$0xff]   ;;  %s795_s27 = scalar_lea.vmem %s1094_s4, 512  ;;  %s905_s28 = smov [#allocation7]  }
  0x5c   : > { %v226_v9 = vpack.c.bf16 %v221_v8, %v220_v7  ;;  %v734_v11 = vld [vmem:[#allocation5 + $0x28] sm:$0xff]   ;;  %v218_v14 = vld [vmem:[%s1072_s9 + $0x10] sm:$0xff]  ;;  %v219_v15 = vld [vmem:[%s1072_s9 + $0x18] sm:$0xff]  ;;  %p796_p4 = scmp.ne.s32.totalorder %s1094_s4, %s795_s27  ;;  %s799_s29 = sshll.u32 %s905_s28, 4  ;;  %s800_s29 = int_to_ptr.vmem [resolvable:$false] %s799_s29 }
  0x5d   : > { %637 = vmatprep.mubr.bf16.mxu0 %v224_v6  ;;  %v222_v16 = vld [vmem:[%s1072_s9 + $0x30] sm:$0xff]  ;;  %v223_v17 = vld [vmem:[%s1072_s9 + $0x38] sm:$0xff]  ;;  %v225_v18 = vpack.c.bf16 %v219_v15, %v218_v14  ;;  %s801_s23 = scalar_lea.vmem %s800_s29, 1024  ;;  %p802_p10 = scmp.lt.s32.totalorder %s1094_s4, %s800_s29 }
  0x5e   : > { %624 = vmatpush3.bf16.msra.mxu0 %v730_v1  ;;  %654 = vmatpush3.bf16.msra.mxu1 %v730_v1  ;;  %v227_v19 = vpack.c.bf16 %v223_v17, %v222_v16  ;;  %p797_p6 = pnand %p796_p4, %p1020_p12  ;;  %p803_p13 = scmp.lt.s32.totalorder %s801_s23, %s795_s27 }
  0x5f   : > { %625 = vmatprep.subr.bf16.mxu0 %v731_v2  ;;  %647 = vmatprep.subr.bf16.mxu1 %v731_v2 }
  0x60   : > { %641 = vmatprep.mubr.bf16.mxu1 %v226_v9  ;;  %p798_p8 = pneg %p797_p6  ;;  %p804_p3 = por %p803_p13, %p802_p10 }
  0x62   : > { %626 = vmatpush3.bf16.msra.mxu0 %v731_v2  ;;  %655 = vmatpush3.bf16.msra.mxu1 %v731_v2  ;;  %p805_p7 = pnand %p804_p3, %p798_p8 }
  0x63   : > { %627 = vmatprep.subr.bf16.mxu0 %v732_v3  ;;  %648 = vmatprep.subr.bf16.mxu1 %v732_v3 }
  0x66   : > { %628 = vmatpush3.bf16.msra.mxu0 %v732_v3  ;;  %656 = vmatpush3.bf16.msra.mxu1 %v732_v3 }
  0x67   : > { %629 = vmatprep.subr.bf16.mxu0 %v733_v10  ;;  %649 = vmatprep.subr.bf16.mxu1 %v733_v10 }
  0x6a   : > { %630 = vmatpush3.bf16.msra.mxu0 %v733_v10  ;;  %657 = vmatpush3.bf16.msra.mxu1 %v733_v10 }
  0x6b   : > { %631 = vmatprep.subr.bf16.mxu0 %v734_v11  ;;  %650 = vmatprep.subr.bf16.mxu1 %v734_v11 }
  0x6e   : > { %632 = vmatpush3.bf16.msra.mxu0 %v734_v11  ;;  %658 = vmatpush3.bf16.msra.mxu1 %v734_v11 }
  0x6f   : > { %633 = vmatprep.subr.bf16.mxu0 %v735_v12  ;;  %651 = vmatprep.subr.bf16.mxu1 %v735_v12 }
  0x72   : > { %634 = vmatpush3.bf16.msra.mxu0 %v735_v12  ;;  %659 = vmatpush3.bf16.msra.mxu1 %v735_v12 }
  0x73   : > { %635 = vmatprep.subr.bf16.mxu0 %v736_v13  ;;  %652 = vmatprep.subr.bf16.mxu1 %v736_v13 }
  0x76   : > { %636 = vmatpush3.bf16.msra.mxu0 %v736_v13  ;;  %660 = vmatpush3.bf16.msra.mxu1 %v736_v13 }
  0x79   : > { %638 = vmatmul.mubr.bf16.vlgmr.msra.gmra.mrb[0].mxu0 %v225_v18  ;;  %642 = vmatmul.mubr.bf16.vlgmr.msra.gmra.mrb[0].mxu1 %v227_v19 }
 0x14c   : > { %v639_v20 = vpop.f32.mrb[0].mxu0  ;;  %v1091_v21 = vpop.f32.mrb[0].mxu1 }
 0x14d   : > { %v326_v22 = vpop.f32.mrb[1].mxu0  ;;  %v342_v23 = vpop.f32.mrb[1].mxu1  ;;  %v388_v35 = vmul.f32 %v639_v20, %v639_v20 }
 0x14e   : > { %v640_v24 = vpop.f32.mrb[2].mxu0  ;;  %v644_v25 = vpop.f32.mrb[2].mxu1  ;;  %v386_v26 = vmul.f32 %v326_v22, %v326_v22 }
 0x14f   : > { %v594_v27 = vpack.c.bf16 %v640_v24, %v639_v20  ;;  %v329_v28 = vpop.f32.mrb[3].mxu0  ;;  %v604_v29 = vpack.c.bf16 %v644_v25, %v1091_v21  ;;  %v345_v30 = vpop.f32.mrb[3].mxu1 }
 0x150   : > { %v589_v31 = vpack.c.bf16 %v329_v28, %v326_v22  ;;  %v373_v32 = vadd.f32 %v329_v28, %v326_v22  ;;  %v387_v33 = vmul.f32 %v329_v28, %v329_v28  ;;  %v599_v34 = vpack.c.bf16 %v345_v30, %v342_v23 }
 0x151   : > { %606 = vst [vmem:[%s207_s20 + $0x8] sm:$0xff] %v594_v27   ;;  %608 = vst [vmem:[%s207_s20 + $0x18] sm:$0xff] %v604_v29  }
 0x152   : > { %590 = vst [vmem:[%s207_s20] sm:$0xff] %v589_v31   ;;  %v374_v36 = vadd.f32 %v639_v20, %v373_v32  ;;  %v394_v37 = vadd.f32 %v387_v33, %v386_v26  ;;  %607 = vst [vmem:[%s207_s20 + $0x10] sm:$0xff] %v599_v34  }
 0x153   : > { %808 = shalt.err (!%p805_p7)
}
 0x154   : > { %s809_s30 = scalar_lea.hbm %s1100_s10, 512  ;;  %s813_s8 = scalar_lea.hbm %s1180_s2, 1024 }
 0x155   : > { %p810_p9 = scmp.ne.s32.totalorder %s1100_s10, %s809_s30  ;;  %p814_p5 = scmp.lt.u32.totalorder %s1100_s10, %s1180_s2 }
 0x156   : > { %p815_p11 = scmp.lt.u32.totalorder %s813_s8, %s809_s30  ;;  %p817_p4 = scmp.lt.u32.totalorder %s809_s30, %s1100_s10 }
 0x157   : > { %p811_p2 = pnand %p810_p9, %p1020_p12 }
 0x158   : > { %p816_p1 = por %p815_p11, %p814_p5 }
 0x159   : > { %p812_p0 = pneg %p811_p2 }
 0x15a   : > { %p818_p6 = por %p817_p4, %p816_p1 }
 0x15c   : > { %p819_p8 = pnand %p818_p6, %p812_p0 }
 0x15e   : > { %822 = shalt.err (!%p819_p8)
}
 0x15f   : > { %s906_s20 = smov 64   ;;  %s907_s25 = smov 4   ;;  %v389_v38 = vmul.f32 %v640_v24, %v640_v24  ;;  %v395_v39 = vadd.f32 %v394_v37, %v388_v35  ;;  %v375_v40 = vadd.f32 %v640_v24, %v374_v36  ;;  %v390_v41 = vmul.f32 %v342_v23, %v342_v23 }
 0x160   : > { %667 = dma.vmem_to_hbm [thread:$0]  (%p1020_p12), %s1094_s4, 512, %s1100_s10, %s411_s11, %s906_s20, %s906_s20, %s907_s25   ;;  %v391_v46 = vmul.f32 %v345_v30, %v345_v30  ;;  %v392_v47 = vmul.f32 %v1091_v21, %v1091_v21  ;;  %v393_v50 = vmul.f32 %v644_v25, %v644_v25  ;;  %vm407_vm0 = vcmask 1040384  }
 0x161   : > { %v376_v42 = vadd.f32 %v375_v40, %v342_v23  ;;  %v396_v43 = vadd.f32 %v395_v39, %v389_v38  ;;  %s568_s4 = sshll.u32 %s1068_s6, 1  ;;  %s581_s26 = sshll.u32 %s950_s16, 5 }
 0x162   : > { %s214_s5 = scalar_lea.vmem [#allocation8], %s568_s4  ;;  %s1134_s28 = scalar_lea.hbm %s1181_s3, %s581_s26 }
 0x163   : > { %v397_v44 = vadd.f32 %v396_v43, %v390_v41  ;;  %v377_v45 = vadd.f32 %v376_v42, %v345_v30  ;;  %s445_s10 = sshll.u32 %s214_s5, 4  ;;  %s416_s29 = scalar_lea.sflag [#allocation9], %s1068_s6  ;;  %s1136_s10 = int_to_ptr.vmem [resolvable:$true] %s445_s10 }
 0x164   : > { %s823_s23 = scalar_lea.vmem %s1136_s10, 32  ;;  %s908_s16 = smov [#allocation8]  }
 0x165   : > { %v378_v48 = vadd.f32 %v1091_v21, %v377_v45  ;;  %v398_v49 = vadd.f32 %v397_v44, %v391_v46  ;;  %p824_p10 = scmp.ne.s32.totalorder %s1136_s10, %s823_s23  ;;  %s827_s30 = sshll.u32 %s908_s16, 4  ;;  %s828_s30 = int_to_ptr.vmem [resolvable:$false] %s827_s30 }
 0x166   : > { %s829_s22 = scalar_lea.vmem %s828_s30, 64  ;;  %p830_p7 = scmp.lt.s32.totalorder %s1136_s10, %s828_s30 }
 0x167   : > { %v379_v51 = vadd.f32 %v644_v25, %v378_v48  ;;  %v399_v52 = vadd.f32 %v398_v49, %v392_v47  ;;  %p825_p13 = pnand %p824_p10, %p1020_p12  ;;  %p831_p9 = scmp.lt.s32.totalorder %s829_s22, %s823_s23 }
 0x169   : > { %v380_v53 = vrot.slane %v379_v51, 4  ;;  %v400_v54 = vadd.f32 %v399_v52, %v393_v50  ;;  %p826_p3 = pneg %p825_p13  ;;  %p832_p2 = por %p831_p9, %p830_p7 }
 0x16b   : > { %v381_v55 = vadd.f32 %v380_v53, %v379_v51  ;;  %v401_v56 = vrot.slane %v400_v54, 4  ;;  %p833_p0 = pnand %p832_p2, %p826_p3 }
 0x16d   : > { %v382_v57 = vrot.slane %v381_v55, 2  ;;  %v402_v58 = vadd.f32 %v401_v56, %v400_v54 }
 0x16f   : > { %v383_v59 = vadd.f32 %v382_v57, %v381_v55  ;;  %v403_v60 = vrot.slane %v402_v58, 2 }
 0x171   : > { %v384_v61 = vrot.slane %v383_v59, 1  ;;  %v404_v62 = vadd.f32 %v403_v60, %v402_v58 }
 0x173   : > { %v405_v63 = vrot.slane %v404_v62, 1  ;;  %v385_v0 = vadd.f32 %v384_v61, %v383_v59 }
 0x175   : > { %v406_v1 = vadd.f32 %v405_v63, %v404_v62 }
 0x177   : > { %v408_v2 = vsel %vm407_vm0, %v385_v0, %v406_v1 }
 0x178   : > { %409 = vst [vmem:[%s214_s5] sm:$0x3] %v408_v2 }
 0x179   : > { %836 = shalt.err (!%p833_p0)
}
 0x17a   : > { %s837_s6 = scalar_lea.hbm %s1134_s28, 32  ;;  %s841_s9 = scalar_lea.hbm %s1181_s3, 64 }
 0x17b   : > { %p838_p5 = scmp.ne.s32.totalorder %s1134_s28, %s837_s6  ;;  %p842_p4 = scmp.lt.u32.totalorder %s1134_s28, %s1181_s3 }
 0x17c   : > { %p843_p6 = scmp.lt.u32.totalorder %s841_s9, %s837_s6  ;;  %p845_p10 = scmp.lt.u32.totalorder %s837_s6, %s1134_s28 }
 0x17d   : > { %p839_p11 = pnand %p838_p5, %p1020_p12 }
 0x17e   : > { %p844_p8 = por %p843_p6, %p842_p4 }
 0x17f   : > { %p840_p1 = pneg %p839_p11 }
 0x180   : > { %p846_p13 = por %p845_p10, %p844_p8 }
 0x182   : > { %p847_p3 = pnand %p846_p13, %p840_p1 }
 0x184   : > { %850 = shalt.err (!%p847_p3)
}
 0x185   : > { %668 = dma.vmem_to_hbm [thread:$0]  (%p1020_p12), %s1136_s10, 32, %s1134_s28, %s416_s29  }
 0x186 PF: > { %s457_s25 = sand.u32 1, %s885_s12   ;;  %p1196_p7 = scmp.ne.s32.totalorder %s1186_s19, 0 }
 0x187   : > { %p1197_p9 = scmp.ge.s32.totalorder %s897_s15, 2  ;;  %s458_s4 = scalar_lea.sflag [#allocation4], %s457_s25 }
 0x189   : > { %p680_p2 = pnand %p1197_p9, %p1196_p7 }
 0x18b   : > { %876 = dma.done.wait (!%p680_p2), %s458_s4, 512  }
 0x18c   : > { %878 = vsyncadd (!%p680_p2), %s458_s4, 4294966784  ;;  %s467_s26 = scalar_lea.sflag [#allocation9], %s457_s25 }
 0x18d   : > { %880 = dma.done.wait (!%p680_p2), %s467_s26, 32  }
 0x18e   : > { %882 = vsyncadd (!%p680_p2), %s467_s26, 4294967264  ;;  %p21_p12 = scmp.ge.s32.totalorder %s985_s24, 4   ;;  %s1198_s12 = smov %s889_s13 }
 0x18f   : > { %s1199_s13 = smov %s893_s14  ;;  %s1200_s14 = smov %s1016_s17 }
 0x190   : > { %s1201_s15 = smov %s985_s24  ;;  %23 = sbr.rel (!%p21_p12) target bundleno = 8 (0x8), region = 94 }
 0x197   :  { %472 = vsyncpa [#allocation3], 1 }
 0x198   :  { %474 = vsyncpa [#allocation3 + $0x1], 1 }
 0x199   :  { %475 = vsyncpa [#allocation6], 1 }
 0x19a   :  { %476 = vsyncpa [#allocation4], 1 }
 0x19b   :  { %478 = vsyncpa [#allocation4 + $0x1], 1 }
 0x19c   :  { %479 = vsyncpa [#allocation9], 1 }
 0x19d   :  { %481 = vsyncpa [#allocation9 + $0x1], 1 }

// kernel: identity_block.6
= control target key start
LH: loop header
LB: loop body
LE: loop exit
PB: predicated region body
PF: predicated region fallthrough
CT: control target
= control target key end

     0   :  { %11 = vsyncpa [#allocation3], 0  ;;  %s1496_s0 = inlined_call_operand.hbm [shape: bf16[2,8,8,128], index: 0, kind: input, shape index: {}]   ;;  %s1497_s1 = inlined_call_operand.hbm [shape: f32[1,128], index: 1, kind: input, shape index: {}]   ;;  %s1498_s2 = inlined_call_operand.hbm [shape: f32[1,128], index: 2, kind: input, shape index: {}]   ;;  %s1499_s3 = inlined_call_operand.hbm [shape: bf16[128,128], index: 3, kind: input, shape index: {}]   ;;  %s1500_s4 = inlined_call_operand.hbm [shape: bf16[2,8,8,128], index: 4, kind: output, shape index: {0}]   ;;  %s1501_s5 = inlined_call_operand.hbm [shape: f32[2,2,128], index: 5, kind: output, shape index: {1}]  }
   0x1   :  { %13 = vsyncpa [#allocation3 + $0x1], 0 }
   0x2   :  { %14 = vsyncpa [#allocation6], 0 }
   0x3   :  { %15 = vsyncpa [#allocation9], 0 }
   0x4   :  { %16 = vsyncpa [#allocation4], 0 }
   0x5   :  { %18 = vsyncpa [#allocation4 + $0x1], 0 }
   0x6   :  { %19 = vsyncpa [#allocation12], 0 }
   0x7   :  { %21 = vsyncpa [#allocation12 + $0x1], 0  ;;  %s1186_s18 = smov 0   ;;  %s1188_s19 = smov 0  }
   0x8   :  { %s1190_s20 = smov 0   ;;  %s1192_s21 = smov 0  }
   0x9 LB: > { %s1207_s22 = sadd.s32 4294967295, %s1144_s21   ;;  %s701_s23 = sadd.s32 4294967294, %s1144_s21   ;;  %s1144_s21 = sphi %s1192_s21, %s1524_s21   ;;  %s1140_s20 = sphi %s1190_s20, %s1523_s20   ;;  %s1136_s19 = sphi %s1188_s19, %s1522_s19   ;;  %s1132_s18 = sphi %s1186_s18, %s1521_s18  }
   0xa   : > { %p47_p0 = scmp.ne.s32.totalorder %s1136_s19, %s1132_s18  ;;  %p1502_p1 = scmp.eq.s32.totalorder %s1207_s22, 0 }
   0xb   : > { %p140_p3 = scmp.eq.s32.totalorder %s701_s23, 1  ;;  %p702_p5 = scmp.ge.s32.totalorder %s1144_s21, 1 }
   0xc   : > { %p1216_p4 = por %p1502_p1, %p47_p0  ;;  %p173_p7 = scmp.lt.s32.totalorder %s1144_s21, 3 }
   0xd   : > { %p1221_p6 = por %p140_p3, %p47_p0  ;;  %s1146_s27 = smov [#allocation5]  }
   0xe   : > { %s1505_s24 = scalar_select %p1216_p4, 1, 0 }
   0xf   : > { %s1506_s25 = scalar_select %p1221_p6, 1, 0 }
  0x10   : > { %p1226_p8 = pnand %p702_p5, %p173_p7  ;;  %s186_s28 = sshll.u32 %s1146_s27, 4  ;;  %s187_s28 = int_to_ptr.vmem [resolvable:$true] %s186_s28 }
  0x11   : > { %s1147_s29 = smov [#allocation7]   ;;  %s1148_s7 = smov [#allocation8]  }
  0x12   : > { %s1507_s26 = scalar_select %p1226_p8, 1, 0 }
  0x13   : > { %p848_p10 = pneg %p1226_p8  ;;  %s197_s30 = sshll.u32 %s1147_s29, 4  ;;  %s1239_s30 = int_to_ptr.vmem [resolvable:$true] %s197_s30 }
  0x14   : > { %s207_s8 = sshll.u32 %s1148_s7, 4  ;;  %s924_s11 = scalar_lea.hbm %s1497_s1, 16  ;;  %s1241_s8 = int_to_ptr.vmem [resolvable:$true] %s207_s8 }
  0x15   : > { %p1235_p11 = pnand %p848_p10, %p1502_p1  ;;  %p925_p12 = scmp.ne.s32.totalorder %s1497_s1, %s924_s11 }
  0x16   : > { %p931_p5 = scmp.lt.u32.totalorder %s924_s11, %s1497_s1 }
  0x17   : > { %p1251_p13 = pneg %p1235_p11 }
  0x19   : > { %p927_p0 = pnand %p1251_p13, %p925_p12 }
  0x1b   : > { %p928_p3 = pneg %p927_p0 }
  0x1d   : > { %p933_p7 = pnand %p931_p5, %p928_p3 }
  0x1f   : > { %936 = shalt.err (!%p933_p7)
}
  0x20   : > { %s937_s17 = scalar_lea.vmem %s187_s28, 16  ;;  %s944_s23 = scalar_lea.vmem %s187_s28, 32 }
  0x21   : > { %p938_p10 = scmp.ne.s32.totalorder %s187_s28, %s937_s17  ;;  %p945_p2 = scmp.lt.s32.totalorder %s187_s28, %s187_s28 }
  0x22   : > { %p946_p6 = scmp.lt.s32.totalorder %s944_s23, %s937_s17 }
  0x23   : > { %p940_p9 = pnand %p938_p10, %p1251_p13 }
  0x24   : > { %p947_p4 = por %p946_p6, %p945_p2 }
  0x25   : > { %p941_p1 = pneg %p940_p9 }
  0x27   : > { %p948_p8 = pnand %p947_p4, %p941_p1 }
  0x29   : > { %951 = shalt.err (!%p948_p8)
}
  0x2a   : > { %851 = dma.hbm_to_vmem [thread:$0]  (!%p1235_p11), %s1497_s1, 16, %s187_s28, [#allocation6]  }
  0x2b   : > { %s952_s10 = scalar_lea.hbm %s1498_s2, 16 }
  0x2c   : > { %p953_p9 = scmp.ne.s32.totalorder %s1498_s2, %s952_s10  ;;  %p959_p1 = scmp.lt.u32.totalorder %s952_s10, %s1498_s2 }
  0x2e   : > { %p955_p12 = pnand %p953_p9, %p1251_p13 }
  0x30   : > { %p956_p2 = pneg %p955_p12 }
  0x32   : > { %p961_p4 = pnand %p959_p1, %p956_p2 }
  0x34   : > { %964 = shalt.err (!%p961_p4)
}
  0x35   : > { %s965_s28 = scalar_lea.vmem %s1239_s30, 16  ;;  %s972_s16 = scalar_lea.vmem %s1239_s30, 32 }
  0x36   : > { %p966_p6 = scmp.ne.s32.totalorder %s1239_s30, %s965_s28  ;;  %p973_p3 = scmp.lt.s32.totalorder %s1239_s30, %s1239_s30 }
  0x37   : > { %p974_p5 = scmp.lt.s32.totalorder %s972_s16, %s965_s28 }
  0x38   : > { %p968_p8 = pnand %p966_p6, %p1251_p13 }
  0x39   : > { %p975_p7 = por %p974_p5, %p973_p3 }
  0x3a   : > { %p969_p0 = pneg %p968_p8 }
  0x3c   : > { %p976_p10 = pnand %p975_p7, %p969_p0 }
  0x3e   : > { %979 = shalt.err (!%p976_p10)
}
  0x3f   : > { %854 = dma.hbm_to_vmem [thread:$0]  (!%p1235_p11), %s1498_s2, 16, %s1239_s30, [#allocation6]  }
  0x40   : > { %s980_s7 = scalar_lea.hbm %s1499_s3, 1024 }
  0x41   : > { %p981_p9 = scmp.ne.s32.totalorder %s1499_s3, %s980_s7  ;;  %p987_p1 = scmp.lt.u32.totalorder %s980_s7, %s1499_s3 }
  0x43   : > { %p983_p12 = pnand %p981_p9, %p1251_p13 }
  0x45   : > { %p984_p2 = pneg %p983_p12 }
  0x47   : > { %p989_p4 = pnand %p987_p1, %p984_p2 }
  0x49   : > { %992 = shalt.err (!%p989_p4)
}
  0x4a   : > { %s993_s30 = scalar_lea.vmem %s1241_s8, 1024  ;;  %p1001_p3 = scmp.lt.s32.totalorder %s1241_s8, %s1241_s8 }
  0x4b   : > { %p994_p6 = scmp.ne.s32.totalorder %s1241_s8, %s993_s30  ;;  %p1002_p5 = scmp.lt.s32.totalorder %s993_s30, %s993_s30 }
  0x4d   : > { %p996_p8 = pnand %p994_p6, %p1251_p13  ;;  %p1003_p7 = por %p1002_p5, %p1001_p3 }
  0x4f   : > { %p997_p0 = pneg %p996_p8 }
  0x51   : > { %p1004_p10 = pnand %p1003_p7, %p997_p0 }
  0x53   : > { %1007 = shalt.err (!%p1004_p10)
}
  0x54   : > { %s1149_s13 = smov 64   ;;  %s1150_s14 = smov 4  }
  0x55   : > { %857 = dma.hbm_to_vmem [thread:$0]  (!%p1235_p11), %s1499_s3, 1024, %s1241_s8, [#allocation9], %s1149_s13, %s1149_s13, %s1150_s14  }
  0x56   : > { %s1318_s16 = sadd.s32 1, %s1144_s21   ;;  %s34_s23 = sadd.s32 1, %s1140_s20 }
  0x57   : > { %s31_s17 = ssub.s32 %s1144_s21, %s1318_s16  ;;  %p41_p9 = scmp.ne.s32.totalorder %s1140_s20, %s1136_s19 }
  0x58   : > { %p32_p13 = scmp.eq.s32.totalorder %s31_s17, 0  ;;  %p42_p12 = scmp.eq.s32.totalorder %s1144_s21, 0 }
  0x59   : > { %p872_p2 = scmp.lt.s32.totalorder %s1144_s21, 2  ;;  %p1510_p4 = scmp.eq.s32.totalorder %s1207_s22, 1 }
  0x5a   : > { %s1328_s27 = scalar_select %p32_p13, %s1140_s20, %s34_s23  }
  0x5b   : > { %p43_p1 = por %p42_p12, %p41_p9  ;;  %p1332_p6 = por %p1510_p4, %p41_p9 }
  0x5c   : > { %s221_s29 = sand.u32 1, %s1140_s20   ;;  %s734_s7 = sshll.u32 %s1144_s21, 9 }
  0x5d   : > { %s707_s8 = sshll.u32 %s221_s29, 5  ;;  %s1341_s11 = scalar_lea.hbm %s1496_s0, %s734_s7 }
  0x5e   : > { %s225_s12 = scalar_lea.vmem [#allocation2], %s707_s8  ;;  %p1343_p11 = pnand %p872_p2, %p43_p1 }
  0x5f   : > { %s232_s30 = sshll.u32 %s225_s12, 4  ;;  %s1349_s28 = scalar_lea.sflag [#allocation3], %s221_s29  ;;  %s1347_s30 = int_to_ptr.vmem [resolvable:$true] %s232_s30 }
  0x60   : > { %s1008_s17 = scalar_lea.hbm %s1341_s11, 512  ;;  %p1010_p0 = pneg %p1343_p11 }
  0x61   : > { %p1009_p8 = scmp.ne.s32.totalorder %s1341_s11, %s1008_s17  ;;  %s1013_s8 = scalar_lea.hbm %s1496_s0, 1024 }
  0x62   : > { %p1014_p7 = scmp.lt.u32.totalorder %s1341_s11, %s1496_s0  ;;  %p1015_p10 = scmp.lt.u32.totalorder %s1013_s8, %s1008_s17 }
  0x63   : > { %p1011_p3 = pnand %p1010_p0, %p1009_p8  ;;  %p1017_p9 = scmp.lt.u32.totalorder %s1008_s17, %s1341_s11 }
  0x64   : > { %p1016_p13 = por %p1015_p10, %p1014_p7 }
  0x65   : > { %p1012_p5 = pneg %p1011_p3 }
  0x66   : > { %p1018_p12 = por %p1017_p9, %p1016_p13 }
  0x68   : > { %p1019_p2 = pnand %p1018_p12, %p1012_p5 }
  0x6a   : > { %1022 = shalt.err (!%p1019_p2)
}
  0x6b   : > { %s1023_s29 = scalar_lea.vmem %s1347_s30, 512  ;;  %s1151_s12 = smov [#allocation2]  }
  0x6c   : > { %p1024_p1 = scmp.ne.s32.totalorder %s1347_s30, %s1023_s29  ;;  %s1028_s23 = sshll.u32 %s1151_s12, 4  ;;  %s1029_s23 = int_to_ptr.vmem [resolvable:$false] %s1028_s23 }
  0x6d   : > { %s1030_s7 = scalar_lea.vmem %s1029_s23, 1024  ;;  %p1031_p3 = scmp.lt.s32.totalorder %s1347_s30, %s1029_s23 }
  0x6e   : > { %p1026_p4 = pnand %p1024_p1, %p1010_p0  ;;  %p1032_p7 = scmp.lt.s32.totalorder %s1030_s7, %s1023_s29 }
  0x70   : > { %p1027_p8 = pneg %p1026_p4  ;;  %p1033_p10 = por %p1032_p7, %p1031_p3 }
  0x72   : > { %p1034_p13 = pnand %p1033_p10, %p1027_p8 }
  0x74   : > { %1037 = shalt.err (!%p1034_p13)
}
  0x75   : > { %861 = dma.hbm_to_vmem [thread:$0]  (!%p1343_p11), %s1341_s11, 512, %s1347_s30, %s1349_s28, %s1149_s13, %s1149_s13, %s1150_s14  }
  0x76   : > { %p1513_p0 = scmp.ne.s32.totalorder %s1507_s26, 0 }
  0x77   : > { %s1383_s17 = sand.u32 (!%p1513_p0), 1, %s1136_s19   ;;  %p1514_p5 = scmp.ne.s32.totalorder (!%p1513_p0), %s1505_s24, 0 }
  0x78   : > { %244 = sbr.rel (%p1513_p0) target bundleno = 437 (0x1b5), region = 36  ;;  %s711_s8 = sshll.u32 (!%p1513_p0), %s1383_s17, 5 }
  0x79   : > { %s247_s9 = scalar_lea.sflag (!%p1513_p0), [#allocation3], %s1383_s17  ;;  %s1389_s15 = scalar_lea.vmem (!%p1513_p0), [#allocation2], %s711_s8 }
  0x7f   : > { %1111 = dma.done.wait (%p1514_p5), %s247_s9, 512  }
  0x80   : > { %1113 = vsyncadd (%p1514_p5), %s247_s9, 4294966784  ;;  %p1515_p11 = scmp.eq.s32.totalorder %s1207_s22, 0 }
  0x82   : > { %1115 = dma.done.wait (%p1515_p11), [#allocation6], 32   ;;  %p1516_p9 = pmov %p1515_p11 }
  0x84   : > { %1117 = vsyncadd (%p1516_p9), [#allocation6], 4294967264  ;;  %p1517_p12 = pmov %p1516_p9 }
  0x85   : > { %p1518_p2 = pmov %p1516_p9 }
  0x86   : > { %1119 = dma.done.wait (%p1517_p12), [#allocation9], 1024  }
  0x87   : > { %1121 = vsyncadd (%p1518_p2), [#allocation9], 4294966272  ;;  %v916_v0 = vld [vmem:[#allocation8] sm:$0xff]   ;;  %v917_v1 = vld [vmem:[#allocation8 + $0x8] sm:$0xff]   ;;  %s286_s24 = scalar_lea.vmem [#allocation10], %s711_s8  ;;  %s735_s13 = sshll.u32 %s1207_s22, 9 }
  0x88   : > { %790 = vmatprep.subr.bf16.mxu0 %v916_v0  ;;  %814 = vmatprep.subr.bf16.mxu1 %v916_v0  ;;  %v918_v2 = vld [vmem:[#allocation8 + $0x10] sm:$0xff]   ;;  %v919_v3 = vld [vmem:[#allocation8 + $0x18] sm:$0xff]   ;;  %v772_v10 = vld [vmem:[%s1389_s15 + $0x8] sm:$0xff]   ;;  %s554_s26 = sshll.u32 %s286_s24, 4  ;;  %s1418_s30 = scalar_lea.hbm %s1500_s4, %s735_s13  ;;  %s1412_s26 = int_to_ptr.vmem [resolvable:$true] %s554_s26 }
  0x89   : > { %791 = vmatpush3.bf16.msra.mxu0 %v916_v0  ;;  %822 = vmatpush3.bf16.msra.mxu1 %v916_v0  ;;  %v737_v4 = vld [vmem:[%s1389_s15] sm:$0xff]   ;;  %v773_v8 = vld [vmem:[%s1389_s15 + $0x10] sm:$0xff]   ;;  %v774_v15 = vld [vmem:[%s1389_s15 + $0x18] sm:$0xff]   ;;  %v742_v20 = vunpack.c.l.bf16 %v772_v10  ;;  %v743_v22 = vunpack.c.h.bf16 %v772_v10  ;;  %s536_s28 = scalar_lea.sflag [#allocation4], %s1383_s17  ;;  %s1038_s10 = scalar_lea.vmem %s1412_s26, 512 }
  0x8a   : > { %792 = vmatprep.subr.bf16.mxu0 %v917_v1  ;;  %815 = vmatprep.subr.bf16.mxu1 %v917_v1  ;;  %v717_v5 = vld [vmem:[#allocation5] ss:$0 sm:$0xff]  ;;  %v738_v6 = vunpack.c.l.bf16 %v737_v4  ;;  %v739_v7 = vunpack.c.h.bf16 %v737_v4  ;;  %v718_v9 = vld [vmem:[#allocation7] ss:$0 sm:$0xff]  ;;  %v746_v11 = vunpack.c.l.bf16 %v773_v8  ;;  %v747_v12 = vunpack.c.h.bf16 %v773_v8  ;;  %v920_v16 = vld [vmem:[#allocation8 + $0x20] sm:$0xff]   ;;  %p1039_p1 = scmp.ne.s32.totalorder %s1412_s26, %s1038_s10  ;;  %s1152_s29 = smov [#allocation10]  }
  0x8b   : > { %v750_v24 = vunpack.c.l.bf16 %v774_v15  ;;  %v751_v25 = vunpack.c.h.bf16 %v774_v15  ;;  %v921_v29 = vld [vmem:[#allocation8 + $0x28] sm:$0xff]   ;;  %v320_v33 = vmul.f32 %v742_v20, %v717_v5  ;;  %v321_v34 = vmul.f32 %v743_v22, %v717_v5  ;;  %v922_v38 = vld [vmem:[#allocation8 + $0x30] sm:$0xff]   ;;  %v923_v43 = vld [vmem:[#allocation8 + $0x38] sm:$0xff]   ;;  %s1042_s12 = sshll.u32 %s1152_s29, 4  ;;  %s1043_s12 = int_to_ptr.vmem [resolvable:$false] %s1042_s12 }
  0x8c   : > { %v318_v13 = vmul.f32 %v738_v6, %v717_v5  ;;  %v319_v14 = vmul.f32 %v739_v7, %v717_v5  ;;  %v322_v17 = vmul.f32 %v746_v11, %v717_v5  ;;  %v323_v21 = vmul.f32 %v747_v12, %v717_v5  ;;  %p1040_p4 = pnand %p1039_p1, %p1332_p6  ;;  %s1044_s23 = scalar_lea.vmem %s1043_s12, 1024 }
  0x8d   : > { %793 = vmatpush3.bf16.msra.mxu0 %v917_v1  ;;  %823 = vmatpush3.bf16.msra.mxu1 %v917_v1  ;;  %v324_v35 = vmul.f32 %v750_v24, %v717_v5  ;;  %v325_v36 = vmul.f32 %v751_v25, %v717_v5  ;;  %v335_v39 = vadd.f32 %v718_v9, %v320_v33  ;;  %p1045_p3 = scmp.lt.s32.totalorder %s1412_s26, %s1043_s12  ;;  %p1046_p7 = scmp.lt.s32.totalorder %s1044_s23, %s1038_s10 }
  0x8e   : > { %794 = vmatprep.subr.bf16.mxu0 %v918_v2  ;;  %816 = vmatprep.subr.bf16.mxu1 %v918_v2  ;;  %v333_v18 = vadd.f32 %v718_v9, %v318_v13  ;;  %v334_v19 = vadd.f32 %v718_v9, %v319_v14  ;;  %v337_v23 = vadd.f32 %v718_v9, %v322_v17  ;;  %p1041_p8 = pneg %p1040_p4 }
  0x8f   : > { %v338_v28 = vadd.f32 %v718_v9, %v323_v21  ;;  %v336_v40 = vadd.f32 %v718_v9, %v321_v34  ;;  %v339_v41 = vadd.f32 %v718_v9, %v324_v35  ;;  %v340_v42 = vadd.f32 %v718_v9, %v325_v36  ;;  %p1047_p10 = por %p1046_p7, %p1045_p3 }
  0x90   : > { %v341_v26 = vmax.f32 %v333_v18, 0.0  ;;  %v342_v27 = vmax.f32 %v334_v19, 0.0  ;;  %v345_v30 = vmax.f32 %v337_v23, 0.0  ;;  %v343_v44 = vmax.f32 %v335_v39, 0.0 }
  0x91   : > { %795 = vmatpush3.bf16.msra.mxu0 %v918_v2  ;;  %824 = vmatpush3.bf16.msra.mxu1 %v918_v2  ;;  %v346_v32 = vmax.f32 %v338_v28, 0.0  ;;  %v344_v45 = vmax.f32 %v336_v40, 0.0  ;;  %v347_v46 = vmax.f32 %v339_v41, 0.0  ;;  %v348_v47 = vmax.f32 %v340_v42, 0.0  ;;  %p1048_p13 = pnand %p1047_p10, %p1041_p8 }
  0x92   : > { %796 = vmatprep.subr.bf16.mxu0 %v919_v3  ;;  %817 = vmatprep.subr.bf16.mxu1 %v919_v3  ;;  %v349_v31 = vpack.c.bf16 %v342_v27, %v341_v26 }
  0x93   : > { %v351_v37 = vpack.c.bf16 %v346_v32, %v345_v30  ;;  %v350_v48 = vpack.c.bf16 %v344_v45, %v343_v44  ;;  %v352_v49 = vpack.c.bf16 %v348_v47, %v347_v46 }
  0x94   : > { %806 = vmatprep.mubr.bf16.mxu0 %v349_v31 }
  0x95   : > { %797 = vmatpush3.bf16.msra.mxu0 %v919_v3  ;;  %825 = vmatpush3.bf16.msra.mxu1 %v919_v3 }
  0x96   : > { %798 = vmatprep.subr.bf16.mxu0 %v920_v16  ;;  %818 = vmatprep.subr.bf16.mxu1 %v920_v16 }
  0x97   : > { %810 = vmatprep.mubr.bf16.mxu1 %v351_v37 }
  0x99   : > { %799 = vmatpush3.bf16.msra.mxu0 %v920_v16  ;;  %826 = vmatpush3.bf16.msra.mxu1 %v920_v16 }
  0x9a   : > { %800 = vmatprep.subr.bf16.mxu0 %v921_v29  ;;  %819 = vmatprep.subr.bf16.mxu1 %v921_v29 }
  0x9d   : > { %801 = vmatpush3.bf16.msra.mxu0 %v921_v29  ;;  %827 = vmatpush3.bf16.msra.mxu1 %v921_v29 }
  0x9e   : > { %802 = vmatprep.subr.bf16.mxu0 %v922_v38  ;;  %820 = vmatprep.subr.bf16.mxu1 %v922_v38 }
  0xa1   : > { %803 = vmatpush3.bf16.msra.mxu0 %v922_v38  ;;  %828 = vmatpush3.bf16.msra.mxu1 %v922_v38 }
  0xa2   : > { %804 = vmatprep.subr.bf16.mxu0 %v923_v43  ;;  %821 = vmatprep.subr.bf16.mxu1 %v923_v43 }
  0xa5   : > { %805 = vmatpush3.bf16.msra.mxu0 %v923_v43  ;;  %829 = vmatpush3.bf16.msra.mxu1 %v923_v43 }
  0xa8   : > { %807 = vmatmul.mubr.bf16.vlgmr.msra.gmra.mrb[0].mxu0 %v350_v48  ;;  %811 = vmatmul.mubr.bf16.vlgmr.msra.gmra.mrb[0].mxu1 %v352_v49 }
 0x17b   : > { %v808_v50 = vpop.f32.mrb[0].mxu0  ;;  %v1409_v51 = vpop.f32.mrb[0].mxu1 }
 0x17c   : > { %v451_v52 = vpop.f32.mrb[1].mxu0  ;;  %v467_v53 = vpop.f32.mrb[1].mxu1  ;;  %v513_v1 = vmul.f32 %v808_v50, %v808_v50 }
 0x17d   : > { %v809_v54 = vpop.f32.mrb[2].mxu0  ;;  %v813_v55 = vpop.f32.mrb[2].mxu1  ;;  %v511_v56 = vmul.f32 %v451_v52, %v451_v52 }
 0x17e   : > { %v760_v57 = vpack.c.bf16 %v809_v54, %v808_v50  ;;  %v454_v58 = vpop.f32.mrb[3].mxu0  ;;  %v770_v59 = vpack.c.bf16 %v813_v55, %v1409_v51  ;;  %v470_v60 = vpop.f32.mrb[3].mxu1 }
 0x17f   : > { %v755_v61 = vpack.c.bf16 %v454_v58, %v451_v52  ;;  %v498_v62 = vadd.f32 %v454_v58, %v451_v52  ;;  %v512_v63 = vmul.f32 %v454_v58, %v454_v58  ;;  %v765_v0 = vpack.c.bf16 %v470_v60, %v467_v53 }
 0x180   : > { %775 = vst [vmem:[%s286_s24 + $0x8] sm:$0xff] %v760_v57   ;;  %777 = vst [vmem:[%s286_s24 + $0x18] sm:$0xff] %v770_v59  }
 0x181   : > { %756 = vst [vmem:[%s286_s24] sm:$0xff] %v755_v61   ;;  %v499_v2 = vadd.f32 %v808_v50, %v498_v62  ;;  %v519_v3 = vadd.f32 %v512_v63, %v511_v56  ;;  %776 = vst [vmem:[%s286_s24 + $0x10] sm:$0xff] %v765_v0  }
 0x182   : > { %1051 = shalt.err (!%p1048_p13)
}
 0x183   : > { %s1052_s7 = scalar_lea.hbm %s1418_s30, 512  ;;  %s1056_s15 = scalar_lea.hbm %s1500_s4, 1024 }
 0x184   : > { %p1053_p0 = scmp.ne.s32.totalorder %s1418_s30, %s1052_s7  ;;  %p1057_p9 = scmp.lt.u32.totalorder %s1418_s30, %s1500_s4 }
 0x185   : > { %p1058_p12 = scmp.lt.u32.totalorder %s1056_s15, %s1052_s7  ;;  %p1060_p1 = scmp.lt.u32.totalorder %s1052_s7, %s1418_s30 }
 0x186   : > { %p1054_p5 = pnand %p1053_p0, %p1332_p6 }
 0x187   : > { %p1059_p2 = por %p1058_p12, %p1057_p9 }
 0x188   : > { %p1055_p11 = pneg %p1054_p5 }
 0x189   : > { %p1061_p4 = por %p1060_p1, %p1059_p2 }
 0x18b   : > { %p1062_p8 = pnand %p1061_p4, %p1055_p11 }
 0x18d   : > { %1065 = shalt.err (!%p1062_p8)
}
 0x18e   : > { %s1153_s14 = smov 64   ;;  %s1154_s11 = smov 4   ;;  %v514_v4 = vmul.f32 %v809_v54, %v809_v54  ;;  %v520_v5 = vadd.f32 %v519_v3, %v513_v1  ;;  %v500_v6 = vadd.f32 %v809_v54, %v499_v2  ;;  %v515_v7 = vmul.f32 %v467_v53, %v467_v53 }
 0x18f   : > { %844 = dma.vmem_to_hbm [thread:$0]  (%p1332_p6), %s1412_s26, 512, %s1418_s30, %s536_s28, %s1153_s14, %s1153_s14, %s1154_s11   ;;  %v516_v12 = vmul.f32 %v470_v60, %v470_v60  ;;  %v517_v13 = vmul.f32 %v1409_v51, %v1409_v51  ;;  %v518_v16 = vmul.f32 %v813_v55, %v813_v55  ;;  %vm532_vm0 = vcmask 1040384  }
 0x190   : > { %v501_v8 = vadd.f32 %v500_v6, %v467_v53  ;;  %v521_v9 = vadd.f32 %v520_v5, %v514_v4  ;;  %s716_s26 = sshll.u32 %s1383_s17, 1  ;;  %s731_s30 = sshll.u32 %s1207_s22, 5 }
 0x191   : > { %s293_s28 = scalar_lea.vmem [#allocation11], %s716_s26  ;;  %s1452_s23 = scalar_lea.hbm %s1501_s5, %s731_s30 }
 0x192   : > { %v522_v10 = vadd.f32 %v521_v9, %v515_v7  ;;  %v502_v11 = vadd.f32 %v501_v8, %v470_v60  ;;  %s570_s10 = sshll.u32 %s293_s28, 4  ;;  %s541_s7 = scalar_lea.sflag [#allocation12], %s1383_s17  ;;  %s1454_s10 = int_to_ptr.vmem [resolvable:$true] %s570_s10 }
 0x193   : > { %s1066_s8 = scalar_lea.vmem %s1454_s10, 32  ;;  %s1155_s22 = smov [#allocation11]  }
 0x194   : > { %v503_v14 = vadd.f32 %v1409_v51, %v502_v11  ;;  %v523_v15 = vadd.f32 %v522_v10, %v516_v12  ;;  %p1067_p3 = scmp.ne.s32.totalorder %s1454_s10, %s1066_s8  ;;  %s1070_s9 = sshll.u32 %s1155_s22, 4  ;;  %s1071_s9 = int_to_ptr.vmem [resolvable:$false] %s1070_s9 }
 0x195   : > { %s1072_s15 = scalar_lea.vmem %s1071_s9, 64  ;;  %p1073_p13 = scmp.lt.s32.totalorder %s1454_s10, %s1071_s9 }
 0x196   : > { %v504_v17 = vadd.f32 %v813_v55, %v503_v14  ;;  %v524_v18 = vadd.f32 %v523_v15, %v517_v13  ;;  %p1068_p7 = pnand %p1067_p3, %p1332_p6  ;;  %p1074_p0 = scmp.lt.s32.totalorder %s1072_s15, %s1066_s8 }
 0x198   : > { %v505_v19 = vrot.slane %v504_v17, 4  ;;  %v525_v20 = vadd.f32 %v524_v18, %v518_v16  ;;  %p1069_p10 = pneg %p1068_p7  ;;  %p1075_p5 = por %p1074_p0, %p1073_p13 }
 0x19a   : > { %v506_v21 = vadd.f32 %v505_v19, %v504_v17  ;;  %v526_v22 = vrot.slane %v525_v20, 4  ;;  %p1076_p11 = pnand %p1075_p5, %p1069_p10 }
 0x19c   : > { %v507_v23 = vrot.slane %v506_v21, 2  ;;  %v527_v24 = vadd.f32 %v526_v22, %v525_v20 }
 0x19e   : > { %v508_v25 = vadd.f32 %v507_v23, %v506_v21  ;;  %v528_v26 = vrot.slane %v527_v24, 2 }
 0x1a0   : > { %v509_v27 = vrot.slane %v508_v25, 1  ;;  %v529_v28 = vadd.f32 %v528_v26, %v527_v24 }
 0x1a2   : > { %v530_v29 = vrot.slane %v529_v28, 1  ;;  %v510_v30 = vadd.f32 %v509_v27, %v508_v25 }
 0x1a4   : > { %v531_v31 = vadd.f32 %v530_v29, %v529_v28 }
 0x1a6   : > { %v533_v32 = vsel %vm532_vm0, %v510_v30, %v531_v31 }
 0x1a7   : > { %534 = vst [vmem:[%s293_s28] sm:$0x3] %v533_v32 }
 0x1a8   : > { %1079 = shalt.err (!%p1076_p11)
}
 0x1a9   : > { %s1080_s17 = scalar_lea.hbm %s1452_s23, 32  ;;  %s1084_s14 = scalar_lea.hbm %s1501_s5, 64 }
 0x1aa   : > { %p1081_p9 = scmp.ne.s32.totalorder %s1452_s23, %s1080_s17  ;;  %p1085_p1 = scmp.lt.u32.totalorder %s1452_s23, %s1501_s5 }
 0x1ab   : > { %p1086_p4 = scmp.lt.u32.totalorder %s1084_s14, %s1080_s17  ;;  %p1088_p3 = scmp.lt.u32.totalorder %s1080_s17, %s1452_s23 }
 0x1ac   : > { %p1082_p12 = pnand %p1081_p9, %p1332_p6 }
 0x1ad   : > { %p1087_p8 = por %p1086_p4, %p1085_p1 }
 0x1ae   : > { %p1083_p2 = pneg %p1082_p12 }
 0x1af   : > { %p1089_p7 = por %p1088_p3, %p1087_p8 }
 0x1b1   : > { %p1090_p10 = pnand %p1089_p7, %p1083_p2 }
 0x1b3   : > { %1093 = shalt.err (!%p1090_p10)
}
 0x1b4   : > { %845 = dma.vmem_to_hbm [thread:$0]  (%p1332_p6), %s1454_s10, 32, %s1452_s23, %s541_s7  }
 0x1b5 PF: > { %s582_s30 = sand.u32 1, %s1132_s18   ;;  %p1519_p13 = scmp.ne.s32.totalorder %s1506_s25, 0 }
 0x1b6   : > { %p1520_p0 = scmp.ge.s32.totalorder %s1144_s21, 2  ;;  %s583_s28 = scalar_lea.sflag [#allocation4], %s582_s30 }
 0x1b8   : > { %p863_p5 = pnand %p1520_p0, %p1519_p13 }
 0x1ba   : > { %1123 = dma.done.wait (!%p863_p5), %s583_s28, 512  }
 0x1bb   : > { %1125 = vsyncadd (!%p863_p5), %s583_s28, 4294966784  ;;  %s592_s29 = scalar_lea.sflag [#allocation12], %s582_s30 }
 0x1bc   : > { %1127 = dma.done.wait (!%p863_p5), %s592_s29, 32  }
 0x1bd   : > { %1129 = vsyncadd (!%p863_p5), %s592_s29, 4294967264  ;;  %p24_p6 = scmp.ge.s32.totalorder %s1318_s16, 4   ;;  %s1521_s18 = smov %s1136_s19 }
 0x1be   : > { %s1522_s19 = smov %s1140_s20  ;;  %s1523_s20 = smov %s1328_s27 }
 0x1bf   : > { %s1524_s21 = smov %s1318_s16  ;;  %26 = sbr.rel (!%p24_p6) target bundleno = 9 (0x9), region = 110 }
 0x1c6   :  { %597 = vsyncpa [#allocation3], 1 }
 0x1c7   :  { %599 = vsyncpa [#allocation3 + $0x1], 1 }
 0x1c8   :  { %600 = vsyncpa [#allocation6], 1 }
 0x1c9   :  { %601 = vsyncpa [#allocation9], 1 }
 0x1ca   :  { %602 = vsyncpa [#allocation4], 1 }
 0x1cb   :  { %604 = vsyncpa [#allocation4 + $0x1], 1 }
 0x1cc   :  { %605 = vsyncpa [#allocation12], 1 }
 0x1cd   :  { %607 = vsyncpa [#allocation12 + $0x1], 1 }

// kernel: identity_block.7
= control target key start
LH: loop header
LB: loop body
LE: loop exit
PB: predicated region body
PF: predicated region fallthrough
CT: control target
= control target key end

     0   :  { %s1130_s0 = inlined_call_operand.hbm [shape: bf16[2,8,8,128], index: 0, kind: input, shape index: {}]   ;;  %s1131_s1 = inlined_call_operand.hbm [shape: f32[1,128], index: 1, kind: input, shape index: {}]   ;;  %s1132_s2 = inlined_call_operand.hbm [shape: f32[1,128], index: 2, kind: input, shape index: {}]   ;;  %s1133_s3 = inlined_call_operand.hbm [shape: f32[2,8,8,128], index: 3, kind: input, shape index: {}]   ;;  %s1134_s4 = inlined_call_operand.hbm [shape: f32[2,8,8,128], index: 4, kind: output, shape index: {}]  }
   0x1   :  { %1140 = sst [smem:[#allocation15_spill]] %s1130_s0 }
   0x2   :  { %9 = vsyncpa [#allocation3], 0 }
   0x3   :  { %11 = vsyncpa [#allocation3 + $0x1], 0 }
   0x4   :  { %12 = vsyncpa [#allocation6], 0 }
   0x5   :  { %13 = vsyncpa [#allocation9], 0 }
   0x6   :  { %15 = vsyncpa [#allocation9 + $0x1], 0 }
   0x7   :  { %16 = vsyncpa [#allocation4], 0 }
   0x8   :  { %18 = vsyncpa [#allocation4 + $0x1], 0  ;;  %s840_s15 = smov 0   ;;  %s842_s16 = smov 0  }
   0x9   :  { %s844_s17 = smov 0   ;;  %s846_s18 = smov 0  }
   0xa LB: > { %s861_s19 = sadd.s32 4294967295, %s802_s18   ;;  %s488_s20 = sadd.s32 4294967294, %s802_s18   ;;  %s802_s18 = sphi %s846_s18, %s1161_s18   ;;  %s798_s17 = sphi %s844_s17, %s1160_s17   ;;  %s794_s16 = sphi %s842_s16, %s1159_s16   ;;  %s790_s15 = sphi %s840_s15, %s1158_s15  }
   0xb   : > { %s865_s21 = sadd.s32 1, %s802_s18   ;;  %s31_s22 = sadd.s32 1, %s798_s17 }
   0xc   : > { %s28_s23 = ssub.s32 %s802_s18, %s865_s21  ;;  %p38_p0 = scmp.ne.s32.totalorder %s798_s17, %s794_s16 }
   0xd   : > { %p29_p1 = scmp.eq.s32.totalorder %s28_s23, 0  ;;  %p39_p2 = scmp.eq.s32.totalorder %s802_s18, 0 }
   0xe   : > { %p44_p3 = scmp.ne.s32.totalorder %s794_s16, %s790_s15  ;;  %p1135_p4 = scmp.eq.s32.totalorder %s861_s19, 0 }
   0xf   : > { %s877_s24 = scalar_select %p29_p1, %s798_s17, %s31_s22  }
  0x10   : > { %p879_p5 = por %p39_p2, %p38_p0  ;;  %p885_p6 = por %p1135_p4, %p44_p3 }
  0x11   : > { %p136_p7 = scmp.eq.s32.totalorder %s861_s19, 1  ;;  %p142_p8 = scmp.eq.s32.totalorder %s488_s20, 1 }
  0x12   : > { %s1142_s26 = scalar_select %p885_p6, 1, 0 }
  0x13   : > { %p489_p9 = scmp.ge.s32.totalorder %s802_s18, 1  ;;  %p149_p10 = scmp.lt.s32.totalorder %s802_s18, 3 }
  0x14   : > { %p892_p11 = por %p136_p7, %p38_p0  ;;  %p896_p12 = por %p142_p8, %p44_p3 }
  0x15   : > { %p900_p13 = pnand %p489_p9, %p149_p10  ;;  %s804_s30 = smov [#allocation5]  }
  0x16   : > { %s1143_s27 = scalar_select %p892_p11, 1, 0 }
  0x17   : > { %s1144_s28 = scalar_select %p896_p12, 1, 0 }
  0x18   : > { %s1145_s29 = scalar_select %p900_p13, 1, 0 }
  0x19   : > { %p548_p2 = pneg %p900_p13  ;;  %s162_s5 = sshll.u32 %s804_s30, 4  ;;  %s163_s5 = int_to_ptr.vmem [resolvable:$true] %s162_s5 }
  0x1a   : > { %p568_p4 = scmp.lt.s32.totalorder %s802_s18, 2  ;;  %p1146_p0 = scmp.eq.s32.totalorder %s861_s19, 0 }
  0x1b   : > { %s805_s8 = smov [#allocation7]   ;;  %s612_s12 = scalar_lea.hbm %s1131_s1, 16 }
  0x1c   : > { %p910_p7 = pnand %p548_p2, %p1146_p0  ;;  %p916_p3 = pnand %p568_p4, %p879_p5 }
  0x1d   : > { %s173_s9 = sshll.u32 %s805_s8, 4  ;;  %p613_p8 = scmp.ne.s32.totalorder %s1131_s1, %s612_s12  ;;  %s920_s9 = int_to_ptr.vmem [resolvable:$true] %s173_s9 }
  0x1e   : > { %s1148_s7 = scalar_select %p916_p3, 1, 0 }
  0x1f   : > { %p614_p9 = pneg %p910_p7  ;;  %p619_p10 = scmp.lt.u32.totalorder %s612_s12, %s1131_s1 }
  0x21   : > { %p615_p4 = pnand %p614_p9, %p613_p8 }
  0x23   : > { %p616_p5 = pneg %p615_p4 }
  0x25   : > { %p621_p2 = pnand %p619_p10, %p616_p5 }
  0x27   : > { %624 = shalt.err (!%p621_p2)
}
  0x28   : > { %s625_s23 = scalar_lea.vmem %s163_s5, 16  ;;  %s632_s25 = scalar_lea.vmem %s163_s5, 32 }
  0x29   : > { %p626_p0 = scmp.ne.s32.totalorder %s163_s5, %s625_s23  ;;  %p633_p11 = scmp.lt.s32.totalorder %s163_s5, %s163_s5 }
  0x2a   : > { %p634_p6 = scmp.lt.s32.totalorder %s632_s25, %s625_s23 }
  0x2b   : > { %p628_p1 = pnand %p626_p0, %p614_p9 }
  0x2c   : > { %p635_p13 = por %p634_p6, %p633_p11 }
  0x2d   : > { %p629_p12 = pneg %p628_p1 }
  0x2f   : > { %p636_p3 = pnand %p635_p13, %p629_p12 }
  0x31   : > { %639 = shalt.err (!%p636_p3)
}
  0x32   : > { %551 = dma.hbm_to_vmem [thread:$0]  (!%p910_p7), %s1131_s1, 16, %s163_s5, [#allocation6]  }
  0x33   : > { %s945_s10 = sand.u32 1, %s798_s17   ;;  %s640_s13 = scalar_lea.hbm %s1132_s2, 16 }
  0x34   : > { %p641_p6 = scmp.ne.s32.totalorder %s1132_s2, %s640_s13  ;;  %p647_p13 = scmp.lt.u32.totalorder %s640_s13, %s1132_s2 }
  0x36   : > { %p643_p11 = pnand %p641_p6, %p614_p9 }
  0x38   : > { %p644_p12 = pneg %p643_p11 }
  0x3a   : > { %p649_p1 = pnand %p647_p13, %p644_p12 }
  0x3c   : > { %652 = shalt.err (!%p649_p1)
}
  0x3d   : > { %s653_s5 = scalar_lea.vmem %s920_s9, 16  ;;  %s660_s25 = scalar_lea.vmem %s920_s9, 32 }
  0x3e   : > { %p654_p3 = scmp.ne.s32.totalorder %s920_s9, %s653_s5  ;;  %p661_p5 = scmp.lt.s32.totalorder %s920_s9, %s920_s9 }
  0x3f   : > { %p662_p10 = scmp.lt.s32.totalorder %s660_s25, %s653_s5 }
  0x40   : > { %p656_p8 = pnand %p654_p3, %p614_p9 }
  0x41   : > { %p663_p2 = por %p662_p10, %p661_p5 }
  0x42   : > { %p657_p4 = pneg %p656_p8 }
  0x44   : > { %p664_p0 = pnand %p663_p2, %p657_p4 }
  0x46   : > { %667 = shalt.err (!%p664_p0)
}
  0x47   : > { %554 = dma.hbm_to_vmem [thread:$0]  (!%p910_p7), %s1132_s2, 16, %s920_s9, [#allocation6]  }
  0x48   : > { %s493_s11 = sshll.u32 %s945_s10, 5  ;;  %s512_s12 = sshll.u32 %s802_s18, 9 }
  0x49   : > { %s1149_s0 = sld [smem:[#allocation15_spill]]  ;;  %s188_s6 = scalar_lea.vmem [#allocation2], %s493_s11 }
  0x4a   : > { %s195_s22 = sshll.u32 %s188_s6, 4  ;;  %s185_s23 = scalar_lea.sflag [#allocation3], %s945_s10  ;;  %s980_s22 = int_to_ptr.vmem [resolvable:$true] %s195_s22 }
  0x4b   : > { %p1150_p6 = scmp.ne.s32.totalorder %s1148_s7, 0 }
  0x4d   : > { %p670_p7 = pneg %p1150_p6 }
  0x4f   : > { %s978_s20 = scalar_lea.hbm %s1149_s0, %s512_s12  ;;  %s673_s30 = scalar_lea.hbm %s1149_s0, 1024 }
  0x50   : > { %s668_s5 = scalar_lea.hbm %s978_s20, 512  ;;  %p674_p13 = scmp.lt.u32.totalorder %s978_s20, %s1149_s0 }
  0x51   : > { %p669_p9 = scmp.ne.s32.totalorder %s978_s20, %s668_s5  ;;  %p675_p1 = scmp.lt.u32.totalorder %s673_s30, %s668_s5 }
  0x52   : > { %p677_p8 = scmp.lt.u32.totalorder %s668_s5, %s978_s20 }
  0x53   : > { %p671_p11 = pnand %p670_p7, %p669_p9  ;;  %p676_p3 = por %p675_p1, %p674_p13 }
  0x55   : > { %p672_p12 = pneg %p671_p11  ;;  %p678_p4 = por %p677_p8, %p676_p3 }
  0x57   : > { %p679_p5 = pnand %p678_p4, %p672_p12 }
  0x59   : > { %682 = shalt.err (!%p679_p5)
}
  0x5a   : > { %s683_s11 = scalar_lea.vmem %s980_s22, 512  ;;  %s806_s13 = smov [#allocation2]  }
  0x5b   : > { %p684_p10 = scmp.ne.s32.totalorder %s980_s22, %s683_s11  ;;  %s688_s14 = sshll.u32 %s806_s13, 4  ;;  %s689_s14 = int_to_ptr.vmem [resolvable:$false] %s688_s14 }
  0x5c   : > { %s690_s6 = scalar_lea.vmem %s689_s14, 1024  ;;  %p691_p9 = scmp.lt.s32.totalorder %s980_s22, %s689_s14 }
  0x5d   : > { %p686_p2 = pnand %p684_p10, %p670_p7  ;;  %p692_p11 = scmp.lt.s32.totalorder %s690_s6, %s683_s11 }
  0x5f   : > { %p687_p0 = pneg %p686_p2  ;;  %p693_p13 = por %p692_p11, %p691_p9 }
  0x61   : > { %p694_p1 = pnand %p693_p13, %p687_p0 }
  0x63   : > { %697 = shalt.err (!%p694_p1)
}
  0x64   : > { %s807_s5 = smov 64   ;;  %s808_s9 = smov 4  }
  0x65   : > { %558 = dma.hbm_to_vmem [thread:$0]  (!%p1150_p6), %s978_s20, 512, %s980_s22, %s185_s23, %s807_s5, %s807_s5, %s808_s9  }
  0x66   : > { %s496_s25 = sshll.u32 %s945_s10, 6  ;;  %s513_s30 = sshll.u32 %s802_s18, 10 }
  0x67   : > { %s1015_s11 = scalar_lea.hbm %s1133_s3, %s513_s30  ;;  %s209_s13 = scalar_lea.vmem [#allocation8], %s496_s25 }
  0x68   : > { %s216_s14 = sshll.u32 %s209_s13, 4  ;;  %s206_s6 = scalar_lea.sflag [#allocation9], %s945_s10  ;;  %s1017_s14 = int_to_ptr.vmem [resolvable:$true] %s216_s14 }
  0x69   : > { %s698_s0 = scalar_lea.hbm %s1015_s11, 1024  ;;  %s703_s23 = scalar_lea.hbm %s1133_s3, 2048 }
  0x6a   : > { %p699_p12 = scmp.ne.s32.totalorder %s1015_s11, %s698_s0  ;;  %p704_p4 = scmp.lt.u32.totalorder %s1015_s11, %s1133_s3 }
  0x6b   : > { %p705_p5 = scmp.lt.u32.totalorder %s703_s23, %s698_s0  ;;  %p707_p2 = scmp.lt.u32.totalorder %s698_s0, %s1015_s11 }
  0x6c   : > { %p701_p3 = pnand %p699_p12, %p670_p7 }
  0x6d   : > { %p706_p10 = por %p705_p5, %p704_p4 }
  0x6e   : > { %p702_p8 = pneg %p701_p3 }
  0x6f   : > { %p708_p0 = por %p707_p2, %p706_p10 }
  0x71   : > { %p709_p9 = pnand %p708_p0, %p702_p8 }
  0x73   : > { %712 = shalt.err (!%p709_p9)
}
  0x74   : > { %s713_s25 = scalar_lea.vmem %s1017_s14, 1024  ;;  %s809_s30 = smov [#allocation8]  }
  0x75   : > { %p714_p11 = scmp.ne.s32.totalorder %s1017_s14, %s713_s25  ;;  %s718_s8 = sshll.u32 %s809_s30, 4  ;;  %s719_s8 = int_to_ptr.vmem [resolvable:$false] %s718_s8 }
  0x76   : > { %s720_s12 = scalar_lea.vmem %s719_s8, 2048  ;;  %p721_p12 = scmp.lt.s32.totalorder %s1017_s14, %s719_s8 }
  0x77   : > { %p716_p13 = pnand %p714_p11, %p670_p7  ;;  %p722_p3 = scmp.lt.s32.totalorder %s720_s12, %s713_s25 }
  0x79   : > { %p717_p1 = pneg %p716_p13  ;;  %p723_p4 = por %p722_p3, %p721_p12 }
  0x7b   : > { %p724_p5 = pnand %p723_p4, %p717_p1 }
  0x7d   : > { %727 = shalt.err (!%p724_p5)
}
  0x7e   : > { %s810_s0 = smov 128   ;;  %s811_s13 = smov 8  }
  0x7f   : > { %561 = dma.hbm_to_vmem [thread:$0]  (!%p1150_p6), %s1015_s11, 1024, %s1017_s14, %s206_s6, %s810_s0, %s810_s0, %s811_s13  }
  0x80   : > { %p1151_p7 = scmp.ne.s32.totalorder %s1145_s29, 0 }
  0x81   : > { %s1048_s20 = sand.u32 (!%p1151_p7), 1, %s794_s16   ;;  %p1152_p8 = scmp.ne.s32.totalorder (!%p1151_p7), %s1142_s26, 0 }
  0x82   : > { %228 = sbr.rel (%p1151_p7) target bundleno = 173 (0xad), region = 36  ;;  %s500_s22 = sshll.u32 (!%p1151_p7), %s1048_s20, 5 }
  0x83   : > { %s231_s23 = scalar_lea.sflag (!%p1151_p7), [#allocation3], %s1048_s20  ;;  %s234_s5 = scalar_lea.vmem (!%p1151_p7), [#allocation2], %s500_s22 }
  0x89   : > { %773 = dma.done.wait (%p1152_p8), %s231_s23, 512  }
  0x8a   : > { %775 = vsyncadd (%p1152_p8), %s231_s23, 4294966784  ;;  %p1153_p10 = scmp.eq.s32.totalorder %s861_s19, 0 }
  0x8c   : > { %777 = dma.done.wait (%p1153_p10), [#allocation6], 32   ;;  %p1154_p6 = pmov %p1153_p10 }
  0x8d   : > { %s503_s29 = sshll.u32 %s1048_s20, 6  ;;  %s248_s7 = scalar_lea.sflag [#allocation9], %s1048_s20 }
  0x8e   : > { %779 = vsyncadd (%p1154_p6), [#allocation6], 4294967264  ;;  %s1064_s10 = scalar_lea.vmem [#allocation8], %s503_s29 }
  0x8f   : > { %781 = dma.done.wait (%p1152_p8), %s248_s7, 1024  }
  0x90   : > { %783 = vsyncadd (%p1152_p8), %s248_s7, 4294966272  ;;  %v516_v0 = vld [vmem:[%s234_s5] sm:$0xff]   ;;  %v531_v4 = vld [vmem:[%s234_s5 + $0x8] sm:$0xff]   ;;  %s280_s26 = scalar_lea.vmem [#allocation10], %s503_s29  ;;  %s514_s14 = sshll.u32 %s861_s19, 10 }
  0x91   : > { %v505_v1 = vld [vmem:[#allocation5] ss:$0 sm:$0xff]  ;;  %v517_v2 = vunpack.c.l.bf16 %v516_v0  ;;  %v518_v3 = vunpack.c.h.bf16 %v516_v0  ;;  %v506_v5 = vld [vmem:[#allocation7] ss:$0 sm:$0xff]  ;;  %v521_v6 = vunpack.c.l.bf16 %v531_v4  ;;  %v522_v7 = vunpack.c.h.bf16 %v531_v4  ;;  %v532_v8 = vld [vmem:[%s234_s5 + $0x10] sm:$0xff]   ;;  %s373_s11 = sshll.u32 %s280_s26, 4  ;;  %s1086_s9 = scalar_lea.hbm %s1134_s4, %s514_s14  ;;  %s1081_s11 = int_to_ptr.vmem [resolvable:$true] %s373_s11 }
  0x92   : > { %v525_v11 = vunpack.c.l.bf16 %v532_v8  ;;  %v526_v12 = vunpack.c.h.bf16 %v532_v8  ;;  %v533_v13 = vld [vmem:[%s234_s5 + $0x18] sm:$0xff]   ;;  %v327_v14 = vld [vmem:[%s1064_s10] sm:$0xff]  ;;  %v328_v15 = vld [vmem:[%s1064_s10 + $0x8] sm:$0xff]  ;;  %s360_s25 = scalar_lea.sflag [#allocation4], %s1048_s20  ;;  %s728_s30 = scalar_lea.vmem %s1081_s11, 1024 }
  0x93   : > { %v304_v9 = vmul.f32 %v517_v2, %v505_v1  ;;  %v305_v10 = vmul.f32 %v518_v3, %v505_v1  ;;  %v306_v16 = vmul.f32 %v521_v6, %v505_v1  ;;  %v307_v17 = vmul.f32 %v522_v7, %v505_v1  ;;  %v329_v22 = vld [vmem:[%s1064_s10 + $0x10] sm:$0xff]  ;;  %v330_v23 = vld [vmem:[%s1064_s10 + $0x18] sm:$0xff]  ;;  %v331_v28 = vld [vmem:[%s1064_s10 + $0x20] sm:$0xff]  ;;  %p729_p2 = scmp.ne.s32.totalorder %s1081_s11, %s728_s30  ;;  %p1155_p0 = scmp.ne.s32.totalorder %s1143_s27, 0 }
  0x94   : > { %v529_v18 = vunpack.c.l.bf16 %v533_v13  ;;  %v530_v19 = vunpack.c.h.bf16 %v533_v13  ;;  %v308_v24 = vmul.f32 %v525_v11, %v505_v1  ;;  %v309_v25 = vmul.f32 %v526_v12, %v505_v1  ;;  %v332_v29 = vld [vmem:[%s1064_s10 + $0x28] sm:$0xff]  ;;  %v333_v36 = vld [vmem:[%s1064_s10 + $0x30] sm:$0xff]  ;;  %v334_v37 = vld [vmem:[%s1064_s10 + $0x38] sm:$0xff]  ;;  %s812_s8 = smov [#allocation10]  }
  0x95   : > { %v319_v20 = vadd.f32 %v506_v5, %v304_v9  ;;  %v320_v21 = vadd.f32 %v506_v5, %v305_v10  ;;  %v321_v26 = vadd.f32 %v506_v5, %v306_v16  ;;  %v322_v27 = vadd.f32 %v506_v5, %v307_v17  ;;  %p730_p9 = pnand %p729_p2, %p1155_p0  ;;  %s732_s12 = sshll.u32 %s812_s8, 4  ;;  %s733_s12 = int_to_ptr.vmem [resolvable:$false] %s732_s12 }
  0x96   : > { %v310_v30 = vmul.f32 %v529_v18, %v505_v1  ;;  %v311_v31 = vmul.f32 %v530_v19, %v505_v1  ;;  %v323_v34 = vadd.f32 %v506_v5, %v308_v24  ;;  %v324_v35 = vadd.f32 %v506_v5, %v309_v25  ;;  %s734_s0 = scalar_lea.vmem %s733_s12, 2048  ;;  %p735_p13 = scmp.lt.s32.totalorder %s1081_s11, %s733_s12 }
  0x97   : > { %v335_v32 = vadd.f32 %v327_v14, %v319_v20  ;;  %v336_v33 = vadd.f32 %v328_v15, %v320_v21  ;;  %v337_v38 = vadd.f32 %v329_v22, %v321_v26  ;;  %v338_v39 = vadd.f32 %v330_v23, %v322_v27  ;;  %p731_p11 = pneg %p730_p9  ;;  %p736_p1 = scmp.lt.s32.totalorder %s734_s0, %s728_s30 }
  0x98   : > { %v325_v40 = vadd.f32 %v506_v5, %v310_v30  ;;  %v326_v41 = vadd.f32 %v506_v5, %v311_v31  ;;  %v339_v44 = vadd.f32 %v331_v28, %v323_v34  ;;  %v340_v45 = vadd.f32 %v332_v29, %v324_v35 }
  0x99   : > { %v343_v42 = vmax.f32 %v335_v32, 0.0  ;;  %v344_v43 = vmax.f32 %v336_v33, 0.0  ;;  %v345_v46 = vmax.f32 %v337_v38, 0.0  ;;  %v346_v47 = vmax.f32 %v338_v39, 0.0  ;;  %p737_p12 = por %p736_p1, %p735_p13 }
  0x9a   : > { %v341_v48 = vadd.f32 %v333_v36, %v325_v40  ;;  %v342_v49 = vadd.f32 %v334_v37, %v326_v41  ;;  %v347_v50 = vmax.f32 %v339_v44, 0.0  ;;  %v348_v51 = vmax.f32 %v340_v45, 0.0 }
  0x9b   : > { %351 = vst [vmem:[%s280_s26] sm:$0xff] %v343_v42  ;;  %352 = vst [vmem:[%s280_s26 + $0x8] sm:$0xff] %v344_v43  ;;  %p738_p3 = pnand %p737_p12, %p731_p11 }
  0x9c   : > { %353 = vst [vmem:[%s280_s26 + $0x10] sm:$0xff] %v345_v46  ;;  %354 = vst [vmem:[%s280_s26 + $0x18] sm:$0xff] %v346_v47  ;;  %v349_v52 = vmax.f32 %v341_v48, 0.0  ;;  %v350_v53 = vmax.f32 %v342_v49, 0.0 }
  0x9d   : > { %355 = vst [vmem:[%s280_s26 + $0x20] sm:$0xff] %v347_v50  ;;  %356 = vst [vmem:[%s280_s26 + $0x28] sm:$0xff] %v348_v51 }
  0x9e   : > { %357 = vst [vmem:[%s280_s26 + $0x30] sm:$0xff] %v349_v52  ;;  %358 = vst [vmem:[%s280_s26 + $0x38] sm:$0xff] %v350_v53 }
  0x9f   : > { %741 = shalt.err (!%p738_p3)
}
  0xa0   : > { %s742_s13 = scalar_lea.hbm %s1086_s9, 1024  ;;  %s746_s5 = scalar_lea.hbm %s1134_s4, 2048 }
  0xa1   : > { %p743_p4 = scmp.ne.s32.totalorder %s1086_s9, %s742_s13  ;;  %p747_p8 = scmp.lt.u32.totalorder %s1086_s9, %s1134_s4 }
  0xa2   : > { %p748_p10 = scmp.lt.u32.totalorder %s746_s5, %s742_s13  ;;  %p750_p2 = scmp.lt.u32.totalorder %s742_s13, %s1086_s9 }
  0xa3   : > { %p744_p5 = pnand %p743_p4, %p1155_p0 }
  0xa4   : > { %p749_p6 = por %p748_p10, %p747_p8 }
  0xa5   : > { %p745_p7 = pneg %p744_p5 }
  0xa6   : > { %p751_p9 = por %p750_p2, %p749_p6 }
  0xa8   : > { %p752_p11 = pnand %p751_p9, %p745_p7 }
  0xaa   : > { %755 = shalt.err (!%p752_p11)
}
  0xab   : > { %s813_s10 = smov 128   ;;  %s814_s26 = smov 8  }
  0xac   : > { %546 = dma.vmem_to_hbm [thread:$0]  (%p1155_p0), %s1081_s11, 1024, %s1086_s9, %s360_s25, %s813_s10, %s813_s10, %s814_s26  }
  0xad PF: > { %s388_s14 = sand.u32 1, %s790_s15   ;;  %p1156_p13 = scmp.ne.s32.totalorder %s1144_s28, 0 }
  0xae   : > { %p1157_p1 = scmp.ge.s32.totalorder %s802_s18, 2  ;;  %s389_s6 = scalar_lea.sflag [#allocation4], %s388_s14 }
  0xb0   : > { %p563_p12 = pnand %p1157_p1, %p1156_p13 }
  0xb2   : > { %785 = dma.done.wait (!%p563_p12), %s389_s6, 1024  }
  0xb3   : > { %787 = vsyncadd (!%p563_p12), %s389_s6, 4294966272  ;;  %p21_p3 = scmp.ge.s32.totalorder %s865_s21, 4   ;;  %s1158_s15 = smov %s794_s16 }
  0xb4   : > { %s1159_s16 = smov %s798_s17  ;;  %s1160_s17 = smov %s877_s24 }
  0xb5   : > { %s1161_s18 = smov %s865_s21  ;;  %23 = sbr.rel (!%p21_p3) target bundleno = 10 (0xa), region = 102 }
  0xbc   :  { %394 = vsyncpa [#allocation3], 1 }
  0xbd   :  { %396 = vsyncpa [#allocation3 + $0x1], 1 }
  0xbe   :  { %397 = vsyncpa [#allocation6], 1 }
  0xbf   :  { %398 = vsyncpa [#allocation9], 1 }
  0xc0   :  { %400 = vsyncpa [#allocation9 + $0x1], 1 }
  0xc1   :  { %401 = vsyncpa [#allocation4], 1 }
  0xc2   :  { %403 = vsyncpa [#allocation4 + $0x1], 1 }

// kernel: identity_block.5
= control target key start
LH: loop header
LB: loop body
LE: loop exit
PB: predicated region body
PF: predicated region fallthrough
CT: control target
= control target key end

     0   :  { %11 = vsyncpa [#allocation4], 0  ;;  %s3961_s0 = inlined_call_operand.hbm [shape: bf16[2,8,8,128], index: 0, kind: input, shape index: {}]   ;;  %s3962_s1 = inlined_call_operand.hbm [shape: f32[1,128], index: 1, kind: input, shape index: {}]   ;;  %s3963_s2 = inlined_call_operand.hbm [shape: f32[1,128], index: 2, kind: input, shape index: {}]   ;;  %s3964_s3 = inlined_call_operand.hbm [shape: bf16[3,3,128,128], index: 3, kind: input, shape index: {}]   ;;  %s3965_s4 = inlined_call_operand.hbm [shape: bf16[2,8,8,128], index: 4, kind: output, shape index: {0}]   ;;  %s3966_s5 = inlined_call_operand.hbm [shape: f32[2,2,128], index: 5, kind: output, shape index: {1}]  }
   0x1   :  { %13 = vsyncpa [#allocation4 + $0x1], 0 }
   0x2   :  { %14 = vsyncpa [#allocation7], 0 }
   0x3   :  { %15 = vsyncpa [#allocation10], 0 }
   0x4   :  { %16 = vsyncpa [#allocation5], 0 }
   0x5   :  { %18 = vsyncpa [#allocation5 + $0x1], 0 }
   0x6   :  { %19 = vsyncpa [#allocation13], 0 }
   0x7   :  { %21 = vsyncpa [#allocation13 + $0x1], 0  ;;  %s3424_s18 = smov 0   ;;  %s3426_s19 = smov 0  }
   0x8   :  { %s3428_s20 = smov 0   ;;  %s3430_s21 = smov 0  }
   0x9 LB: > { %s3445_s22 = sadd.s32 4294967295, %s3381_s21   ;;  %s2349_s23 = sadd.s32 4294967294, %s3381_s21   ;;  %s3381_s21 = sphi %s3430_s21, %s3995_s21   ;;  %s3377_s20 = sphi %s3428_s20, %s3994_s20   ;;  %s3373_s19 = sphi %s3426_s19, %s3993_s19   ;;  %s3369_s18 = sphi %s3424_s18, %s3992_s18  }
   0xa   : > { %p47_p0 = scmp.ne.s32.totalorder %s3373_s19, %s3369_s18  ;;  %p3967_p1 = scmp.eq.s32.totalorder %s3445_s22, 0 }
   0xb   : > { %p140_p3 = scmp.eq.s32.totalorder %s2349_s23, 1  ;;  %p2350_p5 = scmp.ge.s32.totalorder %s3381_s21, 1 }
   0xc   : > { %p3454_p4 = por %p3967_p1, %p47_p0  ;;  %p173_p7 = scmp.lt.s32.totalorder %s3381_s21, 3 }
   0xd   : > { %p3459_p6 = por %p140_p3, %p47_p0  ;;  %s3383_s27 = smov [#allocation6]  }
   0xe   : > { %s3970_s24 = scalar_select %p3454_p4, 1, 0 }
   0xf   : > { %s3971_s25 = scalar_select %p3459_p6, 1, 0 }
  0x10   : > { %p3464_p8 = pnand %p2350_p5, %p173_p7  ;;  %s186_s28 = sshll.u32 %s3383_s27, 4  ;;  %s187_s28 = int_to_ptr.vmem [resolvable:$true] %s186_s28 }
  0x11   : > { %s3384_s29 = smov [#allocation8]   ;;  %s3385_s7 = smov [#allocation9]  }
  0x12   : > { %s3972_s26 = scalar_select %p3464_p8, 1, 0 }
  0x13   : > { %p3020_p10 = pneg %p3464_p8  ;;  %s197_s30 = sshll.u32 %s3384_s29, 4  ;;  %s3477_s30 = int_to_ptr.vmem [resolvable:$true] %s197_s30 }
  0x14   : > { %s207_s8 = sshll.u32 %s3385_s7, 4  ;;  %s3161_s11 = scalar_lea.hbm %s3962_s1, 16  ;;  %s3479_s8 = int_to_ptr.vmem [resolvable:$true] %s207_s8 }
  0x15   : > { %p3473_p11 = pnand %p3020_p10, %p3967_p1  ;;  %p3162_p12 = scmp.ne.s32.totalorder %s3962_s1, %s3161_s11 }
  0x16   : > { %p3168_p5 = scmp.lt.u32.totalorder %s3161_s11, %s3962_s1 }
  0x17   : > { %p3489_p13 = pneg %p3473_p11 }
  0x19   : > { %p3164_p0 = pnand %p3489_p13, %p3162_p12 }
  0x1b   : > { %p3165_p3 = pneg %p3164_p0 }
  0x1d   : > { %p3170_p7 = pnand %p3168_p5, %p3165_p3 }
  0x1f   : > { %3173 = shalt.err (!%p3170_p7)
}
  0x20   : > { %s3174_s17 = scalar_lea.vmem %s187_s28, 16  ;;  %s3181_s23 = scalar_lea.vmem %s187_s28, 32 }
  0x21   : > { %p3175_p10 = scmp.ne.s32.totalorder %s187_s28, %s3174_s17  ;;  %p3182_p2 = scmp.lt.s32.totalorder %s187_s28, %s187_s28 }
  0x22   : > { %p3183_p6 = scmp.lt.s32.totalorder %s3181_s23, %s3174_s17 }
  0x23   : > { %p3177_p9 = pnand %p3175_p10, %p3489_p13 }
  0x24   : > { %p3184_p4 = por %p3183_p6, %p3182_p2 }
  0x25   : > { %p3178_p1 = pneg %p3177_p9 }
  0x27   : > { %p3185_p8 = pnand %p3184_p4, %p3178_p1 }
  0x29   : > { %3188 = shalt.err (!%p3185_p8)
}
  0x2a   : > { %3023 = dma.hbm_to_vmem [thread:$0]  (!%p3473_p11), %s3962_s1, 16, %s187_s28, [#allocation7]  }
  0x2b   : > { %s3189_s10 = scalar_lea.hbm %s3963_s2, 16 }
  0x2c   : > { %p3190_p9 = scmp.ne.s32.totalorder %s3963_s2, %s3189_s10  ;;  %p3196_p1 = scmp.lt.u32.totalorder %s3189_s10, %s3963_s2 }
  0x2e   : > { %p3192_p12 = pnand %p3190_p9, %p3489_p13 }
  0x30   : > { %p3193_p2 = pneg %p3192_p12 }
  0x32   : > { %p3198_p4 = pnand %p3196_p1, %p3193_p2 }
  0x34   : > { %3201 = shalt.err (!%p3198_p4)
}
  0x35   : > { %s3202_s28 = scalar_lea.vmem %s3477_s30, 16  ;;  %s3209_s16 = scalar_lea.vmem %s3477_s30, 32 }
  0x36   : > { %p3203_p6 = scmp.ne.s32.totalorder %s3477_s30, %s3202_s28  ;;  %p3210_p3 = scmp.lt.s32.totalorder %s3477_s30, %s3477_s30 }
  0x37   : > { %p3211_p5 = scmp.lt.s32.totalorder %s3209_s16, %s3202_s28 }
  0x38   : > { %p3205_p8 = pnand %p3203_p6, %p3489_p13 }
  0x39   : > { %p3212_p7 = por %p3211_p5, %p3210_p3 }
  0x3a   : > { %p3206_p0 = pneg %p3205_p8 }
  0x3c   : > { %p3213_p10 = pnand %p3212_p7, %p3206_p0 }
  0x3e   : > { %3216 = shalt.err (!%p3213_p10)
}
  0x3f   : > { %3026 = dma.hbm_to_vmem [thread:$0]  (!%p3473_p11), %s3963_s2, 16, %s3477_s30, [#allocation7]  }
  0x40   : > { %s3217_s7 = scalar_lea.hbm %s3964_s3, 9216 }
  0x41   : > { %p3218_p9 = scmp.ne.s32.totalorder %s3964_s3, %s3217_s7  ;;  %p3224_p1 = scmp.lt.u32.totalorder %s3217_s7, %s3964_s3 }
  0x43   : > { %p3220_p12 = pnand %p3218_p9, %p3489_p13 }
  0x45   : > { %p3221_p2 = pneg %p3220_p12 }
  0x47   : > { %p3226_p4 = pnand %p3224_p1, %p3221_p2 }
  0x49   : > { %3229 = shalt.err (!%p3226_p4)
}
  0x4a   : > { %s3230_s30 = scalar_lea.vmem %s3479_s8, 9216  ;;  %p3238_p3 = scmp.lt.s32.totalorder %s3479_s8, %s3479_s8 }
  0x4b   : > { %p3231_p6 = scmp.ne.s32.totalorder %s3479_s8, %s3230_s30  ;;  %p3239_p5 = scmp.lt.s32.totalorder %s3230_s30, %s3230_s30 }
  0x4d   : > { %p3233_p8 = pnand %p3231_p6, %p3489_p13  ;;  %p3240_p7 = por %p3239_p5, %p3238_p3 }
  0x4f   : > { %p3234_p0 = pneg %p3233_p8 }
  0x51   : > { %p3241_p10 = pnand %p3240_p7, %p3234_p0 }
  0x53   : > { %3244 = shalt.err (!%p3241_p10)
}
  0x54   : > { %s3386_s13 = smov 64   ;;  %s3387_s14 = smov 4  }
  0x55   : > { %3029 = dma.hbm_to_vmem [thread:$0]  (!%p3473_p11), %s3964_s3, 9216, %s3479_s8, [#allocation10], %s3386_s13, %s3386_s13, %s3387_s14  }
  0x56   : > { %s3556_s16 = sadd.s32 1, %s3381_s21   ;;  %s34_s23 = sadd.s32 1, %s3377_s20 }
  0x57   : > { %s31_s17 = ssub.s32 %s3381_s21, %s3556_s16  ;;  %p41_p9 = scmp.ne.s32.totalorder %s3377_s20, %s3373_s19 }
  0x58   : > { %p32_p13 = scmp.eq.s32.totalorder %s31_s17, 0  ;;  %p42_p12 = scmp.eq.s32.totalorder %s3381_s21, 0 }
  0x59   : > { %p3044_p2 = scmp.lt.s32.totalorder %s3381_s21, 2  ;;  %p3975_p4 = scmp.eq.s32.totalorder %s3445_s22, 1 }
  0x5a   : > { %s3566_s27 = scalar_select %p32_p13, %s3377_s20, %s34_s23  }
  0x5b   : > { %p43_p1 = por %p42_p12, %p41_p9  ;;  %p3570_p6 = por %p3975_p4, %p41_p9 }
  0x5c   : > { %s221_s29 = sand.u32 1, %s3377_s20   ;;  %s2446_s7 = sshll.u32 %s3381_s21, 9 }
  0x5d   : > { %s2355_s8 = sshll.u32 %s221_s29, 5  ;;  %s3579_s11 = scalar_lea.hbm %s3961_s0, %s2446_s7 }
  0x5e   : > { %s225_s12 = scalar_lea.vmem [#allocation3], %s2355_s8  ;;  %p3581_p11 = pnand %p3044_p2, %p43_p1 }
  0x5f   : > { %s232_s30 = sshll.u32 %s225_s12, 4  ;;  %s3587_s28 = scalar_lea.sflag [#allocation4], %s221_s29  ;;  %s3585_s30 = int_to_ptr.vmem [resolvable:$true] %s232_s30 }
  0x60   : > { %s3245_s17 = scalar_lea.hbm %s3579_s11, 512  ;;  %p3247_p0 = pneg %p3581_p11 }
  0x61   : > { %p3246_p8 = scmp.ne.s32.totalorder %s3579_s11, %s3245_s17  ;;  %s3250_s8 = scalar_lea.hbm %s3961_s0, 1024 }
  0x62   : > { %p3251_p7 = scmp.lt.u32.totalorder %s3579_s11, %s3961_s0  ;;  %p3252_p10 = scmp.lt.u32.totalorder %s3250_s8, %s3245_s17 }
  0x63   : > { %p3248_p3 = pnand %p3247_p0, %p3246_p8  ;;  %p3254_p9 = scmp.lt.u32.totalorder %s3245_s17, %s3579_s11 }
  0x64   : > { %p3253_p13 = por %p3252_p10, %p3251_p7 }
  0x65   : > { %p3249_p5 = pneg %p3248_p3 }
  0x66   : > { %p3255_p12 = por %p3254_p9, %p3253_p13 }
  0x68   : > { %p3256_p2 = pnand %p3255_p12, %p3249_p5 }
  0x6a   : > { %3259 = shalt.err (!%p3256_p2)
}
  0x6b   : > { %s3260_s29 = scalar_lea.vmem %s3585_s30, 512  ;;  %s3388_s12 = smov [#allocation3]  }
  0x6c   : > { %p3261_p1 = scmp.ne.s32.totalorder %s3585_s30, %s3260_s29  ;;  %s3265_s23 = sshll.u32 %s3388_s12, 4  ;;  %s3266_s23 = int_to_ptr.vmem [resolvable:$false] %s3265_s23 }
  0x6d   : > { %s3267_s7 = scalar_lea.vmem %s3266_s23, 1024  ;;  %p3268_p3 = scmp.lt.s32.totalorder %s3585_s30, %s3266_s23 }
  0x6e   : > { %p3263_p4 = pnand %p3261_p1, %p3247_p0  ;;  %p3269_p7 = scmp.lt.s32.totalorder %s3267_s7, %s3260_s29 }
  0x70   : > { %p3264_p8 = pneg %p3263_p4  ;;  %p3270_p10 = por %p3269_p7, %p3268_p3 }
  0x72   : > { %p3271_p13 = pnand %p3270_p10, %p3264_p8 }
  0x74   : > { %3274 = shalt.err (!%p3271_p13)
}
  0x75   : > { %3033 = dma.hbm_to_vmem [thread:$0]  (!%p3581_p11), %s3579_s11, 512, %s3585_s30, %s3587_s28, %s3386_s13, %s3386_s13, %s3387_s14  }
  0x76   : > { %p3978_p0 = scmp.ne.s32.totalorder %s3972_s26, 0 }
  0x77   : > { %s3621_s17 = sand.u32 (!%p3978_p0), 1, %s3373_s19   ;;  %p3979_p5 = scmp.ne.s32.totalorder (!%p3978_p0), %s3970_s24, 0 }
  0x78   : > { %244 = sbr.rel (%p3978_p0) target bundleno = 579 (0x243), region = 36  ;;  %s2359_s8 = sshll.u32 (!%p3978_p0), %s3621_s17, 5 }
  0x79   : > { %s247_s9 = scalar_lea.sflag (!%p3978_p0), [#allocation4], %s3621_s17  ;;  %s3627_s15 = scalar_lea.vmem (!%p3978_p0), [#allocation3], %s2359_s8 }
  0x7f   : > { %3348 = dma.done.wait (%p3979_p5), %s247_s9, 512  }
  0x80   : > { %3350 = vsyncadd (%p3979_p5), %s247_s9, 4294966784  ;;  %p3980_p11 = scmp.eq.s32.totalorder %s3445_s22, 0 }
  0x82   : > { %3352 = dma.done.wait (%p3980_p11), [#allocation7], 32   ;;  %p3981_p9 = pmov %p3980_p11 }
  0x84   : > { %3354 = vsyncadd (%p3981_p9), [#allocation7], 4294967264  ;;  %p3982_p12 = pmov %p3981_p9 }
  0x85   : > { %p3983_p2 = pmov %p3981_p9 }
  0x86   : > { %3356 = dma.done.wait (%p3982_p12), [#allocation10], 9216  }
  0x87   : > { %3358 = vsyncadd (%p3983_p2), [#allocation10], 4294958080  ;;  %v3389_v0 = vmov 0   ;;  %v3089_v1 = vld [vmem:[#allocation9 + $0xc0] sm:$0xff]   ;;  %v3091_v3 = vld [vmem:[#allocation9 + $0xc8] sm:$0xff]   ;;  %vm352_vm0 = vcmask 1040384  }
  0x88   : > { %349 = vst [vmem:[#allocation2] sm:$0xff] %v3389_v0  ;;  %351 = vst [vmem:[#allocation2 + $0x48] sm:$0xff] %v3389_v0  ;;  %v3090_v2 = vld [vmem:[#allocation9] sm:$0xff]   ;;  %2634 = vmatprep.subr.bf16.mxu0 %v3089_v1  ;;  %v3092_v4 = vld [vmem:[#allocation9 + $0x8] sm:$0xff]   ;;  %vm353_vm1 = vsmask.f32 256 }
  0x89   : > { %2666 = vmatprep.subr.bf16.mxu1 %v3090_v2  ;;  %2635 = vmatpush3.bf16.msra.mxu0 %v3089_v1  ;;  %v3093_v5 = vld [vmem:[#allocation9 + $0xd0] sm:$0xff]   ;;  %vm386_vm2 = vsmask.f32 7954  ;;  %v3095_v7 = vld [vmem:[#allocation9 + $0xd8] sm:$0xff]   ;;  %vm385_vm3 = vcmask 1047556   ;;  %vm3642_vm4 = vmand %vm352_vm0, %vm353_vm1  ;;  %vm491_vm7 = vcmask 1044480  }
  0x8a   : > { %2667 = vmatpush3.bf16.msra.mxu1 %v3090_v2  ;;  %2636 = vmatprep.subr.bf16.mxu0 %v3091_v3  ;;  %v3094_v6 = vld [vmem:[#allocation9 + $0x10] sm:$0xff]   ;;  %v3096_v8 = vld [vmem:[#allocation9 + $0x18] sm:$0xff]   ;;  %vm3646_vm5 = vmand %vm385_vm3, %vm386_vm2  ;;  %vm492_vm6 = vsmask.f32 4354  ;;  %vm1530_vm9 = vcmask 1046528   ;;  %vm2089_vm10 = vcmask 1045504  }
  0x8b   : > { %2668 = vmatprep.subr.bf16.mxu1 %v3092_v4  ;;  %v3097_v11 = vld [vmem:[#allocation9 + $0xe0] sm:$0xff]   ;;  %v3099_v13 = vld [vmem:[#allocation9 + $0xe8] sm:$0xff]   ;;  %v3651_v16 = vld [vmem:[#allocation6] ss:$0 sm:$0xff]  ;;  %s3864_s24 = scalar_lea.vmem [#allocation11], %s2359_s8  ;;  %s2447_s26 = sshll.u32 %s3445_s22, 9 }
  0x8c   : > { %v3098_v12 = vld [vmem:[#allocation9 + $0x20] sm:$0xff]   ;;  %v3100_v14 = vld [vmem:[#allocation9 + $0x28] sm:$0xff]   ;;  %v3653_v17 = vld [vmem:[#allocation8] ss:$0 sm:$0xff]  ;;  %s2202_s13 = sshll.u32 %s3864_s24, 4  ;;  %s3882_s30 = scalar_lea.hbm %s3965_s4, %s2447_s26  ;;  %s3884_s13 = int_to_ptr.vmem [resolvable:$true] %s2202_s13 }
  0x8d   : > { %2637 = vmatpush3.bf16.msra.mxu0 %v3091_v3  ;;  %v2449_v15 = vld [vmem:[%s3627_s15] sm:$0xff]   ;;  %v358_v19 = vld [vmem:[#allocation2 + $0x8] sm:$0x1]  ;;  %v391_v20 = vld [vmem:[#allocation2 + $0x8] sm:$0xf0]  ;;  %s2184_s28 = scalar_lea.sflag [#allocation5], %s3621_s17 }
  0x8e   : > { %2669 = vmatpush3.bf16.msra.mxu1 %v3092_v4  ;;  %2638 = vmatprep.subr.bf16.mxu0 %v3093_v5  ;;  %v2450_v18 = vunpack.c.l.bf16 %v2449_v15  ;;  %v2451_v22 = vunpack.c.h.bf16 %v2449_v15  ;;  %v3101_v23 = vld [vmem:[#allocation9 + $0xf0] sm:$0xff]   ;;  %v359_v24 = vsel %vm3642_vm4, 0, %v358_v19  ;;  %v392_v25 = vsel %vm3646_vm5, 0, %v391_v20  ;;  %v361_v32 = vld [vmem:[#allocation2 + $0x10] sm:$0x1]  ;;  %v2484_v42 = vld [vmem:[%s3627_s15 + $0x8] sm:$0xff]  }
  0x8f   : > { %2670 = vmatprep.subr.bf16.mxu1 %v3094_v6  ;;  %v355_v21 = vld [vmem:[#allocation2] sm:$0x1]  ;;  %v388_v27 = vld [vmem:[#allocation2] sm:$0xf0]  ;;  %360 = vst [vmem:[#allocation2 + $0x8] sm:$0x1] %v359_v24  ;;  %v2454_v43 = vunpack.c.l.bf16 %v2484_v42  ;;  %v2455_v46 = vunpack.c.h.bf16 %v2484_v42  ;;  %vm3693_vm8 = vmand %vm491_vm7, %vm492_vm6 }
  0x90   : > { %v356_v26 = vsel %vm3642_vm4, 0, %v355_v21  ;;  %v3102_v28 = vld [vmem:[#allocation9 + $0x30] sm:$0xff]   ;;  %v318_v29 = vmul.f32 %v2450_v18, %v3651_v16  ;;  %393 = vst [vmem:[#allocation2 + $0x8] sm:$0xf0] %v392_v25  ;;  %v389_v30 = vsel %vm3646_vm5, 0, %v388_v27  ;;  %v319_v31 = vmul.f32 %v2451_v22, %v3651_v16  ;;  %v3103_v38 = vld [vmem:[#allocation9 + $0xf8] sm:$0xff]  }
  0x91   : > { %2639 = vmatpush3.bf16.msra.mxu0 %v3093_v5  ;;  %357 = vst [vmem:[#allocation2] sm:$0x1] %v356_v26  ;;  %v394_v33 = vld [vmem:[#allocation2 + $0x10] sm:$0xf0]  ;;  %390 = vst [vmem:[#allocation2] sm:$0xf0] %v389_v30  ;;  %v320_v54 = vmul.f32 %v2454_v43, %v3651_v16  ;;  %v321_v55 = vmul.f32 %v2455_v46, %v3651_v16 }
  0x92   : > { %2671 = vmatpush3.bf16.msra.mxu1 %v3094_v6  ;;  %2640 = vmatprep.subr.bf16.mxu0 %v3095_v7  ;;  %v362_v34 = vsel %vm3642_vm4, 0, %v361_v32  ;;  %v395_v35 = vsel %vm3646_vm5, 0, %v394_v33  ;;  %v333_v36 = vadd.f32 %v3653_v17, %v318_v29  ;;  %v334_v37 = vadd.f32 %v3653_v17, %v319_v31  ;;  %v3104_v39 = vld [vmem:[#allocation9 + $0x38] sm:$0xff]   ;;  %v364_v44 = vld [vmem:[#allocation2 + $0x18] sm:$0x1]  ;;  %s3275_s10 = scalar_lea.vmem %s3884_s13, 512 }
  0x93   : > { %2672 = vmatprep.subr.bf16.mxu1 %v3096_v8  ;;  %363 = vst [vmem:[#allocation2 + $0x10] sm:$0x1] %v362_v34  ;;  %396 = vst [vmem:[#allocation2 + $0x10] sm:$0xf0] %v395_v35  ;;  %v397_v45 = vld [vmem:[#allocation2 + $0x18] sm:$0xf0]  ;;  %v335_v1 = vadd.f32 %v3653_v17, %v320_v54  ;;  %v336_v2 = vadd.f32 %v3653_v17, %v321_v55  ;;  %p3276_p1 = scmp.ne.s32.totalorder %s3884_s13, %s3275_s10 }
  0x94   : > { %v341_v40 = vmax.f32 %v333_v36, 0.0  ;;  %v342_v41 = vmax.f32 %v334_v37, 0.0  ;;  %v367_v47 = vld [vmem:[#allocation2 + $0x20] sm:$0x1]  ;;  %v365_v50 = vsel %vm3642_vm4, 0, %v364_v44  ;;  %v398_v51 = vsel %vm3646_vm5, 0, %v397_v45 }
  0x95   : > { %2641 = vmatpush3.bf16.msra.mxu0 %v3095_v7  ;;  %v400_v52 = vld [vmem:[#allocation2 + $0x20] sm:$0xf0]  ;;  %v3676_v53 = vld [vmem:[#allocation9 + $0x180] sm:$0xff]   ;;  %366 = vst [vmem:[#allocation2 + $0x18] sm:$0x1] %v365_v50  ;;  %v368_v56 = vsel %vm3642_vm4, 0, %v367_v47  ;;  %p3277_p4 = pnand %p3276_p1, %p3570_p6 }
  0x96   : > { %2673 = vmatpush3.bf16.msra.mxu1 %v3096_v8  ;;  %2642 = vmatprep.subr.bf16.mxu0 %v3097_v11  ;;  %v418_v48 = vpack.c.bf16 %v341_v40, %v341_v40  ;;  %v419_v49 = vpack.c.bf16 %v342_v41, %v342_v41  ;;  %399 = vst [vmem:[#allocation2 + $0x18] sm:$0xf0] %v398_v51  ;;  %v401_v57 = vsel %vm3646_vm5, 0, %v400_v52  ;;  %v3686_v63 = vld [vmem:[#allocation9 + $0x100] sm:$0xff]   ;;  %369 = vst [vmem:[#allocation2 + $0x20] sm:$0x1] %v368_v56 }
  0x97   : > { %2674 = vmatprep.subr.bf16.mxu1 %v3098_v12  ;;  %402 = vst [vmem:[#allocation2 + $0x20] sm:$0xf0] %v401_v57  ;;  %v494_v0 = vld [vmem:[#allocation2 + $0x8] sm:$0x1f]  ;;  %v343_v7 = vmax.f32 %v335_v1, 0.0  ;;  %v344_v8 = vmax.f32 %v336_v2, 0.0  ;;  %p3278_p8 = pneg %p3277_p4 }
  0x98   : > { %v427_v58 = vshrl.u32 %v418_v48, 16  ;;  %v430_v59 = vshll.u32 %v418_v48, 16  ;;  %v3684_v60 = vld [vmem:[#allocation2] sm:$0xff]  ;;  %v434_v61 = vshrl.u32 %v419_v49, 16  ;;  %v437_v62 = vshll.u32 %v419_v49, 16  ;;  %v2486_v46 = vld [vmem:[%s3627_s15 + $0x18] sm:$0xff]  }
  0x99   : > { %2643 = vmatpush3.bf16.msra.mxu0 %v3097_v11  ;;  %2682 = vmatprep.mubr.bf16.mxu1 %v3684_v60  ;;  %v421_v15 = vpack.c.bf16 %v344_v8, %v344_v8  ;;  %v370_v19 = vld [vmem:[#allocation2 + $0x28] sm:$0x1]  ;;  %v403_v20 = vld [vmem:[#allocation2 + $0x28] sm:$0xf0]  ;;  %v373_v22 = vld [vmem:[#allocation2 + $0x30] sm:$0x1]  ;;  %v2462_v51 = vunpack.c.l.bf16 %v2486_v46 }
  0x9a   : > { %2675 = vmatpush3.bf16.msra.mxu1 %v3098_v12  ;;  %2644 = vmatprep.subr.bf16.mxu0 %v3099_v13  ;;  %v429_v3 = vrot.slane %v427_v58, 7  ;;  %v436_v4 = vrot.slane %v434_v61, 7  ;;  %v497_v5 = vld [vmem:[#allocation2 + $0x10] sm:$0x1f]  ;;  %v371_v25 = vsel %vm3642_vm4, 0, %v370_v19  ;;  %v404_v26 = vsel %vm3646_vm5, 0, %v403_v20 }
  0x9b   : > { %2676 = vmatprep.subr.bf16.mxu1 %v3100_v14  ;;  %v406_v27 = vld [vmem:[#allocation2 + $0x30] sm:$0xf0]  ;;  %v448_v30 = vshrl.u32 %v421_v15, 16  ;;  %v451_v31 = vshll.u32 %v421_v15, 16  ;;  %372 = vst [vmem:[#allocation2 + $0x28] sm:$0x1] %v371_v25  ;;  %v324_v1 = vmul.f32 %v2462_v51, %v3651_v16 }
  0x9c   : > { %v432_v11 = vor.u32 %v430_v59, %v429_v3  ;;  %v439_v12 = vor.u32 %v437_v62, %v436_v4  ;;  %405 = vst [vmem:[#allocation2 + $0x28] sm:$0xf0] %v404_v26  ;;  %v374_v35 = vsel %vm3642_vm4, 0, %v373_v22  ;;  %v407_v36 = vsel %vm3646_vm5, 0, %v406_v27  ;;  %v376_v47 = vld [vmem:[#allocation2 + $0x38] sm:$0x1] }
  0x9d   : > { %2645 = vmatpush3.bf16.msra.mxu0 %v3099_v13  ;;  %v2485_v13 = vld [vmem:[%s3627_s15 + $0x10] sm:$0xff]   ;;  %v500_v32 = vld [vmem:[#allocation2 + $0x18] sm:$0x1f]  ;;  %375 = vst [vmem:[#allocation2 + $0x30] sm:$0x1] %v374_v35  ;;  %v377_v52 = vsel %vm3642_vm4, 0, %v376_v47  ;;  %v339_v15 = vadd.f32 %v3653_v17, %v324_v1 }
  0x9e   : > { %2677 = vmatpush3.bf16.msra.mxu1 %v3100_v14  ;;  %2646 = vmatprep.subr.bf16.mxu0 %v3101_v23  ;;  %v420_v14 = vpack.c.bf16 %v343_v7, %v343_v7  ;;  %v2458_v18 = vunpack.c.l.bf16 %v2485_v13  ;;  %v2459_v21 = vunpack.c.h.bf16 %v2485_v13  ;;  %v498_v24 = vsel %vm3693_vm8, %v439_v12, %v497_v5  ;;  %408 = vst [vmem:[#allocation2 + $0x30] sm:$0xf0] %v407_v36  ;;  %v3108_v48 = vld [vmem:[#allocation9 + $0x108] sm:$0xff]   ;;  %v412_v3 = vld [vmem:[#allocation2 + $0x40] sm:$0xf0]  ;;  %v3121_v9 = vld [vmem:[#allocation9 + $0x40] sm:$0xff]  }
  0x9f   : > { %2678 = vmatprep.subr.bf16.mxu1 %v3102_v28  ;;  %499 = vst [vmem:[#allocation2 + $0x10] sm:$0x1f] %v498_v24  ;;  %v409_v54 = vld [vmem:[#allocation2 + $0x38] sm:$0xf0]  ;;  %v379_v55 = vld [vmem:[#allocation2 + $0x40] sm:$0x1] }
  0xa0   : > { %v444_v29 = vshll.u32 %v420_v14, 16  ;;  %v322_v33 = vmul.f32 %v2458_v18, %v3651_v16  ;;  %v323_v34 = vmul.f32 %v2459_v21, %v3651_v16  ;;  %v3107_v58 = vld [vmem:[#allocation9 + $0x188] sm:$0xff]   ;;  %378 = vst [vmem:[#allocation2 + $0x38] sm:$0x1] %v377_v52  ;;  %v410_v62 = vsel %vm3646_vm5, 0, %v409_v54  ;;  %v3109_v4 = vld [vmem:[#allocation9 + $0x190] sm:$0xff]  }
  0xa1   : > { %2647 = vmatpush3.bf16.msra.mxu0 %v3101_v23  ;;  %v495_v23 = vsel %vm3693_vm8, %v432_v11, %v494_v0  ;;  %v2463_v0 = vunpack.c.h.bf16 %v2486_v46  ;;  %411 = vst [vmem:[#allocation2 + $0x38] sm:$0xf0] %v410_v62  ;;  %v380_v2 = vsel %vm3642_vm4, 0, %v379_v55  ;;  %v3110_v12 = vld [vmem:[#allocation9 + $0x110] sm:$0xff]   ;;  %v413_v19 = vsel %vm3646_vm5, 0, %v412_v3  ;;  %v3120_v55 = vld [vmem:[#allocation9 + $0x138] sm:$0xff]  }
  0xa2   : > { %2679 = vmatpush3.bf16.msra.mxu1 %v3102_v28  ;;  %2648 = vmatprep.subr.bf16.mxu0 %v3103_v38  ;;  %496 = vst [vmem:[#allocation2 + $0x8] sm:$0x1f] %v495_v23  ;;  %v441_v28 = vshrl.u32 %v420_v14, 16  ;;  %v337_v40 = vadd.f32 %v3653_v17, %v322_v33  ;;  %v338_v41 = vadd.f32 %v3653_v17, %v323_v34  ;;  %381 = vst [vmem:[#allocation2 + $0x40] sm:$0x1] %v380_v2  ;;  %v3113_v33 = vld [vmem:[#allocation9 + $0x1a0] sm:$0xff]  }
  0xa3   : > { %2680 = vmatprep.subr.bf16.mxu1 %v3104_v39  ;;  %v506_v13 = vld [vmem:[#allocation2 + $0x28] sm:$0x1f]  ;;  %v325_v18 = vmul.f32 %v2463_v0, %v3651_v16  ;;  %414 = vst [vmem:[#allocation2 + $0x40] sm:$0xf0] %v413_v19  ;;  %v347_v21 = vmax.f32 %v339_v15, 0.0  ;;  %v3114_v34 = vld [vmem:[#allocation9 + $0x120] sm:$0xff]  }
  0xa4   : > { %v443_v37 = vrot.slane %v441_v28, 7  ;;  %v345_v44 = vmax.f32 %v337_v40, 0.0  ;;  %v346_v45 = vmax.f32 %v338_v41, 0.0  ;;  %v3112_v16 = vld [vmem:[#allocation9 + $0x118] sm:$0xff]   ;;  %v3115_v41 = vld [vmem:[#allocation9 + $0x1a8] sm:$0xff]   ;;  %v3122_v10 = vld [vmem:[#allocation9 + $0x140] sm:$0xff]  }
  0xa5   : > { %2649 = vmatpush3.bf16.msra.mxu0 %v3103_v38  ;;  %v450_v38 = vrot.slane %v448_v30, 7  ;;  %v509_v14 = vld [vmem:[#allocation2 + $0x30] sm:$0x1f]  ;;  %v424_v26 = vpack.c.bf16 %v347_v21, %v347_v21  ;;  %v382_v51 = vld [vmem:[#allocation2 + $0x48] sm:$0x1]  ;;  %v3123_v62 = vld [vmem:[#allocation9 + $0x48] sm:$0xff]  }
  0xa6   : > { %2681 = vmatpush3.bf16.msra.mxu1 %v3104_v39  ;;  %2698 = vmatprep.subr.bf16.mxu0 %v3676_v53  ;;  %v503_v39 = vld [vmem:[#allocation2 + $0x20] sm:$0x1f]  ;;  %v446_v42 = vor.u32 %v444_v29, %v443_v37  ;;  %v3725_v57 = vld [vmem:[#allocation2 + $0x10] sm:$0xff]  ;;  %v422_v59 = vpack.c.bf16 %v345_v44, %v345_v44  ;;  %v423_v61 = vpack.c.bf16 %v346_v45, %v346_v45  ;;  %v383_v52 = vsel %vm3642_vm4, 0, %v382_v51  ;;  %v415_v54 = vld [vmem:[#allocation2 + $0x48] sm:$0xf0] }
  0xa7   : > { %2730 = vmatprep.subr.bf16.mxu1 %v3686_v63  ;;  %v453_v43 = vor.u32 %v451_v31, %v450_v38  ;;  %v3111_v28 = vld [vmem:[#allocation9 + $0x198] sm:$0xff]   ;;  %v469_v30 = vshrl.u32 %v424_v26, 16  ;;  %v472_v31 = vshll.u32 %v424_v26, 16  ;;  %384 = vst [vmem:[#allocation2 + $0x48] sm:$0x1] %v383_v52  ;;  %v416_v6 = vsel %vm3646_vm5, 0, %v415_v54 }
  0xa8   : > { %v501_v49 = vsel %vm3693_vm8, %v446_v42, %v500_v32  ;;  %v455_v5 = vshrl.u32 %v422_v59, 16  ;;  %v458_v7 = vshll.u32 %v422_v59, 16  ;;  %v462_v8 = vshrl.u32 %v423_v61, 16  ;;  %v512_v38 = vld [vmem:[#allocation2 + $0x38] sm:$0x1f]  ;;  %v3119_v59 = vld [vmem:[#allocation9 + $0x1b8] sm:$0xff]  }
  0xa9   : > { %v504_v50 = vsel %vm3693_vm8, %v453_v43, %v503_v39  ;;  %v3723_v56 = vld [vmem:[#allocation2 + $0x8] sm:$0xff]  ;;  %502 = vst [vmem:[#allocation2 + $0x18] sm:$0x1f] %v501_v49  ;;  %v465_v11 = vshll.u32 %v423_v61, 16  ;;  %v471_v35 = vrot.slane %v469_v30, 7  ;;  %v3116_v43 = vld [vmem:[#allocation9 + $0x128] sm:$0xff]  }
  0xaa   : > { %505 = vst [vmem:[#allocation2 + $0x20] sm:$0x1f] %v504_v50  ;;  %2650 = vmatprep.mubr.bf16.mxu0 %v3723_v56  ;;  %2683 = vmatmul.mubr.bf16.vlgmr.msra.gmra.mrb[0].mxu1 %v3723_v56  ;;  %v464_v20 = vrot.slane %v462_v8, 7  ;;  %v515_v42 = vld [vmem:[#allocation2 + $0x40] sm:$0x1f]  ;;  %v3127_v3 = vld [vmem:[#allocation9 + $0x58] sm:$0xff]  }
  0xab   : > { %2651 = vmatmul.mubr.bf16.vlgmr.msra.gmra.mrb[0].mxu0 %v3725_v57  ;;  %2731 = vmatpush3.bf16.msra.mxu1 %v3686_v63  ;;  %v457_v63 = vrot.slane %v455_v5, 7  ;;  %v474_v39 = vor.u32 %v472_v31, %v471_v35  ;;  %v3118_v49 = vld [vmem:[#allocation9 + $0x130] sm:$0xff]   ;;  %417 = vst [vmem:[#allocation2 + $0x48] sm:$0xf0] %v416_v6  ;;  %v3124_v0 = vld [vmem:[#allocation9 + $0x148] sm:$0xff]   ;;  %v3129_v5 = vld [vmem:[#allocation9 + $0x60] sm:$0xff]  }
  0xac   : > { %2699 = vmatpush3.bf16.msra.mxu0 %v3676_v53  ;;  %2732 = vmatprep.subr.bf16.mxu1 %v3108_v48  ;;  %v340_v53 = vadd.f32 %v3653_v17, %v325_v18  ;;  %v467_v23 = vor.u32 %v465_v11, %v464_v20  ;;  %v3117_v50 = vld [vmem:[#allocation9 + $0x1b0] sm:$0xff]   ;;  %v3131_v8 = vld [vmem:[#allocation9 + $0x68] sm:$0xff]   ;;  %v3135_v15 = vld [vmem:[#allocation9 + $0x78] sm:$0xff]   ;;  %s3390_s29 = smov [#allocation11]  }
  0xad   : > { %2700 = vmatprep.subr.bf16.mxu0 %v3107_v58  ;;  %2686 = vmatprep.mubr.bf16.mxu1 %v3725_v57  ;;  %v460_v22 = vor.u32 %v458_v7, %v457_v63  ;;  %v513_v44 = vsel %vm3693_vm8, %v474_v39, %v512_v38  ;;  %v3125_v1 = vld [vmem:[#allocation9 + $0x50] sm:$0xff]   ;;  %v3130_v7 = vld [vmem:[#allocation9 + $0x160] sm:$0xff]   ;;  %v3132_v11 = vld [vmem:[#allocation9 + $0x168] sm:$0xff]   ;;  %s3279_s12 = sshll.u32 %s3390_s29, 4  ;;  %s3280_s12 = int_to_ptr.vmem [resolvable:$false] %s3279_s12 }
  0xae   : > { %v348_v27 = vmax.f32 %v340_v53, 0.0  ;;  %v510_v17 = vsel %vm3693_vm8, %v467_v23, %v509_v14  ;;  %514 = vst [vmem:[#allocation2 + $0x38] sm:$0x1f] %v513_v44  ;;  %v3126_v2 = vld [vmem:[#allocation9 + $0x150] sm:$0xff]   ;;  %v3136_v18 = vld [vmem:[#allocation9 + $0x178] sm:$0xff]   ;;  %v3137_v19 = vld [vmem:[#allocation9 + $0x1c0] sm:$0xff]   ;;  %p3282_p3 = scmp.lt.s32.totalorder %s3884_s13, %s3280_s12 }
  0xaf   : > { %2733 = vmatpush3.bf16.msra.mxu1 %v3108_v48  ;;  %v507_v29 = vsel %vm3693_vm8, %v460_v22, %v506_v13  ;;  %511 = vst [vmem:[#allocation2 + $0x30] sm:$0x1f] %v510_v17  ;;  %v3134_v13 = vld [vmem:[#allocation9 + $0x170] sm:$0xff]   ;;  %v3138_v63 = vld [vmem:[#allocation9 + $0x80] sm:$0xff]   ;;  %v3139_v20 = vld [vmem:[#allocation9 + $0x1c8] sm:$0xff]   ;;  %s3281_s23 = scalar_lea.vmem %s3280_s12, 1024 }
  0xb0   : > { %2701 = vmatpush3.bf16.msra.mxu0 %v3107_v58  ;;  %v3743_v24 = vld [vmem:[#allocation2 + $0x18] sm:$0xff]  ;;  %2734 = vmatprep.subr.bf16.mxu1 %v3110_v12  ;;  %508 = vst [vmem:[#allocation2 + $0x28] sm:$0x1f] %v507_v29  ;;  %v425_v32 = vpack.c.bf16 %v348_v27, %v348_v27  ;;  %v3141_v53 = vld [vmem:[#allocation9 + $0x1d0] sm:$0xff]   ;;  %v3143_v23 = vld [vmem:[#allocation9 + $0x1d8] sm:$0xff]   ;;  %p3283_p7 = scmp.lt.s32.totalorder %s3281_s23, %s3275_s10 }
  0xb1   : > { %v3745_v25 = vld [vmem:[#allocation2 + $0x20] sm:$0xff]  ;;  %2654 = vmatprep.mubr.bf16.mxu0 %v3743_v24  ;;  %2702 = vmatprep.subr.bf16.mxu0 %v3109_v4  ;;  %v3145_v26 = vld [vmem:[#allocation9 + $0x1e0] sm:$0xff]   ;;  %v3151_v31 = vld [vmem:[#allocation9 + $0x1f8] sm:$0xff]  }
  0xb2   : > { %2687 = vmatmul.mubr.bf16.gmra.mrb[4].mxu1 %v3743_v24  ;;  %v476_v36 = vshrl.u32 %v425_v32, 16  ;;  %v479_v37 = vshll.u32 %v425_v32, 16  ;;  %v3792_v14 = vld [vmem:[#allocation2 + $0x48] sm:$0xff]  ;;  %v3140_v21 = vld [vmem:[#allocation9 + $0x88] sm:$0xff]   ;;  %v3146_v27 = vld [vmem:[#allocation9 + $0xa0] sm:$0xff]   ;;  %p3284_p10 = por %p3283_p7, %p3282_p3 }
  0xb3   : > { %2655 = vmatmul.mubr.bf16.gmra.mrb[4].mxu0 %v3745_v25  ;;  %2735 = vmatpush3.bf16.msra.mxu1 %v3110_v12  ;;  %v3133_v12 = vld [vmem:[#allocation9 + $0x70] sm:$0xff]   ;;  %v3148_v29 = vld [vmem:[#allocation9 + $0xa8] sm:$0xff]   ;;  %v3152_v32 = vld [vmem:[#allocation9 + $0xb8] sm:$0xff]  }
  0xb4   : > { %2703 = vmatpush3.bf16.msra.mxu0 %v3109_v4  ;;  %2736 = vmatprep.subr.bf16.mxu1 %v3112_v16  ;;  %v478_v40 = vrot.slane %v476_v36, 7  ;;  %v3128_v4 = vld [vmem:[#allocation9 + $0x158] sm:$0xff]   ;;  %v3142_v22 = vld [vmem:[#allocation9 + $0x90] sm:$0xff]   ;;  %v3158_v36 = vld [vmem:[#allocation9 + $0x228] sm:$0xff]   ;;  %p3285_p13 = pnand %p3284_p10, %p3278_p8 }
  0xb5   : > { %2704 = vmatprep.subr.bf16.mxu0 %v3111_v28  ;;  %2690 = vmatprep.mubr.bf16.mxu1 %v3745_v25  ;;  %v3771_v58 = vld [vmem:[#allocation2 + $0x38] sm:$0xff]  ;;  %v3149_v17 = vld [vmem:[#allocation9 + $0x1f0] sm:$0xff]   ;;  %v3160_v38 = vld [vmem:[#allocation9 + $0x238] sm:$0xff]  }
  0xb6   : > { %v481_v45 = vor.u32 %v479_v37, %v478_v40  ;;  %v3759_v47 = vld [vmem:[#allocation2 + $0x30] sm:$0xff]  ;;  %v3150_v30 = vld [vmem:[#allocation9 + $0xb0] sm:$0xff]  }
  0xb7   : > { %2737 = vmatpush3.bf16.msra.mxu1 %v3112_v16  ;;  %v3757_v46 = vld [vmem:[#allocation2 + $0x28] sm:$0xff] }
  0xb8   : > { %2705 = vmatpush3.bf16.msra.mxu0 %v3111_v28  ;;  %2738 = vmatprep.subr.bf16.mxu1 %v3114_v34  ;;  %v516_v48 = vsel %vm3693_vm8, %v481_v45, %v515_v42  ;;  %v3144_v16 = vld [vmem:[#allocation9 + $0x98] sm:$0xff]   ;;  %v3147_v28 = vld [vmem:[#allocation9 + $0x1e8] sm:$0xff]   ;;  %v3155_v35 = vld [vmem:[#allocation9 + $0x210] sm:$0xff]  }
  0xb9   : > { %2706 = vmatprep.subr.bf16.mxu0 %v3113_v33  ;;  %2658 = vmatprep.mubr.bf16.mxu0 %v3757_v46  ;;  %517 = vst [vmem:[#allocation2 + $0x40] sm:$0x1f] %v516_v48  ;;  %v3159_v37 = vld [vmem:[#allocation9 + $0x230] sm:$0xff]  }
  0xba   : > { %2691 = vmatmul.mubr.bf16.gmra.mrb[8].mxu1 %v3757_v46 }
  0xbb   : > { %2659 = vmatmul.mubr.bf16.gmra.mrb[8].mxu0 %v3759_v47  ;;  %2739 = vmatpush3.bf16.msra.mxu1 %v3114_v34  ;;  %v3154_v34 = vld [vmem:[#allocation9 + $0x208] sm:$0xff]  }
  0xbc   : > { %2707 = vmatpush3.bf16.msra.mxu0 %v3113_v33  ;;  %2740 = vmatprep.subr.bf16.mxu1 %v3116_v43  ;;  %v3153_v33 = vld [vmem:[#allocation9 + $0x200] sm:$0xff]  }
  0xbd   : > { %2708 = vmatprep.subr.bf16.mxu0 %v3115_v41  ;;  %2694 = vmatprep.mubr.bf16.mxu1 %v3759_v47 }
  0xbe   : > { %2662 = vmatprep.mubr.bf16.mxu0 %v3771_v58 }
  0xbf   : > { %2741 = vmatpush3.bf16.msra.mxu1 %v3116_v43 }
  0xc0   : > { %2709 = vmatpush3.bf16.msra.mxu0 %v3115_v41  ;;  %2742 = vmatprep.subr.bf16.mxu1 %v3118_v49  ;;  %v3774_v61 = vld [vmem:[#allocation2 + $0x40] sm:$0xff] }
  0xc1   : > { %2710 = vmatprep.subr.bf16.mxu0 %v3117_v50 }
  0xc2   : > { %2695 = vmatmul.mubr.bf16.gmra.mrb[12].mxu1 %v3771_v58 }
  0xc3   : > { %2663 = vmatmul.mubr.bf16.gmra.mrb[12].mxu0 %v3774_v61  ;;  %2743 = vmatpush3.bf16.msra.mxu1 %v3118_v49 }
  0xc4   : > { %2711 = vmatpush3.bf16.msra.mxu0 %v3117_v50  ;;  %2744 = vmatprep.subr.bf16.mxu1 %v3120_v55 }
  0xc5   : > { %2712 = vmatprep.subr.bf16.mxu0 %v3119_v59  ;;  %2714 = vmatprep.mubr.bf16.mxu0 %v3725_v57 }
  0xc6   : > { %2746 = vmatprep.mubr.bf16.mxu1 %v3723_v56 }
  0xc7   : > { %2745 = vmatpush3.bf16.msra.mxu1 %v3120_v55 }
  0xc8   : > { %2713 = vmatpush3.bf16.msra.mxu0 %v3119_v59  ;;  %2762 = vmatprep.subr.bf16.mxu1 %v3121_v9 }
  0xc9   : > { %2826 = vmatprep.subr.bf16.mxu0 %v3122_v10 }
  0xca   : > { %2747 = vmatmul.mubr.bf16.vlgmr.msra.gmra.mrb[16].mxu1 %v3725_v57 }
  0xcb   : > { %2715 = vmatmul.mubr.bf16.vlgmr.msra.gmra.mrb[16].mxu0 %v3743_v24  ;;  %2763 = vmatpush3.bf16.msra.mxu1 %v3121_v9 }
  0xcc   : > { %2827 = vmatpush3.bf16.msra.mxu0 %v3122_v10  ;;  %2764 = vmatprep.subr.bf16.mxu1 %v3123_v62 }
  0xcd   : > { %2828 = vmatprep.subr.bf16.mxu0 %v3124_v0  ;;  %2718 = vmatprep.mubr.bf16.mxu0 %v3745_v25 }
  0xce   : > { %2750 = vmatprep.mubr.bf16.mxu1 %v3743_v24 }
  0xcf   : > { %2765 = vmatpush3.bf16.msra.mxu1 %v3123_v62 }
  0xd0   : > { %2829 = vmatpush3.bf16.msra.mxu0 %v3124_v0  ;;  %2766 = vmatprep.subr.bf16.mxu1 %v3125_v1 }
  0xd1   : > { %2830 = vmatprep.subr.bf16.mxu0 %v3126_v2 }
  0xd2   : > { %2751 = vmatmul.mubr.bf16.gmra.mrb[20].mxu1 %v3745_v25 }
  0xd3   : > { %2719 = vmatmul.mubr.bf16.gmra.mrb[20].mxu0 %v3757_v46  ;;  %2767 = vmatpush3.bf16.msra.mxu1 %v3125_v1 }
  0xd4   : > { %2831 = vmatpush3.bf16.msra.mxu0 %v3126_v2  ;;  %2768 = vmatprep.subr.bf16.mxu1 %v3127_v3 }
  0xd5   : > { %2832 = vmatprep.subr.bf16.mxu0 %v3128_v4  ;;  %2722 = vmatprep.mubr.bf16.mxu0 %v3759_v47 }
  0xd6   : > { %2754 = vmatprep.mubr.bf16.mxu1 %v3757_v46 }
  0xd7   : > { %2769 = vmatpush3.bf16.msra.mxu1 %v3127_v3 }
  0xd8   : > { %2833 = vmatpush3.bf16.msra.mxu0 %v3128_v4  ;;  %2770 = vmatprep.subr.bf16.mxu1 %v3129_v5 }
  0xd9   : > { %2834 = vmatprep.subr.bf16.mxu0 %v3130_v7 }
  0xda   : > { %2755 = vmatmul.mubr.bf16.gmra.mrb[24].mxu1 %v3759_v47 }
  0xdb   : > { %2723 = vmatmul.mubr.bf16.gmra.mrb[24].mxu0 %v3771_v58  ;;  %2771 = vmatpush3.bf16.msra.mxu1 %v3129_v5 }
  0xdc   : > { %2835 = vmatpush3.bf16.msra.mxu0 %v3130_v7  ;;  %2772 = vmatprep.subr.bf16.mxu1 %v3131_v8 }
  0xdd   : > { %2836 = vmatprep.subr.bf16.mxu0 %v3132_v11  ;;  %2726 = vmatprep.mubr.bf16.mxu0 %v3774_v61 }
  0xde   : > { %2758 = vmatprep.mubr.bf16.mxu1 %v3771_v58 }
  0xdf   : > { %2773 = vmatpush3.bf16.msra.mxu1 %v3131_v8 }
  0xe0   : > { %2837 = vmatpush3.bf16.msra.mxu0 %v3132_v11  ;;  %2774 = vmatprep.subr.bf16.mxu1 %v3133_v12 }
  0xe1   : > { %2838 = vmatprep.subr.bf16.mxu0 %v3134_v13 }
  0xe2   : > { %2759 = vmatmul.mubr.bf16.gmra.mrb[28].mxu1 %v3774_v61 }
  0xe3   : > { %2727 = vmatmul.mubr.bf16.gmra.mrb[28].mxu0 %v3792_v14  ;;  %2775 = vmatpush3.bf16.msra.mxu1 %v3133_v12 }
  0xe4   : > { %2839 = vmatpush3.bf16.msra.mxu0 %v3134_v13  ;;  %2776 = vmatprep.subr.bf16.mxu1 %v3135_v15 }
  0xe5   : > { %2840 = vmatprep.subr.bf16.mxu0 %v3136_v18  ;;  %2778 = vmatprep.mubr.bf16.mxu1 %v3684_v60 }
  0xe6   : > { %2842 = vmatprep.mubr.bf16.mxu0 %v3723_v56 }
  0xe7   : > { %2777 = vmatpush3.bf16.msra.mxu1 %v3135_v15 }
  0xe8   : > { %2841 = vmatpush3.bf16.msra.mxu0 %v3136_v18  ;;  %2794 = vmatprep.subr.bf16.mxu1 %v3137_v19 }
  0xe9   : > { %2858 = vmatprep.subr.bf16.mxu0 %v3138_v63 }
  0xea   : > { %2779 = vmatmul.mubr.bf16.vlgmr.msra.gmra.mrb[16].mxu1 %v3723_v56 }
  0xeb   : > { %2843 = vmatmul.mubr.bf16.vlgmr.msra.gmra.mrb[32].mxu0 %v3725_v57  ;;  %2795 = vmatpush3.bf16.msra.mxu1 %v3137_v19 }
  0xec   : > { %2859 = vmatpush3.bf16.msra.mxu0 %v3138_v63  ;;  %2796 = vmatprep.subr.bf16.mxu1 %v3139_v20 }
  0xed   : > { %2860 = vmatprep.subr.bf16.mxu0 %v3140_v21  ;;  %2782 = vmatprep.mubr.bf16.mxu1 %v3725_v57 }
  0xee   : > { %2846 = vmatprep.mubr.bf16.mxu0 %v3743_v24 }
  0xef   : > { %2797 = vmatpush3.bf16.msra.mxu1 %v3139_v20 }
  0xf0   : > { %2861 = vmatpush3.bf16.msra.mxu0 %v3140_v21  ;;  %2798 = vmatprep.subr.bf16.mxu1 %v3141_v53 }
  0xf1   : > { %2862 = vmatprep.subr.bf16.mxu0 %v3142_v22 }
  0xf2   : > { %2783 = vmatmul.mubr.bf16.gmra.mrb[20].mxu1 %v3743_v24 }
  0xf3   : > { %2847 = vmatmul.mubr.bf16.gmra.mrb[36].mxu0 %v3745_v25  ;;  %2799 = vmatpush3.bf16.msra.mxu1 %v3141_v53 }
  0xf4   : > { %2863 = vmatpush3.bf16.msra.mxu0 %v3142_v22  ;;  %2800 = vmatprep.subr.bf16.mxu1 %v3143_v23 }
  0xf5   : > { %2864 = vmatprep.subr.bf16.mxu0 %v3144_v16  ;;  %2786 = vmatprep.mubr.bf16.mxu1 %v3745_v25 }
  0xf6   : > { %2850 = vmatprep.mubr.bf16.mxu0 %v3757_v46 }
  0xf7   : > { %2801 = vmatpush3.bf16.msra.mxu1 %v3143_v23 }
  0xf8   : > { %2865 = vmatpush3.bf16.msra.mxu0 %v3144_v16  ;;  %2802 = vmatprep.subr.bf16.mxu1 %v3145_v26 }
  0xf9   : > { %2866 = vmatprep.subr.bf16.mxu0 %v3146_v27 }
  0xfa   : > { %2787 = vmatmul.mubr.bf16.gmra.mrb[24].mxu1 %v3757_v46 }
  0xfb   : > { %2851 = vmatmul.mubr.bf16.gmra.mrb[40].mxu0 %v3759_v47  ;;  %2803 = vmatpush3.bf16.msra.mxu1 %v3145_v26 }
  0xfc   : > { %2867 = vmatpush3.bf16.msra.mxu0 %v3146_v27  ;;  %2804 = vmatprep.subr.bf16.mxu1 %v3147_v28 }
  0xfd   : > { %2868 = vmatprep.subr.bf16.mxu0 %v3148_v29  ;;  %2790 = vmatprep.mubr.bf16.mxu1 %v3759_v47 }
  0xfe   : > { %2854 = vmatprep.mubr.bf16.mxu0 %v3771_v58 }
  0xff   : > { %2805 = vmatpush3.bf16.msra.mxu1 %v3147_v28 }
 0x100   : > { %2869 = vmatpush3.bf16.msra.mxu0 %v3148_v29  ;;  %2806 = vmatprep.subr.bf16.mxu1 %v3149_v17 }
 0x101   : > { %2870 = vmatprep.subr.bf16.mxu0 %v3150_v30 }
 0x102   : > { %2791 = vmatmul.mubr.bf16.gmra.mrb[28].mxu1 %v3771_v58 }
 0x103   : > { %2855 = vmatmul.mubr.bf16.gmra.mrb[44].mxu0 %v3774_v61  ;;  %2807 = vmatpush3.bf16.msra.mxu1 %v3149_v17 }
 0x104   : > { %2871 = vmatpush3.bf16.msra.mxu0 %v3150_v30  ;;  %2808 = vmatprep.subr.bf16.mxu1 %v3151_v31 }
 0x105   : > { %2872 = vmatprep.subr.bf16.mxu0 %v3152_v32  ;;  %2810 = vmatprep.mubr.bf16.mxu1 %v3725_v57 }
 0x106   : > { %2874 = vmatprep.mubr.bf16.mxu0 %v3684_v60  ;;  %v3156_v60 = vld [vmem:[#allocation9 + $0x218] sm:$0xff]  }
 0x107   : > { %2809 = vmatpush3.bf16.msra.mxu1 %v3151_v31 }
 0x108   : > { %2873 = vmatpush3.bf16.msra.mxu0 %v3152_v32  ;;  %2922 = vmatprep.subr.bf16.mxu1 %v3153_v33 }
 0x109   : > { %2890 = vmatprep.subr.bf16.mxu0 %v3153_v33 }
 0x10a   : > { %2811 = vmatmul.mubr.bf16.vlgmr.msra.gmra.mrb[16].mxu1 %v3743_v24 }
 0x10b   : > { %2875 = vmatmul.mubr.bf16.vlgmr.msra.gmra.mrb[32].mxu0 %v3723_v56  ;;  %2930 = vmatpush3.bf16.msra.mxu1 %v3153_v33  ;;  %v3157_v56 = vld [vmem:[#allocation9 + $0x220] sm:$0xff]  }
 0x10c   : > { %2891 = vmatpush3.bf16.msra.mxu0 %v3153_v33  ;;  %2923 = vmatprep.subr.bf16.mxu1 %v3154_v34 }
 0x10d   : > { %2892 = vmatprep.subr.bf16.mxu0 %v3154_v34  ;;  %2814 = vmatprep.mubr.bf16.mxu1 %v3745_v25 }
 0x10e   : > { %2878 = vmatprep.mubr.bf16.mxu0 %v3725_v57 }
 0x10f   : > { %2931 = vmatpush3.bf16.msra.mxu1 %v3154_v34 }
 0x110   : > { %2893 = vmatpush3.bf16.msra.mxu0 %v3154_v34  ;;  %2924 = vmatprep.subr.bf16.mxu1 %v3155_v35 }
 0x111   : > { %2894 = vmatprep.subr.bf16.mxu0 %v3155_v35 }
 0x112   : > { %2815 = vmatmul.mubr.bf16.gmra.mrb[20].mxu1 %v3757_v46 }
 0x113   : > { %2879 = vmatmul.mubr.bf16.gmra.mrb[36].mxu0 %v3743_v24  ;;  %2932 = vmatpush3.bf16.msra.mxu1 %v3155_v35 }
 0x114   : > { %2895 = vmatpush3.bf16.msra.mxu0 %v3155_v35  ;;  %2925 = vmatprep.subr.bf16.mxu1 %v3156_v60 }
 0x115   : > { %2896 = vmatprep.subr.bf16.mxu0 %v3156_v60  ;;  %2818 = vmatprep.mubr.bf16.mxu1 %v3759_v47 }
 0x116   : > { %2882 = vmatprep.mubr.bf16.mxu0 %v3745_v25 }
 0x117   : > { %2933 = vmatpush3.bf16.msra.mxu1 %v3156_v60 }
 0x118   : > { %2897 = vmatpush3.bf16.msra.mxu0 %v3156_v60  ;;  %2926 = vmatprep.subr.bf16.mxu1 %v3157_v56 }
 0x119   : > { %2898 = vmatprep.subr.bf16.mxu0 %v3157_v56 }
 0x11a   : > { %2819 = vmatmul.mubr.bf16.gmra.mrb[24].mxu1 %v3771_v58 }
 0x11b   : > { %2883 = vmatmul.mubr.bf16.gmra.mrb[40].mxu0 %v3757_v46  ;;  %2934 = vmatpush3.bf16.msra.mxu1 %v3157_v56 }
 0x11c   : > { %2899 = vmatpush3.bf16.msra.mxu0 %v3157_v56  ;;  %2927 = vmatprep.subr.bf16.mxu1 %v3158_v36 }
 0x11d   : > { %2900 = vmatprep.subr.bf16.mxu0 %v3158_v36  ;;  %2822 = vmatprep.mubr.bf16.mxu1 %v3774_v61 }
 0x11e   : > { %2886 = vmatprep.mubr.bf16.mxu0 %v3759_v47 }
 0x11f   : > { %2935 = vmatpush3.bf16.msra.mxu1 %v3158_v36 }
 0x120   : > { %2901 = vmatpush3.bf16.msra.mxu0 %v3158_v36  ;;  %2928 = vmatprep.subr.bf16.mxu1 %v3159_v37 }
 0x121   : > { %2902 = vmatprep.subr.bf16.mxu0 %v3159_v37 }
 0x122   : > { %2823 = vmatmul.mubr.bf16.gmra.mrb[28].mxu1 %v3792_v14 }
 0x123   : > { %2887 = vmatmul.mubr.bf16.gmra.mrb[44].mxu0 %v3771_v58  ;;  %2936 = vmatpush3.bf16.msra.mxu1 %v3159_v37 }
 0x124   : > { %2903 = vmatpush3.bf16.msra.mxu0 %v3159_v37  ;;  %2929 = vmatprep.subr.bf16.mxu1 %v3160_v38 }
 0x125   : > { %2904 = vmatprep.subr.bf16.mxu0 %v3160_v38  ;;  %2906 = vmatprep.mubr.bf16.mxu0 %v3725_v57 }
 0x126   : > { %2914 = vmatprep.mubr.bf16.mxu1 %v3759_v47 }
 0x127   : > { %2937 = vmatpush3.bf16.msra.mxu1 %v3160_v38 }
 0x128   : > { %2905 = vmatpush3.bf16.msra.mxu0 %v3160_v38 }
 0x12a   : > { %2915 = vmatmul.mubr.bf16.vlgmr.msra.gmra.mrb[32].mxu1 %v3771_v58 }
 0x12b   : > { %2907 = vmatmul.mubr.bf16.vlgmr.msra.gmra.mrb[32].mxu0 %v3743_v24  ;;  %2918 = vmatprep.mubr.bf16.mxu1 %v3774_v61 }
 0x12c   : > { %2910 = vmatprep.mubr.bf16.mxu0 %v3745_v25 }
 0x132   : > { %2919 = vmatmul.mubr.bf16.gmra.mrb[36].mxu1 %v3792_v14 }
 0x133   : > { %2911 = vmatmul.mubr.bf16.gmra.mrb[36].mxu0 %v3757_v46 }
 0x17d   : > { %v2684_v39 = vpop.f32.mrb[0].mxu1 }
 0x17e   : > { %v2652_v40 = vpop.f32.mrb[0].mxu0  ;;  %v786_v41 = vpop.f32.mrb[1].mxu1 }
 0x17f   : > { %v794_v57 = vadd.f32 %v2684_v39, %v2652_v40  ;;  %v649_v42 = vpop.f32.mrb[1].mxu0  ;;  %v2685_v43 = vpop.f32.mrb[2].mxu1 }
 0x180   : > { %v787_v44 = vadd.f32 %v786_v41, %v649_v42  ;;  %v2653_v45 = vpop.f32.mrb[2].mxu0  ;;  %v789_v47 = vpop.f32.mrb[3].mxu1 }
 0x181   : > { %v652_v48 = vpop.f32.mrb[3].mxu0 }
 0x185   : > { %v2688_v49 = vpop.f32.mrb[4].mxu1 }
 0x186   : > { %v2656_v24 = vpop.f32.mrb[4].mxu0  ;;  %v800_v50 = vpop.f32.mrb[5].mxu1 }
 0x187   : > { %v808_v51 = vadd.f32 %v2688_v49, %v2656_v24  ;;  %v663_v52 = vpop.f32.mrb[5].mxu0  ;;  %v2689_v25 = vpop.f32.mrb[6].mxu1 }
 0x188   : > { %v801_v54 = vadd.f32 %v800_v50, %v663_v52  ;;  %v2657_v55 = vpop.f32.mrb[6].mxu0  ;;  %v803_v6 = vpop.f32.mrb[7].mxu1 }
 0x189   : > { %v666_v46 = vpop.f32.mrb[7].mxu0 }
 0x18d   : > { %v2692_v58 = vpop.f32.mrb[8].mxu1 }
 0x18e   : > { %v2660_v59 = vpop.f32.mrb[8].mxu0  ;;  %v814_v61 = vpop.f32.mrb[9].mxu1 }
 0x18f   : > { %v822_v9 = vadd.f32 %v2692_v58, %v2660_v59  ;;  %v677_v10 = vpop.f32.mrb[9].mxu0  ;;  %v2693_v62 = vpop.f32.mrb[10].mxu1 }
 0x190   : > { %v815_v0 = vadd.f32 %v814_v61, %v677_v10  ;;  %v2661_v1 = vpop.f32.mrb[10].mxu0  ;;  %v817_v2 = vpop.f32.mrb[11].mxu1 }
 0x191   : > { %v680_v3 = vpop.f32.mrb[11].mxu0 }
 0x195   : > { %v2696_v4 = vpop.f32.mrb[12].mxu1 }
 0x196   : > { %v2664_v5 = vpop.f32.mrb[12].mxu0  ;;  %v828_v7 = vpop.f32.mrb[13].mxu1 }
 0x197   : > { %v836_v8 = vadd.f32 %v2696_v4, %v2664_v5  ;;  %v691_v11 = vpop.f32.mrb[13].mxu0  ;;  %v2697_v12 = vpop.f32.mrb[14].mxu1 }
 0x198   : > { %v829_v13 = vadd.f32 %v828_v7, %v691_v11  ;;  %v2665_v14 = vpop.f32.mrb[14].mxu0  ;;  %v831_v15 = vpop.f32.mrb[15].mxu1 }
 0x199   : > { %v694_v18 = vpop.f32.mrb[15].mxu0 }
 0x19e   : > { %v2716_v19 = vpop.f32.mrb[16].mxu0 }
 0x19f   : > { %v1005_v63 = vadd.f32 %v2716_v19, %v794_v57  ;;  %v949_v20 = vpop.f32.mrb[17].mxu0 }
 0x1a0   : > { %v1004_v21 = vadd.f32 %v949_v20, %v787_v44  ;;  %v2717_v53 = vpop.f32.mrb[18].mxu0 }
 0x1a1   : > { %v952_v22 = vpop.f32.mrb[19].mxu0 }
 0x1a6   : > { %v2720_v23 = vpop.f32.mrb[20].mxu0 }
 0x1a7   : > { %v1007_v16 = vadd.f32 %v2720_v23, %v808_v51  ;;  %v963_v26 = vpop.f32.mrb[21].mxu0 }
 0x1a8   : > { %v1006_v27 = vadd.f32 %v963_v26, %v801_v54  ;;  %v2721_v28 = vpop.f32.mrb[22].mxu0 }
 0x1a9   : > { %v966_v29 = vpop.f32.mrb[23].mxu0 }
 0x1ae   : > { %v2724_v17 = vpop.f32.mrb[24].mxu0 }
 0x1af   : > { %v1009_v30 = vadd.f32 %v2724_v17, %v822_v9  ;;  %v977_v31 = vpop.f32.mrb[25].mxu0 }
 0x1b0   : > { %v1008_v32 = vadd.f32 %v977_v31, %v815_v0  ;;  %v2725_v33 = vpop.f32.mrb[26].mxu0 }
 0x1b1   : > { %v980_v34 = vpop.f32.mrb[27].mxu0 }
 0x1b6   : > { %v2728_v35 = vpop.f32.mrb[28].mxu0 }
 0x1b7   : > { %v1011_v60 = vadd.f32 %v2728_v35, %v836_v8  ;;  %v991_v56 = vpop.f32.mrb[29].mxu0 }
 0x1b8   : > { %v1010_v36 = vadd.f32 %v991_v56, %v829_v13  ;;  %v2729_v37 = vpop.f32.mrb[30].mxu0 }
 0x1b9   : > { %v994_v38 = vpop.f32.mrb[31].mxu0 }
 0x1dd   : > { %v2812_v39 = vpop.f32.mrb[16].mxu1 }
 0x1de   : > { %v1435_v40 = vpop.f32.mrb[17].mxu1  ;;  %v1534_v57 = vrot.slane %v2812_v39, 1 }
 0x1df   : > { %v2813_v41 = vpop.f32.mrb[18].mxu1  ;;  %v1531_v44 = vrot.slane %v1435_v40, 1 }
 0x1e0   : > { %v1535_v42 = vrot.slane %v2813_v41, 1  ;;  %v1438_v43 = vpop.f32.mrb[19].mxu1 }
 0x1e1   : > { %v1532_v45 = vrot.slane %v1438_v43, 1 }
 0x1e2   : > { %v1536_v47 = vsel %vm1530_vm9, %v1534_v57, %v1535_v42 }
 0x1e3   : > { %v3837_v48 = vadd.f32 %v1536_v47, %v1005_v63  ;;  %v1533_v49 = vsel %vm1530_vm9, %v1531_v44, %v1532_v45 }
 0x1e4   : > { %v3840_v24 = vadd.f32 %v1533_v49, %v1004_v21 }
 0x1e5   : > { %v2816_v50 = vpop.f32.mrb[20].mxu1 }
 0x1e6   : > { %v1451_v51 = vpop.f32.mrb[21].mxu1  ;;  %v1540_v25 = vrot.slane %v2816_v50, 1 }
 0x1e7   : > { %v2817_v52 = vpop.f32.mrb[22].mxu1  ;;  %v1537_v6 = vrot.slane %v1451_v51, 1 }
 0x1e8   : > { %v1541_v54 = vrot.slane %v2817_v52, 1  ;;  %v1454_v55 = vpop.f32.mrb[23].mxu1 }
 0x1e9   : > { %v1538_v46 = vrot.slane %v1454_v55, 1 }
 0x1ea   : > { %v1542_v58 = vsel %vm1530_vm9, %v1540_v25, %v1541_v54 }
 0x1eb   : > { %v3843_v59 = vadd.f32 %v1542_v58, %v1007_v16  ;;  %v1539_v61 = vsel %vm1530_vm9, %v1537_v6, %v1538_v46 }
 0x1ec   : > { %v3846_v9 = vadd.f32 %v1539_v61, %v1006_v27 }
 0x1ed   : > { %v2820_v10 = vpop.f32.mrb[24].mxu1 }
 0x1ee   : > { %v2884_v62 = vpop.f32.mrb[40].mxu0  ;;  %v1467_v0 = vpop.f32.mrb[25].mxu1  ;;  %v1546_v3 = vrot.slane %v2820_v10, 1 }
 0x1ef   : > { %v1864_v1 = vpop.f32.mrb[41].mxu0  ;;  %v2821_v2 = vpop.f32.mrb[26].mxu1  ;;  %v1543_v8 = vrot.slane %v1467_v0, 1 }
 0x1f0   : > { %v1547_v4 = vrot.slane %v2821_v2, 1  ;;  %v2885_v5 = vpop.f32.mrb[42].mxu0  ;;  %v1470_v7 = vpop.f32.mrb[27].mxu1 }
 0x1f1   : > { %v1544_v11 = vrot.slane %v1470_v7, 1  ;;  %v1867_v12 = vpop.f32.mrb[43].mxu0 }
 0x1f2   : > { %v1548_v13 = vsel %vm1530_vm9, %v1546_v3, %v1547_v4 }
 0x1f3   : > { %v1568_v14 = vadd.f32 %v1548_v13, %v1009_v30  ;;  %v1545_v15 = vsel %vm1530_vm9, %v1543_v8, %v1544_v11 }
 0x1f4   : > { %v1567_v18 = vadd.f32 %v1545_v15, %v1008_v32 }
 0x1f5   : > { %v2824_v19 = vpop.f32.mrb[28].mxu1 }
 0x1f6   : > { %v2888_v63 = vpop.f32.mrb[44].mxu0  ;;  %v1483_v20 = vpop.f32.mrb[29].mxu1  ;;  %v1552_v22 = vrot.slane %v2824_v19, 1 }
 0x1f7   : > { %v1880_v21 = vpop.f32.mrb[45].mxu0  ;;  %v2825_v53 = vpop.f32.mrb[30].mxu1  ;;  %v1549_v27 = vrot.slane %v1483_v20, 1 }
 0x1f8   : > { %v1553_v23 = vrot.slane %v2825_v53, 1  ;;  %v2889_v16 = vpop.f32.mrb[46].mxu0  ;;  %v1486_v26 = vpop.f32.mrb[31].mxu1 }
 0x1f9   : > { %v1550_v28 = vrot.slane %v1486_v26, 1  ;;  %v1883_v29 = vpop.f32.mrb[47].mxu0 }
 0x1fa   : > { %v1554_v17 = vsel %vm1530_vm9, %v1552_v22, %v1553_v23 }
 0x1fb   : > { %v3851_v31 = vadd.f32 %v1554_v17, %v1011_v60  ;;  %v1551_v30 = vsel %vm1530_vm9, %v1549_v27, %v1550_v28 }
 0x1fc   : > { %v3854_v33 = vadd.f32 %v1551_v30, %v1010_v36 }
 0x1fd   : > { %v2916_v32 = vpop.f32.mrb[32].mxu1 }
 0x1fe   : > { %v2908_v34 = vpop.f32.mrb[32].mxu0  ;;  %v2938_v35 = vadd.f32 %v2916_v32, %v2884_v62  ;;  %v2026_v56 = vpop.f32.mrb[33].mxu1 }
 0x1ff   : > { %v1994_v37 = vpop.f32.mrb[33].mxu0  ;;  %v2939_v38 = vadd.f32 %v2026_v56, %v1864_v1  ;;  %v2917_v39 = vpop.f32.mrb[34].mxu1  ;;  %v2093_v42 = vrot.slane %v2908_v34, 2 }
 0x200   : > { %v2909_v40 = vpop.f32.mrb[34].mxu0  ;;  %v2940_v41 = vadd.f32 %v2917_v39, %v2885_v5  ;;  %v2029_v57 = vpop.f32.mrb[35].mxu1  ;;  %v2105_v45 = vrot.slane %v2938_v35, 2  ;;  %v2090_v47 = vrot.slane %v1994_v37, 2 }
 0x201   : > { %v2094_v43 = vrot.slane %v2909_v40, 2  ;;  %v1997_v44 = vpop.f32.mrb[35].mxu0  ;;  %v2941_v60 = vadd.f32 %v2029_v57, %v1867_v12  ;;  %v2102_v50 = vrot.slane %v2939_v38, 2 }
 0x202   : > { %v2106_v49 = vrot.slane %v2940_v41, 2  ;;  %v2091_v36 = vrot.slane %v1997_v44, 2 }
 0x203   : > { %v2095_v51 = vsel %vm2089_vm10, %v2093_v42, %v2094_v43  ;;  %v2103_v52 = vrot.slane %v2941_v60, 2 }
 0x204   : > { %v2123_v25 = vadd.f32 %v2095_v51, %v3837_v48  ;;  %v2107_v54 = vsel %vm2089_vm10, %v2105_v45, %v2106_v49  ;;  %v2092_v55 = vsel %vm2089_vm10, %v2090_v47, %v2091_v36 }
 0x205   : > { %v2127_v6 = vadd.f32 %v2107_v54, %v1568_v14  ;;  %v2122_v46 = vadd.f32 %v2092_v55, %v3840_v24  ;;  %v2104_v58 = vsel %vm2089_vm10, %v2102_v50, %v2103_v52  ;;  %v2920_v61 = vpop.f32.mrb[36].mxu1 }
 0x206   : > { %v2160_v10 = vmul.f32 %v2123_v25, %v2123_v25  ;;  %v2126_v62 = vadd.f32 %v2104_v58, %v1567_v18  ;;  %v2912_v0 = vpop.f32.mrb[36].mxu0  ;;  %v2942_v1 = vadd.f32 %v2920_v61, %v2888_v63  ;;  %v2042_v2 = vpop.f32.mrb[37].mxu1 }
 0x207   : > { %v2467_v3 = vpack.c.bf16 %v2123_v25, %v2122_v46  ;;  %v2146_v4 = vadd.f32 %v2123_v25, %v2122_v46  ;;  %v2159_v5 = vmul.f32 %v2122_v46, %v2122_v46  ;;  %v2010_v48 = vpop.f32.mrb[37].mxu0  ;;  %v2921_v7 = vpop.f32.mrb[38].mxu1  ;;  %v2099_v13 = vrot.slane %v2912_v0, 2 }
 0x208   : > { %v2477_v8 = vpack.c.bf16 %v2127_v6, %v2126_v62  ;;  %v2913_v11 = vpop.f32.mrb[38].mxu0  ;;  %v2045_v12 = vpop.f32.mrb[39].mxu1  ;;  %v2943_v14 = vadd.f32 %v2042_v2, %v1880_v21  ;;  %v2096_v19 = vrot.slane %v2010_v48, 2  ;;  %v2944_v63 = vadd.f32 %v2921_v7, %v2889_v16 }
 0x209   : > { %2468 = vst [vmem:[%s3864_s24] sm:$0xff] %v2467_v3   ;;  %v2167_v24 = vadd.f32 %v2160_v10, %v2159_v5  ;;  %v2100_v15 = vrot.slane %v2913_v11, 2  ;;  %v2013_v18 = vpop.f32.mrb[39].mxu0  ;;  %v2945_v53 = vadd.f32 %v2045_v12, %v1883_v29  ;;  %v2111_v22 = vrot.slane %v2942_v1, 2 }
 0x20a   : > { %2488 = vst [vmem:[%s3864_s24 + $0x10] sm:$0xff] %v2477_v8   ;;  %v2097_v20 = vrot.slane %v2013_v18, 2  ;;  %v2108_v23 = vrot.slane %v2943_v14, 2  ;;  %v2112_v28 = vrot.slane %v2944_v63, 2  ;;  %v2163_v39 = vmul.f32 %v2126_v62, %v2126_v62 }
 0x20b   : > { %v2101_v26 = vsel %vm2089_vm10, %v2099_v13, %v2100_v15  ;;  %v2109_v21 = vrot.slane %v2945_v53, 2 }
 0x20c   : > { %v2125_v27 = vadd.f32 %v2101_v26, %v3843_v59  ;;  %v2098_v17 = vsel %vm2089_vm10, %v2096_v19, %v2097_v20  ;;  %v2113_v32 = vsel %vm2089_vm10, %v2111_v22, %v2112_v28 }
 0x20d   : > { %v2124_v30 = vadd.f32 %v2098_v17, %v3846_v9  ;;  %v2110_v34 = vsel %vm2089_vm10, %v2108_v23, %v2109_v21  ;;  %v2129_v16 = vadd.f32 %v2113_v32, %v3851_v31 }
 0x20e   : > { %v2128_v59 = vadd.f32 %v2110_v34, %v3854_v33  ;;  %v2162_v37 = vmul.f32 %v2125_v27, %v2125_v27  ;;  %v2164_v33 = vmul.f32 %v2127_v6, %v2127_v6 }
 0x20f   : > { %v2472_v29 = vpack.c.bf16 %v2125_v27, %v2124_v30  ;;  %v2147_v35 = vadd.f32 %v2146_v4, %v2124_v30  ;;  %v2161_v56 = vmul.f32 %v2124_v30, %v2124_v30 }
 0x210   : > { %v2482_v31 = vpack.c.bf16 %v2129_v16, %v2128_v59 }
 0x211   : > { %2487 = vst [vmem:[%s3864_s24 + $0x8] sm:$0xff] %v2472_v29   ;;  %v2148_v38 = vadd.f32 %v2147_v35, %v2125_v27  ;;  %v2168_v9 = vadd.f32 %v2167_v24, %v2161_v56 }
 0x212   : > { %2489 = vst [vmem:[%s3864_s24 + $0x18] sm:$0xff] %v2482_v31  }
 0x213   : > { %v2149_v40 = vadd.f32 %v2148_v38, %v2126_v62  ;;  %v2169_v41 = vadd.f32 %v2168_v9, %v2162_v37 }
 0x215   : > { %v2170_v57 = vadd.f32 %v2169_v41, %v2163_v39  ;;  %v2150_v42 = vadd.f32 %v2149_v40, %v2127_v6 }
 0x216   : > { %3288 = shalt.err (!%p3285_p13)
}
 0x217   : > { %s3289_s7 = scalar_lea.hbm %s3882_s30, 512  ;;  %s3293_s15 = scalar_lea.hbm %s3965_s4, 1024 }
 0x218   : > { %p3290_p0 = scmp.ne.s32.totalorder %s3882_s30, %s3289_s7  ;;  %p3294_p9 = scmp.lt.u32.totalorder %s3882_s30, %s3965_s4 }
 0x219   : > { %p3295_p12 = scmp.lt.u32.totalorder %s3293_s15, %s3289_s7  ;;  %p3297_p1 = scmp.lt.u32.totalorder %s3289_s7, %s3882_s30 }
 0x21a   : > { %p3291_p5 = pnand %p3290_p0, %p3570_p6 }
 0x21b   : > { %p3296_p2 = por %p3295_p12, %p3294_p9 }
 0x21c   : > { %p3292_p11 = pneg %p3291_p5 }
 0x21d   : > { %p3298_p4 = por %p3297_p1, %p3296_p2 }
 0x21f   : > { %p3299_p8 = pnand %p3298_p4, %p3292_p11 }
 0x221   : > { %3302 = shalt.err (!%p3299_p8)
}
 0x222   : > { %s3391_s14 = smov 64   ;;  %s3392_s11 = smov 4   ;;  %v2151_v43 = vadd.f32 %v2150_v42, %v2128_v59  ;;  %v2165_v44 = vmul.f32 %v2128_v59, %v2128_v59  ;;  %v2171_v60 = vadd.f32 %v2170_v57, %v2164_v33  ;;  %v2166_v45 = vmul.f32 %v2129_v16, %v2129_v16 }
 0x223   : > { %3016 = dma.vmem_to_hbm [thread:$0]  (%p3570_p6), %s3884_s13, 512, %s3882_s30, %s2184_s28, %s3391_s14, %s3391_s14, %s3392_s11  }
 0x224   : > { %v2152_v47 = vadd.f32 %v2151_v43, %v2129_v16  ;;  %v2172_v49 = vadd.f32 %v2171_v60, %v2165_v44  ;;  %s2364_s10 = sshll.u32 %s3621_s17, 1  ;;  %s2443_s13 = sshll.u32 %s3445_s22, 5 }
 0x225   : > { %s293_s30 = scalar_lea.vmem [#allocation12], %s2364_s10  ;;  %s3916_s23 = scalar_lea.hbm %s3966_s5, %s2443_s13 }
 0x226   : > { %v2153_v36 = vrot.slane %v2152_v47, 4  ;;  %v2173_v50 = vadd.f32 %v2172_v49, %v2166_v45  ;;  %s2218_s28 = sshll.u32 %s293_s30, 4  ;;  %s2189_s7 = scalar_lea.sflag [#allocation13], %s3621_s17  ;;  %s3918_s28 = int_to_ptr.vmem [resolvable:$true] %s2218_s28 }
 0x227   : > { %s3303_s8 = scalar_lea.vmem %s3918_s28, 32  ;;  %s3393_s22 = smov [#allocation12]  }
 0x228   : > { %v2154_v51 = vadd.f32 %v2153_v36, %v2152_v47  ;;  %v2174_v52 = vrot.slane %v2173_v50, 4  ;;  %p3304_p3 = scmp.ne.s32.totalorder %s3918_s28, %s3303_s8  ;;  %s3307_s9 = sshll.u32 %s3393_s22, 4  ;;  %s3308_s9 = int_to_ptr.vmem [resolvable:$false] %s3307_s9 }
 0x229   : > { %s3309_s15 = scalar_lea.vmem %s3308_s9, 64  ;;  %p3310_p13 = scmp.lt.s32.totalorder %s3918_s28, %s3308_s9 }
 0x22a   : > { %v2155_v25 = vrot.slane %v2154_v51, 2  ;;  %v2175_v54 = vadd.f32 %v2174_v52, %v2173_v50  ;;  %p3305_p7 = pnand %p3304_p3, %p3570_p6  ;;  %p3311_p0 = scmp.lt.s32.totalorder %s3309_s15, %s3303_s8 }
 0x22c   : > { %v2156_v55 = vadd.f32 %v2155_v25, %v2154_v51  ;;  %v2176_v6 = vrot.slane %v2175_v54, 2  ;;  %p3306_p10 = pneg %p3305_p7  ;;  %p3312_p5 = por %p3311_p0, %p3310_p13 }
 0x22e   : > { %v2157_v46 = vrot.slane %v2156_v55, 1  ;;  %v2177_v58 = vadd.f32 %v2176_v6, %v2175_v54  ;;  %p3313_p11 = pnand %p3312_p5, %p3306_p10 }
 0x230   : > { %v2178_v61 = vrot.slane %v2177_v58, 1  ;;  %v2158_v10 = vadd.f32 %v2157_v46, %v2156_v55 }
 0x232   : > { %v2179_v62 = vadd.f32 %v2178_v61, %v2177_v58 }
 0x234   : > { %v2181_v0 = vsel %vm352_vm0, %v2158_v10, %v2179_v62 }
 0x235   : > { %2182 = vst [vmem:[%s293_s30] sm:$0x3] %v2181_v0 }
 0x236   : > { %3316 = shalt.err (!%p3313_p11)
}
 0x237   : > { %s3317_s17 = scalar_lea.hbm %s3916_s23, 32  ;;  %s3321_s14 = scalar_lea.hbm %s3966_s5, 64 }
 0x238   : > { %p3318_p9 = scmp.ne.s32.totalorder %s3916_s23, %s3317_s17  ;;  %p3322_p1 = scmp.lt.u32.totalorder %s3916_s23, %s3966_s5 }
 0x239   : > { %p3323_p4 = scmp.lt.u32.totalorder %s3321_s14, %s3317_s17  ;;  %p3325_p3 = scmp.lt.u32.totalorder %s3317_s17, %s3916_s23 }
 0x23a   : > { %p3319_p12 = pnand %p3318_p9, %p3570_p6 }
 0x23b   : > { %p3324_p8 = por %p3323_p4, %p3322_p1 }
 0x23c   : > { %p3320_p2 = pneg %p3319_p12 }
 0x23d   : > { %p3326_p7 = por %p3325_p3, %p3324_p8 }
 0x23f   : > { %p3327_p10 = pnand %p3326_p7, %p3320_p2 }
 0x241   : > { %3330 = shalt.err (!%p3327_p10)
}
 0x242   : > { %3017 = dma.vmem_to_hbm [thread:$0]  (%p3570_p6), %s3918_s28, 32, %s3916_s23, %s2189_s7  }
 0x243 PF: > { %s2230_s13 = sand.u32 1, %s3369_s18   ;;  %p3990_p13 = scmp.ne.s32.totalorder %s3971_s25, 0 }
 0x244   : > { %p3991_p0 = scmp.ge.s32.totalorder %s3381_s21, 2  ;;  %s2231_s30 = scalar_lea.sflag [#allocation5], %s2230_s13 }
 0x246   : > { %p3035_p5 = pnand %p3991_p0, %p3990_p13 }
 0x248   : > { %3360 = dma.done.wait (!%p3035_p5), %s2231_s30, 512  }
 0x249   : > { %3362 = vsyncadd (!%p3035_p5), %s2231_s30, 4294966784  ;;  %s2240_s29 = scalar_lea.sflag [#allocation13], %s2230_s13 }
 0x24a   : > { %3364 = dma.done.wait (!%p3035_p5), %s2240_s29, 32  }
 0x24b   : > { %3366 = vsyncadd (!%p3035_p5), %s2240_s29, 4294967264  ;;  %p24_p6 = scmp.ge.s32.totalorder %s3556_s16, 4   ;;  %s3992_s18 = smov %s3373_s19 }
 0x24c   : > { %s3993_s19 = smov %s3377_s20  ;;  %s3994_s20 = smov %s3566_s27 }
 0x24d   : > { %s3995_s21 = smov %s3556_s16  ;;  %26 = sbr.rel (!%p24_p6) target bundleno = 9 (0x9), region = 121 }
 0x254   :  { %2245 = vsyncpa [#allocation4], 1 }
 0x255   :  { %2247 = vsyncpa [#allocation4 + $0x1], 1 }
 0x256   :  { %2248 = vsyncpa [#allocation7], 1 }
 0x257   :  { %2249 = vsyncpa [#allocation10], 1 }
 0x258   :  { %2250 = vsyncpa [#allocation5], 1 }
 0x259   :  { %2252 = vsyncpa [#allocation5 + $0x1], 1 }
 0x25a   :  { %2253 = vsyncpa [#allocation13], 1 }
 0x25b   :  { %2255 = vsyncpa [#allocation13 + $0x1], 1 }

</bundles_post_ra>
